<compile_context>
chip_gen: v6e
topology: v6e:2x2x1
jax: 0.10.0
libtpu: 0.0.40
codegen_flags: <defaults>
</compile_context>

<pallas_src>
import functools
import math

import jax
import jax.numpy as jnp
from jax.experimental import pallas as pl
from jax.experimental.pallas import tpu as pltpu


# ----------------------------------------------------------------------------
# Tile-size helper
# ----------------------------------------------------------------------------
def _pick_tile(dim, pref, align):
    """Largest multiple of `align` that divides `dim` and is <= pref; else full dim."""
    if dim <= pref:
        return dim
    t = pref - (pref % align) if pref % align else pref
    while t >= align:
        if dim % t == 0:
            return t
        t -= align
    return dim  # fallback: whole dim (still a legal full-extent block)


# ----------------------------------------------------------------------------
# Pallas kernels
# ----------------------------------------------------------------------------
def _linear_kernel(x_ref, w_ref, b_ref, o_ref, acc_ref, *, activation):
    # x: (tm, tk) bf16, w: (tk, tn) bf16, b: (1, tn) f32, o: (tm, tn)
    @pl.when(pl.program_id(2) == 0)
    def _():
        acc_ref[...] = jnp.zeros_like(acc_ref)

    acc_ref[...] += jnp.dot(
        x_ref[...], w_ref[...], preferred_element_type=jnp.float32
    )

    @pl.when(pl.program_id(2) == pl.num_programs(2) - 1)
    def _():
        y = acc_ref[...] + b_ref[...]
        if activation == "relu":
            y = jnp.maximum(y, 0.0)
        o_ref[...] = y.astype(o_ref.dtype)


def _add_ln_kernel(x_ref, r_ref, g_ref, b_ref, o_ref, *, eps):
    # Fused residual-add + LayerNorm over rows.  x, r: (tm, D)
    x = x_ref[...].astype(jnp.float32) + r_ref[...].astype(jnp.float32)
    mu = jnp.mean(x, axis=-1, keepdims=True)
    var = jnp.mean(jnp.square(x - mu), axis=-1, keepdims=True)
    inv = jax.lax.rsqrt(var + eps)
    o_ref[...] = ((x - mu) * inv * g_ref[...] + b_ref[...]).astype(o_ref.dtype)


def _attention_core(q, k, v, m, causal, out_dtype):
    # q: (Sq, H, Dh) bf16 (pre-scaled) | k, v: (Sk, H, Dh) bf16 | m: (1, 1, Sk) f32
    Sq = q.shape[0]
    Sk = k.shape[0]
    # (H, Sq, Sk) scores in f32; contraction on last dim (no explicit .T).
    s = jnp.einsum("qhd,khd->hqk", q, k, preferred_element_type=jnp.float32)

    s = jnp.where(m > 0.0, s, -1e9)  # (1,1,Sk) broadcasts over (H,Sq,Sk)
    if causal:
        row = jax.lax.broadcasted_iota(jnp.int32, (Sq, Sk), 0)
        col = jax.lax.broadcasted_iota(jnp.int32, (Sq, Sk), 1)
        s = jnp.where((row >= col)[None, :, :], s, -1e9)

    s = s - jnp.max(s, axis=-1, keepdims=True)
    p = jnp.exp(s)
    denom = jnp.sum(p, axis=-1, keepdims=True)
    p = p * pl.reciprocal(denom, approx=True)

    o = jnp.einsum(
        "hqk,khd->qhd", p.astype(v.dtype), v, preferred_element_type=jnp.float32
    )
    return o.reshape(Sq, -1).astype(out_dtype)


def _mha_self_kernel(qkv_ref, m_ref, o_ref, *, num_heads, scale, causal):
    # qkv: (1, S, 3D) bf16 | m: (1, 1, S) f32 (1=keep) | o: (1, S, D) bf16
    _, S, D3 = qkv_ref.shape
    D = D3 // 3
    Dh = D // num_heads

    qkv = qkv_ref[0]
    q = (qkv[:, :D] * jnp.asarray(scale, qkv.dtype)).reshape(S, num_heads, Dh)
    k = qkv[:, D:2 * D].reshape(S, num_heads, Dh)
    v = qkv[:, 2 * D:].reshape(S, num_heads, Dh)

    o_ref[0] = _attention_core(q, k, v, m_ref[...], causal, o_ref.dtype)


def _mha_cross_kernel(q_ref, kv_ref, m_ref, o_ref, *, num_heads, scale, causal):
    # q: (1, Sq, D) bf16 | kv: (1, Sk, 2D) bf16 | m: (1, 1, Sk) f32 (1=keep)
    _, Sq, D = q_ref.shape
    Sk = kv_ref.shape[1]
    Dh = D // num_heads

    q = (q_ref[0] * jnp.asarray(scale, q_ref.dtype)).reshape(Sq, num_heads, Dh)
    kv = kv_ref[0]
    k = kv[:, :D].reshape(Sk, num_heads, Dh)
    v = kv[:, D:].reshape(Sk, num_heads, Dh)

    o_ref[0] = _attention_core(q, k, v, m_ref[...], causal, o_ref.dtype)


# ----------------------------------------------------------------------------
# Pallas wrappers
# ----------------------------------------------------------------------------
def linear(x, w, b, activation=None, out_dtype=jnp.float32):
    # x: (M, K), w: (K, N), b: (N,)
    M, K = x.shape
    N = w.shape[1]
    tm = _pick_tile(M, 256, 8)
    tn = _pick_tile(N, 512, 128)
    tk = _pick_tile(K, 512, 128)
    grid = (M // tm, N // tn, K // tk)

    xb = x.astype(jnp.bfloat16)
    wb = w.astype(jnp.bfloat16)
    bb = b.reshape(1, N).astype(jnp.float32)

    return pl.pallas_call(
        functools.partial(_linear_kernel, activation=activation),
        out_shape=jax.ShapeDtypeStruct((M, N), out_dtype),
        grid_spec=pltpu.PrefetchScalarGridSpec(
            num_scalar_prefetch=0,
            grid=grid,
            in_specs=[
                pl.BlockSpec((tm, tk), lambda i, j, k: (i, k)),
                pl.BlockSpec((tk, tn), lambda i, j, k: (k, j)),
                pl.BlockSpec((1, tn), lambda i, j, k: (0, j)),
            ],
            out_specs=pl.BlockSpec((tm, tn), lambda i, j, k: (i, j)),
            scratch_shapes=[pltpu.VMEM((tm, tn), jnp.float32)],
        ),
        compiler_params=pltpu.CompilerParams(
            dimension_semantics=("parallel", "parallel", "arbitrary")
        ),
    )(xb, wb, bb)


def add_layernorm(x, res, gamma, beta, eps=1e-5):
    # Fused (x + res) -> LayerNorm.  x, res: (M, D)
    M, D = x.shape
    tm = _pick_tile(M, 512, 8)
    return pl.pallas_call(
        functools.partial(_add_ln_kernel, eps=eps),
        out_shape=jax.ShapeDtypeStruct((M, D), jnp.float32),
        grid=(M // tm,),
        in_specs=[
            pl.BlockSpec((tm, D), lambda i: (i, 0)),
            pl.BlockSpec((tm, D), lambda i: (i, 0)),
            pl.BlockSpec((1, D), lambda i: (0, 0)),
            pl.BlockSpec((1, D), lambda i: (0, 0)),
        ],
        out_specs=pl.BlockSpec((tm, D), lambda i: (i, 0)),
        compiler_params=pltpu.CompilerParams(dimension_semantics=("parallel",)),
    )(x, res, gamma.reshape(1, D), beta.reshape(1, D))


def mha_self_attention(qkv, mask2d, num_heads, causal):
    # qkv: (B, S, 3D) bf16 | mask2d: (B, S) (1 keep / 0 pad)
    B, S, D3 = qkv.shape
    D = D3 // 3
    scale = 1.0 / math.sqrt(D // num_heads)
    mask3 = mask2d.reshape(B, 1, S).astype(jnp.float32)
    return pl.pallas_call(
        functools.partial(
            _mha_self_kernel, num_heads=num_heads, scale=scale, causal=causal
        ),
        out_shape=jax.ShapeDtypeStruct((B, S, D), jnp.bfloat16),
        grid=(B,),
        in_specs=[
            pl.BlockSpec((1, S, D3), lambda b: (b, 0, 0)),
            pl.BlockSpec((1, 1, S), lambda b: (b, 0, 0)),
        ],
        out_specs=pl.BlockSpec((1, S, D), lambda b: (b, 0, 0)),
        compiler_params=pltpu.CompilerParams(dimension_semantics=("parallel",)),
    )(qkv, mask3)


def mha_cross_attention(q, kv, mask2d, num_heads):
    # q: (B, Sq, D) bf16 | kv: (B, Sk, 2D) bf16 | mask2d: (B, Sk) (1 keep / 0 pad)
    B, Sq, D = q.shape
    Sk = kv.shape[1]
    scale = 1.0 / math.sqrt(D // num_heads)
    mask3 = mask2d.reshape(B, 1, Sk).astype(jnp.float32)
    return pl.pallas_call(
        functools.partial(
            _mha_cross_kernel, num_heads=num_heads, scale=scale, causal=False
        ),
        out_shape=jax.ShapeDtypeStruct((B, Sq, D), jnp.bfloat16),
        grid=(B,),
        in_specs=[
            pl.BlockSpec((1, Sq, D), lambda b: (b, 0, 0)),
            pl.BlockSpec((1, Sk, 2 * D), lambda b: (b, 0, 0)),
            pl.BlockSpec((1, 1, Sk), lambda b: (b, 0, 0)),
        ],
        out_specs=pl.BlockSpec((1, Sq, D), lambda b: (b, 0, 0)),
        compiler_params=pltpu.CompilerParams(dimension_semantics=("parallel",)),
    )(q, kv, mask3)


# ----------------------------------------------------------------------------
# Model pieces (glue in plain JAX, compute in Pallas)
# ----------------------------------------------------------------------------
def positional_encoding(max_len, d_model):
    pos = jnp.arange(max_len, dtype=jnp.float32)[:, None]
    i = jnp.arange(0, d_model, 2, dtype=jnp.float32)[None, :]
    div = jnp.exp(-i * (math.log(10000.0) / d_model))
    pe = jnp.zeros((max_len, d_model), jnp.float32)
    pe = pe.at[:, 0::2].set(jnp.sin(pos * div))
    pe = pe.at[:, 1::2].set(jnp.cos(pos * div))
    return pe


def self_attention_block(x, mask2d, p, num_heads, causal=False):
    # Fused QKV projection: one (D, 3D) matmul launch for the whole block.
    B, S, D = x.shape
    qkv = linear(
        x.reshape(B * S, D), p["wqkv"], p["bqkv"], out_dtype=jnp.bfloat16
    ).reshape(B, S, 3 * D)
    o = mha_self_attention(qkv, mask2d, num_heads, causal)
    return linear(o.reshape(B * S, D), p["wo"], p["bo"]).reshape(B, S, D)


def cross_attention_block(x_q, memory, mask2d, p, num_heads):
    B, Sq, D = x_q.shape
    Sk = memory.shape[1]
    q = linear(
        x_q.reshape(B * Sq, D), p["wq"], p["bq"], out_dtype=jnp.bfloat16
    ).reshape(B, Sq, D)
    kv = linear(
        memory.reshape(B * Sk, D), p["wkv"], p["bkv"], out_dtype=jnp.bfloat16
    ).reshape(B, Sk, 2 * D)
    o = mha_cross_attention(q, kv, mask2d, num_heads)
    return linear(o.reshape(B * Sq, D), p["wo"], p["bo"]).reshape(B, Sq, D)


def feed_forward(x, p):
    B, S, D = x.shape
    h = linear(
        x.reshape(B * S, D), p["w1"], p["b1"], activation="relu",
        out_dtype=jnp.bfloat16,
    )
    return linear(h, p["w2"], p["b2"]).reshape(B, S, D)


def encoder_layer(x, src_mask2d, p, num_heads):
    B, S, D = x.shape
    a = self_attention_block(x, src_mask2d, p["self_attn"], num_heads)
    x = add_layernorm(
        x.reshape(B * S, D), a.reshape(B * S, D), p["ln1_g"], p["ln1_b"]
    ).reshape(B, S, D)
    f = feed_forward(x, p["ffn"])
    x = add_layernorm(
        x.reshape(B * S, D), f.reshape(B * S, D), p["ln2_g"], p["ln2_b"]
    ).reshape(B, S, D)
    return x


def decoder_layer(x, memory, src_mask2d, tgt_mask2d, p, num_heads):
    B, S, D = x.shape
    a = self_attention_block(
        x, tgt_mask2d, p["self_attn"], num_heads, causal=True
    )
    x = add_layernorm(
        x.reshape(B * S, D), a.reshape(B * S, D), p["ln1_g"], p["ln1_b"]
    ).reshape(B, S, D)
    c = cross_attention_block(x, memory, src_mask2d, p["cross_attn"], num_heads)
    x = add_layernorm(
        x.reshape(B * S, D), c.reshape(B * S, D), p["ln2_g"], p["ln2_b"]
    ).reshape(B, S, D)
    f = feed_forward(x, p["ffn"])
    x = add_layernorm(
        x.reshape(B * S, D), f.reshape(B * S, D), p["ln3_g"], p["ln3_b"]
    ).reshape(B, S, D)
    return x


def embed(tokens, emb_table, pe, d_model):
    # tokens: (B, S) int32
    x = jnp.take(emb_table, tokens, axis=0) * math.sqrt(d_model)
    return x + pe[None, : tokens.shape[1], :]


def transformer_forward(params, src, tgt, src_mask_2d, tgt_mask_2d,
                        num_heads, d_model):
    """src/tgt: (B, S) int32.  *_mask_2d: (B, S) float (1 keep / 0 pad).
    Decoder self-attention combines the tgt padding mask with an in-kernel
    causal mask (matches PyTorch Transformer semantics for padded targets)."""
    B, S_src = src.shape
    S_tgt = tgt.shape[1]
    pe = params["pe"]

    # encoder
    x = embed(src, params["src_emb"], pe, d_model)
    for lp in params["enc_layers"]:
        x = encoder_layer(x, src_mask_2d, lp, num_heads)
    memory = x

    # decoder
    y = embed(tgt, params["tgt_emb"], pe, d_model)
    for lp in params["dec_layers"]:
        y = decoder_layer(y, memory, src_mask_2d, tgt_mask_2d, lp, num_heads)

    # generator
    logits = linear(
        y.reshape(B * S_tgt, d_model), params["gen_w"], params["gen_b"]
    ).reshape(B, S_tgt, params["gen_w"].shape[1])
    return logits


# ----------------------------------------------------------------------------
# Deterministic parameter init
# ----------------------------------------------------------------------------
def _init_params(key, src_vocab, tgt_vocab, d_model, num_layers, d_ff, max_seq):
    def nrm(k, shape):
        return 0.02 * jax.random.normal(k, shape, jnp.float32)

    keys = iter(jax.random.split(key, 16 + num_layers * 32))

    def self_attn_params():
        return {
            # fused Q|K|V projection: (D, 3D)
            "wqkv": nrm(next(keys), (d_model, 3 * d_model)),
            "bqkv": jnp.zeros((3 * d_model,), jnp.float32),
            "wo": nrm(next(keys), (d_model, d_model)),
            "bo": jnp.zeros((d_model,), jnp.float32),
        }

    def cross_attn_params():
        return {
            "wq": nrm(next(keys), (d_model, d_model)),
            "bq": jnp.zeros((d_model,), jnp.float32),
            # fused K|V projection: (D, 2D)
            "wkv": nrm(next(keys), (d_model, 2 * d_model)),
            "bkv": jnp.zeros((2 * d_model,), jnp.float32),
            "wo": nrm(next(keys), (d_model, d_model)),
            "bo": jnp.zeros((d_model,), jnp.float32),
        }

    def ffn_params():
        return {
            "w1": nrm(next(keys), (d_model, d_ff)),
            "b1": jnp.zeros((d_ff,), jnp.float32),
            "w2": nrm(next(keys), (d_ff, d_model)),
            "b2": jnp.zeros((d_model,), jnp.float32),
        }

    def enc_layer_params():
        return {
            "self_attn": self_attn_params(), "ffn": ffn_params(),
            "ln1_g": jnp.ones((d_model,), jnp.float32),
            "ln1_b": jnp.zeros((d_model,), jnp.float32),
            "ln2_g": jnp.ones((d_model,), jnp.float32),
            "ln2_b": jnp.zeros((d_model,), jnp.float32),
        }

    def dec_layer_params():
        return {
            "self_attn": self_attn_params(), "cross_attn": cross_attn_params(),
            "ffn": ffn_params(),
            "ln1_g": jnp.ones((d_model,), jnp.float32),
            "ln1_b": jnp.zeros((d_model,), jnp.float32),
            "ln2_g": jnp.ones((d_model,), jnp.float32),
            "ln2_b": jnp.zeros((d_model,), jnp.float32),
            "ln3_g": jnp.ones((d_model,), jnp.float32),
            "ln3_b": jnp.zeros((d_model,), jnp.float32),
        }

    return {
        "src_emb": nrm(next(keys), (src_vocab, d_model)),
        "tgt_emb": nrm(next(keys), (tgt_vocab, d_model)),
        "pe": positional_encoding(max_seq, d_model),
        "enc_layers": [enc_layer_params() for _ in range(num_layers)],
        "dec_layers": [dec_layer_params() for _ in range(num_layers)],
        "gen_w": nrm(next(keys), (d_model, tgt_vocab)),
        "gen_b": jnp.zeros((tgt_vocab,), jnp.float32),
    }


# ----------------------------------------------------------------------------
if __name__ == "__main__":
    SRC_VOCAB = 256
    TGT_VOCAB = 256
    D_MODEL = 128       # lane-dense last dim (>=128)
    NUM_HEADS = 4       # head_dim = 32, handled inside the attention kernel
    NUM_LAYERS = 2
    D_FF = 256
    MAX_SEQ = 16
    B = 2
    S = 16

    key = jax.random.PRNGKey(0)
    kp, ks, kt = jax.random.split(key, 3)
    params = _init_params(kp, SRC_VOCAB, TGT_VOCAB, D_MODEL, NUM_LAYERS, D_FF, MAX_SEQ)

    src = jax.random.randint(ks, (B, S), 0, SRC_VOCAB, dtype=jnp.int32)
    tgt = jax.random.randint(kt, (B, S), 0, TGT_VOCAB, dtype=jnp.int32)
    src_mask = jnp.ones((B, S), jnp.float32)  # no padding
    tgt_mask = jnp.ones((B, S), jnp.float32)  # no padding (causal built in-kernel)

    fwd = jax.jit(
        functools.partial(transformer_forward, num_heads=NUM_HEADS, d_model=D_MODEL)
    )
    logits = fwd(params, src, tgt, src_mask, tgt_mask)
    jax.block_until_ready(logits)
    assert logits.shape == (B, S, TGT_VOCAB)
    assert bool(jnp.all(jnp.isfinite(logits)))
    print("KERNEL_OK")
</pallas_src>

<mosaic_0001>
module attributes {stable_mosaic.version = 11 : i64} {
  func.func @_linear_kernel(%arg0: i32, %arg1: i32, %arg2: i32, %arg3: memref<32x128xbf16, #tpu.memory_space<vmem>>, %arg4: memref<128x384xbf16, #tpu.memory_space<vmem>>, %arg5: memref<1x384xf32, #tpu.memory_space<vmem>>, %arg6: memref<32x384xbf16, #tpu.memory_space<vmem>>, %arg7: memref<32x384xf32, #tpu.memory_space<vmem>>) attributes {dimension_semantics = [#tpu.dimension_semantics<parallel>, #tpu.dimension_semantics<parallel>, #tpu.dimension_semantics<arbitrary>], iteration_bounds = array<i64: 1, 1, 1>, scalar_prefetch = 0 : i64, scratch_operands = 1 : i64, tpu.core_type = #tpu.core_type<tc>, window_params = [{transform_indices = @transform_0, window_bounds = array<i64: 32, 128>}, {transform_indices = @transform_1, window_bounds = array<i64: 128, 384>}, {transform_indices = @transform_2, window_bounds = array<i64: 1, 384>}, {transform_indices = @transform_3, window_bounds = array<i64: 32, 384>}]} {
    %c0_i32 = arith.constant 0 : i32
    %0 = arith.cmpi eq, %arg2, %c0_i32 : i32
    %1 = arith.extui %0 : i1 to i32
    %c0_i32_0 = arith.constant 0 : i32
    %2 = arith.cmpi ne, %1, %c0_i32_0 : i32
    scf.if %2 {
      %cst_10 = arith.constant 0.000000e+00 : f32
      %12 = vector.broadcast %cst_10 : f32 to vector<32x384xf32>
      %c0_11 = arith.constant 0 : index
      %c0_12 = arith.constant 0 : index
      %13 = vector.load %arg7[%c0_11, %c0_12] : memref<32x384xf32, #tpu.memory_space<vmem>>, vector<32x384xf32>
      tpu.vector_store %arg7[%c0_11, %c0_12], %12 {strides = array<i32>} : memref<32x384xf32, #tpu.memory_space<vmem>>, vector<32x384xf32>,
    } else {
    }
    %c0 = arith.constant 0 : index
    %c0_1 = arith.constant 0 : index
    %3 = vector.load %arg7[%c0, %c0_1] : memref<32x384xf32, #tpu.memory_space<vmem>>, vector<32x384xf32>
    %c0_2 = arith.constant 0 : index
    %c0_3 = arith.constant 0 : index
    %4 = vector.load %arg3[%c0_2, %c0_3] : memref<32x128xbf16, #tpu.memory_space<vmem>>, vector<32x128xbf16>
    %c0_4 = arith.constant 0 : index
    %c0_5 = arith.constant 0 : index
    %5 = vector.load %arg4[%c0_4, %c0_5] : memref<128x384xbf16, #tpu.memory_space<vmem>>, vector<128x384xbf16>
    %cst = arith.constant dense<0.000000e+00> : vector<32x384xf32>
    %6 = tpu.matmul %4, %5, %cst {dimension_numbers = #tpu.dot_dimension_numbers<[1], [0], [0], [1], [0, 0, 1, 1], [], []>} : vector<32x128xbf16>, vector<128x384xbf16>, vector<32x384xf32> -> vector<32x384xf32>
    %7 = arith.addf %3, %6 : vector<32x384xf32>
    %c0_6 = arith.constant 0 : index
    %c0_7 = arith.constant 0 : index
    %8 = vector.load %arg7[%c0_6, %c0_7] : memref<32x384xf32, #tpu.memory_space<vmem>>, vector<32x384xf32>
    tpu.vector_store %arg7[%c0_6, %c0_7], %7 {strides = array<i32>} : memref<32x384xf32, #tpu.memory_space<vmem>>, vector<32x384xf32>,
    %c0_i32_8 = arith.constant 0 : i32
    %9 = arith.cmpi eq, %arg2, %c0_i32_8 : i32
    %10 = arith.extui %9 : i1 to i32
    %c0_i32_9 = arith.constant 0 : i32
    %11 = arith.cmpi ne, %10, %c0_i32_9 : i32
    scf.if %11 {
      %c0_10 = arith.constant 0 : index
      %c0_11 = arith.constant 0 : index
      %12 = vector.load %arg7[%c0_10, %c0_11] : memref<32x384xf32, #tpu.memory_space<vmem>>, vector<32x384xf32>
      %c0_12 = arith.constant 0 : index
      %c0_13 = arith.constant 0 : index
      %13 = vector.load %arg5[%c0_12, %c0_13] : memref<1x384xf32, #tpu.memory_space<vmem>>, vector<1x384xf32>
      %14 = vector.broadcast %13 : vector<1x384xf32> to vector<32x384xf32>
      %15 = arith.addf %12, %14 : vector<32x384xf32>
      %16 = arith.truncf %15 : vector<32x384xf32> to vector<32x384xbf16>
      %c0_14 = arith.constant 0 : index
      %c0_15 = arith.constant 0 : index
      %17 = vector.load %arg6[%c0_14, %c0_15] : memref<32x384xbf16, #tpu.memory_space<vmem>>, vector<32x384xbf16>
      tpu.vector_store %arg6[%c0_14, %c0_15], %16 {strides = array<i32>} : memref<32x384xbf16, #tpu.memory_space<vmem>>, vector<32x384xbf16>,
    } else {
    }
    return
  }
  func.func @transform_0(%arg0: i32, %arg1: i32, %arg2: i32) -> (i32, i32) {
    %c0_i32 = arith.constant 0 : i32
    return %arg0, %arg2 : i32, i32
  }
  func.func @transform_1(%arg0: i32, %arg1: i32, %arg2: i32) -> (i32, i32) {
    %c0_i32 = arith.constant 0 : i32
    return %arg2, %arg1 : i32, i32
  }
  func.func @transform_2(%arg0: i32, %arg1: i32, %arg2: i32) -> (i32, i32) {
    %c0_i32 = arith.constant 0 : i32
    %c0_i32_0 = arith.constant 0 : i32
    return %c0_i32, %arg1 : i32, i32
  }
  func.func @transform_3(%arg0: i32, %arg1: i32, %arg2: i32) -> (i32, i32) {
    %c0_i32 = arith.constant 0 : i32
    return %arg0, %arg1 : i32, i32
  }
}

module attributes {stable_mosaic.version = 11 : i64} {
  func.func @_mha_self_kernel(%arg0: i32, %arg1: memref<1x16x384xbf16, #tpu.memory_space<vmem>>, %arg2: memref<1x1x16xf32, #tpu.memory_space<vmem>>, %arg3: memref<1x16x128xbf16, #tpu.memory_space<vmem>>) attributes {dimension_semantics = [#tpu.dimension_semantics<parallel>], iteration_bounds = array<i64: 2>, scalar_prefetch = 0 : i64, scratch_operands = 0 : i64, tpu.core_type = #tpu.core_type<tc>, window_params = [{transform_indices = @transform_0, window_bounds = array<i64: 1, 16, 384>}, {transform_indices = @transform_1, window_bounds = array<i64: 1, 1, 16>}, {transform_indices = @transform_2, window_bounds = array<i64: 1, 16, 128>}]} {
    %c0 = arith.constant 0 : index
    %c0_0 = arith.constant 0 : index
    %c0_1 = arith.constant 0 : index
    %0 = vector.load %arg1[%c0, %c0_0, %c0_1] : memref<1x16x384xbf16, #tpu.memory_space<vmem>>, vector<1x16x384xbf16>
    %1 = vector.shape_cast %0 : vector<1x16x384xbf16> to vector<16x384xbf16>
    %2 = vector.extract_strided_slice %1 {offsets = [0, 0], sizes = [16, 128], strides = [1, 1]} : vector<16x384xbf16> to vector<16x128xbf16>
    %cst = arith.constant 1.767580e-01 : bf16
    %3 = vector.broadcast %cst : bf16 to vector<16x128xbf16>
    %4 = arith.mulf %2, %3 : vector<16x128xbf16>
    %5 = vector.shape_cast %4 : vector<16x128xbf16> to vector<16x4x32xbf16>
    %6 = vector.extract_strided_slice %1 {offsets = [0, 128], sizes = [16, 128], strides = [1, 1]} : vector<16x384xbf16> to vector<16x128xbf16>
    %7 = vector.shape_cast %6 : vector<16x128xbf16> to vector<16x4x32xbf16>
    %8 = vector.extract_strided_slice %1 {offsets = [0, 256], sizes = [16, 128], strides = [1, 1]} : vector<16x384xbf16> to vector<16x128xbf16>
    %9 = vector.shape_cast %8 : vector<16x128xbf16> to vector<16x4x32xbf16>
    %c0_2 = arith.constant 0 : index
    %c0_3 = arith.constant 0 : index
    %c0_4 = arith.constant 0 : index
    %10 = vector.load %arg2[%c0_2, %c0_3, %c0_4] : memref<1x1x16xf32, #tpu.memory_space<vmem>>, vector<1x1x16xf32>
    "tpu.trace_start"() <{level = 10 : i32, message = "qhd,khd->hqk"}> : () -> ()
    %cst_5 = arith.constant dense<0.000000e+00> : vector<4x16x16xf32>
    %11 = tpu.matmul %5, %7, %cst_5 {dimension_numbers = #tpu.dot_dimension_numbers<[2], [2], [0], [0], [0, 1, 0, 0, 1, 0], [1], [1]>} : vector<16x4x32xbf16>, vector<16x4x32xbf16>, vector<4x16x16xf32> -> vector<4x16x16xf32>
    %cst_6 = arith.constant 0.000000e+00 : f32
    "tpu.trace_stop"() : () -> ()
    %12 = vector.broadcast %cst_6 : f32 to vector<1x1x16xf32>
    %13 = arith.cmpf ogt, %10, %12 : vector<1x1x16xf32>
    %cst_7 = arith.constant -1.000000e+09 : f32
    %14 = vector.shape_cast %13 : vector<1x1x16xi1> to vector<1x1x16xi1>
    %15 = vector.broadcast %14 : vector<1x1x16xi1> to vector<4x16x16xi1>
    %16 = vector.broadcast %cst_7 : f32 to vector<4x16x16xf32>
    %17 = arith.select %15, %11, %16 : vector<4x16x16xi1>, vector<4x16x16xf32>
    %cst_8 = arith.constant dense<0xFF800000> : vector<4x16xf32>
    %18 = vector.multi_reduction <maximumf>, %17, %cst_8 [2] : vector<4x16x16xf32> to vector<4x16xf32>
    %19 = vector.shape_cast %18 : vector<4x16xf32> to vector<4x16x1xf32>
    %20 = vector.broadcast %19 : vector<4x16x1xf32> to vector<4x16x16xf32>
    %21 = arith.subf %17, %20 : vector<4x16x16xf32>
    %22 = math.exp %21 : vector<4x16x16xf32>
    %cst_9 = arith.constant dense<0.000000e+00> : vector<4x16xf32>
    %23 = vector.multi_reduction <add>, %22, %cst_9 [2] : vector<4x16x16xf32> to vector<4x16xf32>
    %24 = vector.shape_cast %23 : vector<4x16xf32> to vector<4x16x1xf32>
    %25 = tpu.reciprocal %24 {approx = true} : vector<4x16x1xf32> -> vector<4x16x1xf32>
    %26 = vector.broadcast %25 : vector<4x16x1xf32> to vector<4x16x16xf32>
    %27 = arith.mulf %22, %26 : vector<4x16x16xf32>
    %28 = arith.truncf %27 : vector<4x16x16xf32> to vector<4x16x16xbf16>
    "tpu.trace_start"() <{level = 10 : i32, message = "hqk,khd->qhd"}> : () -> ()
    %cst_10 = arith.constant dense<0.000000e+00> : vector<4x32x16xf32>
    %29 = tpu.matmul %9, %28, %cst_10 {dimension_numbers = #tpu.dot_dimension_numbers<[0], [2], [2], [1], [0, 1, 0, 2, 1, 1], [1], [0]>} : vector<16x4x32xbf16>, vector<4x16x16xbf16>, vector<4x32x16xf32> -> vector<4x32x16xf32>
    %30 = tpu.transpose %29, [2, 0, 1] : vector<4x32x16xf32> -> vector<16x4x32xf32>
    "tpu.trace_stop"() : () -> ()
    %31 = vector.shape_cast %30 : vector<16x4x32xf32> to vector<16x128xf32>
    %32 = arith.truncf %31 : vector<16x128xf32> to vector<16x128xbf16>
    %c0_11 = arith.constant 0 : index
    %c0_12 = arith.constant 0 : index
    %c0_13 = arith.constant 0 : index
    %33 = vector.load %arg3[%c0_11, %c0_12, %c0_13] : memref<1x16x128xbf16, #tpu.memory_space<vmem>>, vector<1x16x128xbf16>
    %34 = vector.shape_cast %33 : vector<1x16x128xbf16> to vector<16x128xbf16>
    %35 = vector.shape_cast %32 : vector<16x128xbf16> to vector<1x16x128xbf16>
    tpu.vector_store %arg3[%c0_11, %c0_12, %c0_13], %35 {strides = array<i32>} : memref<1x16x128xbf16, #tpu.memory_space<vmem>>, vector<1x16x128xbf16>,
    return
  }
  func.func @transform_0(%arg0: i32) -> (i32, i32, i32) {
    %c0_i32 = arith.constant 0 : i32
    %c0_i32_0 = arith.constant 0 : i32
    %c0_i32_1 = arith.constant 0 : i32
    return %arg0, %c0_i32, %c0_i32_0 : i32, i32, i32
  }
  func.func @transform_1(%arg0: i32) -> (i32, i32, i32) {
    %c0_i32 = arith.constant 0 : i32
    %c0_i32_0 = arith.constant 0 : i32
    %c0_i32_1 = arith.constant 0 : i32
    return %arg0, %c0_i32, %c0_i32_0 : i32, i32, i32
  }
  func.func @transform_2(%arg0: i32) -> (i32, i32, i32) {
    %c0_i32 = arith.constant 0 : i32
    %c0_i32_0 = arith.constant 0 : i32
    %c0_i32_1 = arith.constant 0 : i32
    return %arg0, %c0_i32, %c0_i32_0 : i32, i32, i32
  }
}

module attributes {stable_mosaic.version = 11 : i64} {
  func.func @_linear_kernel(%arg0: i32, %arg1: i32, %arg2: i32, %arg3: memref<32x128xbf16, #tpu.memory_space<vmem>>, %arg4: memref<128x128xbf16, #tpu.memory_space<vmem>>, %arg5: memref<1x128xf32, #tpu.memory_space<vmem>>, %arg6: memref<32x128xf32, #tpu.memory_space<vmem>>, %arg7: memref<32x128xf32, #tpu.memory_space<vmem>>) attributes {dimension_semantics = [#tpu.dimension_semantics<parallel>, #tpu.dimension_semantics<parallel>, #tpu.dimension_semantics<arbitrary>], iteration_bounds = array<i64: 1, 1, 1>, scalar_prefetch = 0 : i64, scratch_operands = 1 : i64, tpu.core_type = #tpu.core_type<tc>, window_params = [{transform_indices = @transform_0, window_bounds = array<i64: 32, 128>}, {transform_indices = @transform_1, window_bounds = array<i64: 128, 128>}, {transform_indices = @transform_2, window_bounds = array<i64: 1, 128>}, {transform_indices = @transform_3, window_bounds = array<i64: 32, 128>}]} {
    %c0_i32 = arith.constant 0 : i32
    %0 = arith.cmpi eq, %arg2, %c0_i32 : i32
    %1 = arith.extui %0 : i1 to i32
    %c0_i32_0 = arith.constant 0 : i32
    %2 = arith.cmpi ne, %1, %c0_i32_0 : i32
    scf.if %2 {
      %cst_10 = arith.constant 0.000000e+00 : f32
      %12 = vector.broadcast %cst_10 : f32 to vector<32x128xf32>
      %c0_11 = arith.constant 0 : index
      %c0_12 = arith.constant 0 : index
      %13 = vector.load %arg7[%c0_11, %c0_12] : memref<32x128xf32, #tpu.memory_space<vmem>>, vector<32x128xf32>
      tpu.vector_store %arg7[%c0_11, %c0_12], %12 {strides = array<i32>} : memref<32x128xf32, #tpu.memory_space<vmem>>, vector<32x128xf32>,
    } else {
    }
    %c0 = arith.constant 0 : index
    %c0_1 = arith.constant 0 : index
    %3 = vector.load %arg7[%c0, %c0_1] : memref<32x128xf32, #tpu.memory_space<vmem>>, vector<32x128xf32>
    %c0_2 = arith.constant 0 : index
    %c0_3 = arith.constant 0 : index
    %4 = vector.load %arg3[%c0_2, %c0_3] : memref<32x128xbf16, #tpu.memory_space<vmem>>, vector<32x128xbf16>
    %c0_4 = arith.constant 0 : index
    %c0_5 = arith.constant 0 : index
    %5 = vector.load %arg4[%c0_4, %c0_5] : memref<128x128xbf16, #tpu.memory_space<vmem>>, vector<128x128xbf16>
    %cst = arith.constant dense<0.000000e+00> : vector<32x128xf32>
    %6 = tpu.matmul %4, %5, %cst {dimension_numbers = #tpu.dot_dimension_numbers<[1], [0], [0], [1], [0, 0, 1, 1], [], []>} : vector<32x128xbf16>, vector<128x128xbf16>, vector<32x128xf32> -> vector<32x128xf32>
    %7 = arith.addf %3, %6 : vector<32x128xf32>
    %c0_6 = arith.constant 0 : index
    %c0_7 = arith.constant 0 : index
    %8 = vector.load %arg7[%c0_6, %c0_7] : memref<32x128xf32, #tpu.memory_space<vmem>>, vector<32x128xf32>
    tpu.vector_store %arg7[%c0_6, %c0_7], %7 {strides = array<i32>} : memref<32x128xf32, #tpu.memory_space<vmem>>, vector<32x128xf32>,
    %c0_i32_8 = arith.constant 0 : i32
    %9 = arith.cmpi eq, %arg2, %c0_i32_8 : i32
    %10 = arith.extui %9 : i1 to i32
    %c0_i32_9 = arith.constant 0 : i32
    %11 = arith.cmpi ne, %10, %c0_i32_9 : i32
    scf.if %11 {
      %c0_10 = arith.constant 0 : index
      %c0_11 = arith.constant 0 : index
      %12 = vector.load %arg7[%c0_10, %c0_11] : memref<32x128xf32, #tpu.memory_space<vmem>>, vector<32x128xf32>
      %c0_12 = arith.constant 0 : index
      %c0_13 = arith.constant 0 : index
      %13 = vector.load %arg5[%c0_12, %c0_13] : memref<1x128xf32, #tpu.memory_space<vmem>>, vector<1x128xf32>
      %14 = vector.broadcast %13 : vector<1x128xf32> to vector<32x128xf32>
      %15 = arith.addf %12, %14 : vector<32x128xf32>
      %c0_14 = arith.constant 0 : index
      %c0_15 = arith.constant 0 : index
      %16 = vector.load %arg6[%c0_14, %c0_15] : memref<32x128xf32, #tpu.memory_space<vmem>>, vector<32x128xf32>
      tpu.vector_store %arg6[%c0_14, %c0_15], %15 {strides = array<i32>} : memref<32x128xf32, #tpu.memory_space<vmem>>, vector<32x128xf32>,
    } else {
    }
    return
  }
  func.func @transform_0(%arg0: i32, %arg1: i32, %arg2: i32) -> (i32, i32) {
    %c0_i32 = arith.constant 0 : i32
    return %arg0, %arg2 : i32, i32
  }
  func.func @transform_1(%arg0: i32, %arg1: i32, %arg2: i32) -> (i32, i32) {
    %c0_i32 = arith.constant 0 : i32
    return %arg2, %arg1 : i32, i32
  }
  func.func @transform_2(%arg0: i32, %arg1: i32, %arg2: i32) -> (i32, i32) {
    %c0_i32 = arith.constant 0 : i32
    %c0_i32_0 = arith.constant 0 : i32
    return %c0_i32, %arg1 : i32, i32
  }
  func.func @transform_3(%arg0: i32, %arg1: i32, %arg2: i32) -> (i32, i32) {
    %c0_i32 = arith.constant 0 : i32
    return %arg0, %arg1 : i32, i32
  }
}

module attributes {stable_mosaic.version = 11 : i64} {
  func.func @_add_ln_kernel(%arg0: i32, %arg1: memref<32x128xf32, #tpu.memory_space<vmem>>, %arg2: memref<32x128xf32, #tpu.memory_space<vmem>>, %arg3: memref<1x128xf32, #tpu.memory_space<vmem>>, %arg4: memref<1x128xf32, #tpu.memory_space<vmem>>, %arg5: memref<32x128xf32, #tpu.memory_space<vmem>>) attributes {dimension_semantics = [#tpu.dimension_semantics<parallel>], iteration_bounds = array<i64: 1>, scalar_prefetch = 0 : i64, scratch_operands = 0 : i64, tpu.core_type = #tpu.core_type<tc>, window_params = [{transform_indices = @transform_0, window_bounds = array<i64: 32, 128>}, {transform_indices = @transform_1, window_bounds = array<i64: 32, 128>}, {pipeline_mode = #tpu.pipeline_mode<synchronous>, transform_indices = @transform_2, window_bounds = array<i64: 1, 128>}, {pipeline_mode = #tpu.pipeline_mode<synchronous>, transform_indices = @transform_3, window_bounds = array<i64: 1, 128>}, {transform_indices = @transform_4, window_bounds = array<i64: 32, 128>}]} {
    %c0 = arith.constant 0 : index
    %c0_0 = arith.constant 0 : index
    %0 = vector.load %arg1[%c0, %c0_0] : memref<32x128xf32, #tpu.memory_space<vmem>>, vector<32x128xf32>
    %c0_1 = arith.constant 0 : index
    %c0_2 = arith.constant 0 : index
    %1 = vector.load %arg2[%c0_1, %c0_2] : memref<32x128xf32, #tpu.memory_space<vmem>>, vector<32x128xf32>
    %2 = arith.addf %0, %1 : vector<32x128xf32>
    %cst = arith.constant dense<0.000000e+00> : vector<32xf32>
    %3 = vector.multi_reduction <add>, %2, %cst [1] : vector<32x128xf32> to vector<32xf32>
    %4 = vector.shape_cast %3 : vector<32xf32> to vector<32x1xf32>
    %cst_3 = arith.constant 1.280000e+02 : f32
    %5 = vector.broadcast %cst_3 : f32 to vector<32x1xf32>
    %6 = arith.divf %4, %5 : vector<32x1xf32>
    %7 = vector.broadcast %6 : vector<32x1xf32> to vector<32x128xf32>
    %8 = arith.subf %2, %7 : vector<32x128xf32>
    %9 = arith.mulf %8, %8 : vector<32x128xf32>
    %cst_4 = arith.constant dense<0.000000e+00> : vector<32xf32>
    %10 = vector.multi_reduction <add>, %9, %cst_4 [1] : vector<32x128xf32> to vector<32xf32>
    %11 = vector.shape_cast %10 : vector<32xf32> to vector<32x1xf32>
    %cst_5 = arith.constant 1.280000e+02 : f32
    %12 = vector.broadcast %cst_5 : f32 to vector<32x1xf32>
    %13 = arith.divf %11, %12 : vector<32x1xf32>
    %cst_6 = arith.constant 9.99999974E-6 : f32
    %14 = vector.broadcast %cst_6 : f32 to vector<32x1xf32>
    %15 = arith.addf %13, %14 : vector<32x1xf32>
    %16 = math.rsqrt %15 : vector<32x1xf32>
    %17 = vector.broadcast %6 : vector<32x1xf32> to vector<32x128xf32>
    %18 = arith.subf %2, %17 : vector<32x128xf32>
    %19 = vector.broadcast %16 : vector<32x1xf32> to vector<32x128xf32>
    %20 = arith.mulf %18, %19 : vector<32x128xf32>
    %c0_7 = arith.constant 0 : index
    %c0_8 = arith.constant 0 : index
    %21 = vector.load %arg3[%c0_7, %c0_8] : memref<1x128xf32, #tpu.memory_space<vmem>>, vector<1x128xf32>
    %22 = vector.broadcast %21 : vector<1x128xf32> to vector<32x128xf32>
    %23 = arith.mulf %20, %22 : vector<32x128xf32>
    %c0_9 = arith.constant 0 : index
    %c0_10 = arith.constant 0 : index
    %24 = vector.load %arg4[%c0_9, %c0_10] : memref<1x128xf32, #tpu.memory_space<vmem>>, vector<1x128xf32>
    %25 = vector.broadcast %24 : vector<1x128xf32> to vector<32x128xf32>
    %26 = arith.addf %23, %25 : vector<32x128xf32>
    %c0_11 = arith.constant 0 : index
    %c0_12 = arith.constant 0 : index
    %27 = vector.load %arg5[%c0_11, %c0_12] : memref<32x128xf32, #tpu.memory_space<vmem>>, vector<32x128xf32>
    tpu.vector_store %arg5[%c0_11, %c0_12], %26 {strides = array<i32>} : memref<32x128xf32, #tpu.memory_space<vmem>>, vector<32x128xf32>,
    return
  }
  func.func @transform_0(%arg0: i32) -> (i32, i32) {
    %c0_i32 = arith.constant 0 : i32
    %c0_i32_0 = arith.constant 0 : i32
    return %arg0, %c0_i32 : i32, i32
  }
  func.func @transform_1(%arg0: i32) -> (i32, i32) {
    %c0_i32 = arith.constant 0 : i32
    %c0_i32_0 = arith.constant 0 : i32
    return %arg0, %c0_i32 : i32, i32
  }
  func.func @transform_2(%arg0: i32) -> (i32, i32) {
    %c0_i32 = arith.constant 0 : i32
    %c0_i32_0 = arith.constant 0 : i32
    %c0_i32_1 = arith.constant 0 : i32
    return %c0_i32, %c0_i32_0 : i32, i32
  }
  func.func @transform_3(%arg0: i32) -> (i32, i32) {
    %c0_i32 = arith.constant 0 : i32
    %c0_i32_0 = arith.constant 0 : i32
    %c0_i32_1 = arith.constant 0 : i32
    return %c0_i32, %c0_i32_0 : i32, i32
  }
  func.func @transform_4(%arg0: i32) -> (i32, i32) {
    %c0_i32 = arith.constant 0 : i32
    %c0_i32_0 = arith.constant 0 : i32
    return %arg0, %c0_i32 : i32, i32
  }
}

module attributes {stable_mosaic.version = 11 : i64} {
  func.func @_linear_kernel(%arg0: i32, %arg1: i32, %arg2: i32, %arg3: memref<32x128xbf16, #tpu.memory_space<vmem>>, %arg4: memref<128x256xbf16, #tpu.memory_space<vmem>>, %arg5: memref<1x256xf32, #tpu.memory_space<vmem>>, %arg6: memref<32x256xbf16, #tpu.memory_space<vmem>>, %arg7: memref<32x256xf32, #tpu.memory_space<vmem>>) attributes {dimension_semantics = [#tpu.dimension_semantics<parallel>, #tpu.dimension_semantics<parallel>, #tpu.dimension_semantics<arbitrary>], iteration_bounds = array<i64: 1, 1, 1>, scalar_prefetch = 0 : i64, scratch_operands = 1 : i64, tpu.core_type = #tpu.core_type<tc>, window_params = [{transform_indices = @transform_0, window_bounds = array<i64: 32, 128>}, {transform_indices = @transform_1, window_bounds = array<i64: 128, 256>}, {transform_indices = @transform_2, window_bounds = array<i64: 1, 256>}, {transform_indices = @transform_3, window_bounds = array<i64: 32, 256>}]} {
    %c0_i32 = arith.constant 0 : i32
    %0 = arith.cmpi eq, %arg2, %c0_i32 : i32
    %1 = arith.extui %0 : i1 to i32
    %c0_i32_0 = arith.constant 0 : i32
    %2 = arith.cmpi ne, %1, %c0_i32_0 : i32
    scf.if %2 {
      %cst_10 = arith.constant 0.000000e+00 : f32
      %12 = vector.broadcast %cst_10 : f32 to vector<32x256xf32>
      %c0_11 = arith.constant 0 : index
      %c0_12 = arith.constant 0 : index
      %13 = vector.load %arg7[%c0_11, %c0_12] : memref<32x256xf32, #tpu.memory_space<vmem>>, vector<32x256xf32>
      tpu.vector_store %arg7[%c0_11, %c0_12], %12 {strides = array<i32>} : memref<32x256xf32, #tpu.memory_space<vmem>>, vector<32x256xf32>,
    } else {
    }
    %c0 = arith.constant 0 : index
    %c0_1 = arith.constant 0 : index
    %3 = vector.load %arg7[%c0, %c0_1] : memref<32x256xf32, #tpu.memory_space<vmem>>, vector<32x256xf32>
    %c0_2 = arith.constant 0 : index
    %c0_3 = arith.constant 0 : index
    %4 = vector.load %arg3[%c0_2, %c0_3] : memref<32x128xbf16, #tpu.memory_space<vmem>>, vector<32x128xbf16>
    %c0_4 = arith.constant 0 : index
    %c0_5 = arith.constant 0 : index
    %5 = vector.load %arg4[%c0_4, %c0_5] : memref<128x256xbf16, #tpu.memory_space<vmem>>, vector<128x256xbf16>
    %cst = arith.constant dense<0.000000e+00> : vector<32x256xf32>
    %6 = tpu.matmul %4, %5, %cst {dimension_numbers = #tpu.dot_dimension_numbers<[1], [0], [0], [1], [0, 0, 1, 1], [], []>} : vector<32x128xbf16>, vector<128x256xbf16>, vector<32x256xf32> -> vector<32x256xf32>
    %7 = arith.addf %3, %6 : vector<32x256xf32>
    %c0_6 = arith.constant 0 : index
    %c0_7 = arith.constant 0 : index
    %8 = vector.load %arg7[%c0_6, %c0_7] : memref<32x256xf32, #tpu.memory_space<vmem>>, vector<32x256xf32>
    tpu.vector_store %arg7[%c0_6, %c0_7], %7 {strides = array<i32>} : memref<32x256xf32, #tpu.memory_space<vmem>>, vector<32x256xf32>,
    %c0_i32_8 = arith.constant 0 : i32
    %9 = arith.cmpi eq, %arg2, %c0_i32_8 : i32
    %10 = arith.extui %9 : i1 to i32
    %c0_i32_9 = arith.constant 0 : i32
    %11 = arith.cmpi ne, %10, %c0_i32_9 : i32
    scf.if %11 {
      %c0_10 = arith.constant 0 : index
      %c0_11 = arith.constant 0 : index
      %12 = vector.load %arg7[%c0_10, %c0_11] : memref<32x256xf32, #tpu.memory_space<vmem>>, vector<32x256xf32>
      %c0_12 = arith.constant 0 : index
      %c0_13 = arith.constant 0 : index
      %13 = vector.load %arg5[%c0_12, %c0_13] : memref<1x256xf32, #tpu.memory_space<vmem>>, vector<1x256xf32>
      %14 = vector.broadcast %13 : vector<1x256xf32> to vector<32x256xf32>
      %15 = arith.addf %12, %14 : vector<32x256xf32>
      %16 = arith.truncf %15 : vector<32x256xf32> to vector<32x256xbf16>
      %c0_14 = arith.constant 0 : index
      %c0_15 = arith.constant 0 : index
      %17 = vector.load %arg6[%c0_14, %c0_15] : memref<32x256xbf16, #tpu.memory_space<vmem>>, vector<32x256xbf16>
      tpu.vector_store %arg6[%c0_14, %c0_15], %16 {strides = array<i32>} : memref<32x256xbf16, #tpu.memory_space<vmem>>, vector<32x256xbf16>,
    } else {
    }
    return
  }
  func.func @transform_0(%arg0: i32, %arg1: i32, %arg2: i32) -> (i32, i32) {
    %c0_i32 = arith.constant 0 : i32
    return %arg0, %arg2 : i32, i32
  }
  func.func @transform_1(%arg0: i32, %arg1: i32, %arg2: i32) -> (i32, i32) {
    %c0_i32 = arith.constant 0 : i32
    return %arg2, %arg1 : i32, i32
  }
  func.func @transform_2(%arg0: i32, %arg1: i32, %arg2: i32) -> (i32, i32) {
    %c0_i32 = arith.constant 0 : i32
    %c0_i32_0 = arith.constant 0 : i32
    return %c0_i32, %arg1 : i32, i32
  }
  func.func @transform_3(%arg0: i32, %arg1: i32, %arg2: i32) -> (i32, i32) {
    %c0_i32 = arith.constant 0 : i32
    return %arg0, %arg1 : i32, i32
  }
}

module attributes {stable_mosaic.version = 11 : i64} {
  func.func @_linear_kernel(%arg0: i32, %arg1: i32, %arg2: i32, %arg3: memref<32x256xbf16, #tpu.memory_space<vmem>>, %arg4: memref<256x128xbf16, #tpu.memory_space<vmem>>, %arg5: memref<1x128xf32, #tpu.memory_space<vmem>>, %arg6: memref<32x128xf32, #tpu.memory_space<vmem>>, %arg7: memref<32x128xf32, #tpu.memory_space<vmem>>) attributes {dimension_semantics = [#tpu.dimension_semantics<parallel>, #tpu.dimension_semantics<parallel>, #tpu.dimension_semantics<arbitrary>], iteration_bounds = array<i64: 1, 1, 1>, scalar_prefetch = 0 : i64, scratch_operands = 1 : i64, tpu.core_type = #tpu.core_type<tc>, window_params = [{transform_indices = @transform_0, window_bounds = array<i64: 32, 256>}, {transform_indices = @transform_1, window_bounds = array<i64: 256, 128>}, {transform_indices = @transform_2, window_bounds = array<i64: 1, 128>}, {transform_indices = @transform_3, window_bounds = array<i64: 32, 128>}]} {
    %c0_i32 = arith.constant 0 : i32
    %0 = arith.cmpi eq, %arg2, %c0_i32 : i32
    %1 = arith.extui %0 : i1 to i32
    %c0_i32_0 = arith.constant 0 : i32
    %2 = arith.cmpi ne, %1, %c0_i32_0 : i32
    scf.if %2 {
      %cst_10 = arith.constant 0.000000e+00 : f32
      %12 = vector.broadcast %cst_10 : f32 to vector<32x128xf32>
      %c0_11 = arith.constant 0 : index
      %c0_12 = arith.constant 0 : index
      %13 = vector.load %arg7[%c0_11, %c0_12] : memref<32x128xf32, #tpu.memory_space<vmem>>, vector<32x128xf32>
      tpu.vector_store %arg7[%c0_11, %c0_12], %12 {strides = array<i32>} : memref<32x128xf32, #tpu.memory_space<vmem>>, vector<32x128xf32>,
    } else {
    }
    %c0 = arith.constant 0 : index
    %c0_1 = arith.constant 0 : index
    %3 = vector.load %arg7[%c0, %c0_1] : memref<32x128xf32, #tpu.memory_space<vmem>>, vector<32x128xf32>
    %c0_2 = arith.constant 0 : index
    %c0_3 = arith.constant 0 : index
    %4 = vector.load %arg3[%c0_2, %c0_3] : memref<32x256xbf16, #tpu.memory_space<vmem>>, vector<32x256xbf16>
    %c0_4 = arith.constant 0 : index
    %c0_5 = arith.constant 0 : index
    %5 = vector.load %arg4[%c0_4, %c0_5] : memref<256x128xbf16, #tpu.memory_space<vmem>>, vector<256x128xbf16>
    %cst = arith.constant dense<0.000000e+00> : vector<32x128xf32>
    %6 = tpu.matmul %4, %5, %cst {dimension_numbers = #tpu.dot_dimension_numbers<[1], [0], [0], [1], [0, 0, 1, 1], [], []>} : vector<32x256xbf16>, vector<256x128xbf16>, vector<32x128xf32> -> vector<32x128xf32>
    %7 = arith.addf %3, %6 : vector<32x128xf32>
    %c0_6 = arith.constant 0 : index
    %c0_7 = arith.constant 0 : index
    %8 = vector.load %arg7[%c0_6, %c0_7] : memref<32x128xf32, #tpu.memory_space<vmem>>, vector<32x128xf32>
    tpu.vector_store %arg7[%c0_6, %c0_7], %7 {strides = array<i32>} : memref<32x128xf32, #tpu.memory_space<vmem>>, vector<32x128xf32>,
    %c0_i32_8 = arith.constant 0 : i32
    %9 = arith.cmpi eq, %arg2, %c0_i32_8 : i32
    %10 = arith.extui %9 : i1 to i32
    %c0_i32_9 = arith.constant 0 : i32
    %11 = arith.cmpi ne, %10, %c0_i32_9 : i32
    scf.if %11 {
      %c0_10 = arith.constant 0 : index
      %c0_11 = arith.constant 0 : index
      %12 = vector.load %arg7[%c0_10, %c0_11] : memref<32x128xf32, #tpu.memory_space<vmem>>, vector<32x128xf32>
      %c0_12 = arith.constant 0 : index
      %c0_13 = arith.constant 0 : index
      %13 = vector.load %arg5[%c0_12, %c0_13] : memref<1x128xf32, #tpu.memory_space<vmem>>, vector<1x128xf32>
      %14 = vector.broadcast %13 : vector<1x128xf32> to vector<32x128xf32>
      %15 = arith.addf %12, %14 : vector<32x128xf32>
      %c0_14 = arith.constant 0 : index
      %c0_15 = arith.constant 0 : index
      %16 = vector.load %arg6[%c0_14, %c0_15] : memref<32x128xf32, #tpu.memory_space<vmem>>, vector<32x128xf32>
      tpu.vector_store %arg6[%c0_14, %c0_15], %15 {strides = array<i32>} : memref<32x128xf32, #tpu.memory_space<vmem>>, vector<32x128xf32>,
    } else {
    }
    return
  }
  func.func @transform_0(%arg0: i32, %arg1: i32, %arg2: i32) -> (i32, i32) {
    %c0_i32 = arith.constant 0 : i32
    return %arg0, %arg2 : i32, i32
  }
  func.func @transform_1(%arg0: i32, %arg1: i32, %arg2: i32) -> (i32, i32) {
    %c0_i32 = arith.constant 0 : i32
    return %arg2, %arg1 : i32, i32
  }
  func.func @transform_2(%arg0: i32, %arg1: i32, %arg2: i32) -> (i32, i32) {
    %c0_i32 = arith.constant 0 : i32
    %c0_i32_0 = arith.constant 0 : i32
    return %c0_i32, %arg1 : i32, i32
  }
  func.func @transform_3(%arg0: i32, %arg1: i32, %arg2: i32) -> (i32, i32) {
    %c0_i32 = arith.constant 0 : i32
    return %arg0, %arg1 : i32, i32
  }
}

module attributes {stable_mosaic.version = 11 : i64} {
  func.func @_linear_kernel(%arg0: i32, %arg1: i32, %arg2: i32, %arg3: memref<32x128xbf16, #tpu.memory_space<vmem>>, %arg4: memref<128x256xbf16, #tpu.memory_space<vmem>>, %arg5: memref<1x256xf32, #tpu.memory_space<vmem>>, %arg6: memref<32x256xbf16, #tpu.memory_space<vmem>>, %arg7: memref<32x256xf32, #tpu.memory_space<vmem>>) attributes {dimension_semantics = [#tpu.dimension_semantics<parallel>, #tpu.dimension_semantics<parallel>, #tpu.dimension_semantics<arbitrary>], iteration_bounds = array<i64: 1, 1, 1>, scalar_prefetch = 0 : i64, scratch_operands = 1 : i64, tpu.core_type = #tpu.core_type<tc>, window_params = [{transform_indices = @transform_0, window_bounds = array<i64: 32, 128>}, {transform_indices = @transform_1, window_bounds = array<i64: 128, 256>}, {transform_indices = @transform_2, window_bounds = array<i64: 1, 256>}, {transform_indices = @transform_3, window_bounds = array<i64: 32, 256>}]} {
    %c0_i32 = arith.constant 0 : i32
    %0 = arith.cmpi eq, %arg2, %c0_i32 : i32
    %1 = arith.extui %0 : i1 to i32
    %c0_i32_0 = arith.constant 0 : i32
    %2 = arith.cmpi ne, %1, %c0_i32_0 : i32
    scf.if %2 {
      %cst_10 = arith.constant 0.000000e+00 : f32
      %12 = vector.broadcast %cst_10 : f32 to vector<32x256xf32>
      %c0_11 = arith.constant 0 : index
      %c0_12 = arith.constant 0 : index
      %13 = vector.load %arg7[%c0_11, %c0_12] : memref<32x256xf32, #tpu.memory_space<vmem>>, vector<32x256xf32>
      tpu.vector_store %arg7[%c0_11, %c0_12], %12 {strides = array<i32>} : memref<32x256xf32, #tpu.memory_space<vmem>>, vector<32x256xf32>,
    } else {
    }
    %c0 = arith.constant 0 : index
    %c0_1 = arith.constant 0 : index
    %3 = vector.load %arg7[%c0, %c0_1] : memref<32x256xf32, #tpu.memory_space<vmem>>, vector<32x256xf32>
    %c0_2 = arith.constant 0 : index
    %c0_3 = arith.constant 0 : index
    %4 = vector.load %arg3[%c0_2, %c0_3] : memref<32x128xbf16, #tpu.memory_space<vmem>>, vector<32x128xbf16>
    %c0_4 = arith.constant 0 : index
    %c0_5 = arith.constant 0 : index
    %5 = vector.load %arg4[%c0_4, %c0_5] : memref<128x256xbf16, #tpu.memory_space<vmem>>, vector<128x256xbf16>
    %cst = arith.constant dense<0.000000e+00> : vector<32x256xf32>
    %6 = tpu.matmul %4, %5, %cst {dimension_numbers = #tpu.dot_dimension_numbers<[1], [0], [0], [1], [0, 0, 1, 1], [], []>} : vector<32x128xbf16>, vector<128x256xbf16>, vector<32x256xf32> -> vector<32x256xf32>
    %7 = arith.addf %3, %6 : vector<32x256xf32>
    %c0_6 = arith.constant 0 : index
    %c0_7 = arith.constant 0 : index
    %8 = vector.load %arg7[%c0_6, %c0_7] : memref<32x256xf32, #tpu.memory_space<vmem>>, vector<32x256xf32>
    tpu.vector_store %arg7[%c0_6, %c0_7], %7 {strides = array<i32>} : memref<32x256xf32, #tpu.memory_space<vmem>>, vector<32x256xf32>,
    %c0_i32_8 = arith.constant 0 : i32
    %9 = arith.cmpi eq, %arg2, %c0_i32_8 : i32
    %10 = arith.extui %9 : i1 to i32
    %c0_i32_9 = arith.constant 0 : i32
    %11 = arith.cmpi ne, %10, %c0_i32_9 : i32
    scf.if %11 {
      %c0_10 = arith.constant 0 : index
      %c0_11 = arith.constant 0 : index
      %12 = vector.load %arg7[%c0_10, %c0_11] : memref<32x256xf32, #tpu.memory_space<vmem>>, vector<32x256xf32>
      %c0_12 = arith.constant 0 : index
      %c0_13 = arith.constant 0 : index
      %13 = vector.load %arg5[%c0_12, %c0_13] : memref<1x256xf32, #tpu.memory_space<vmem>>, vector<1x256xf32>
      %14 = vector.broadcast %13 : vector<1x256xf32> to vector<32x256xf32>
      %15 = arith.addf %12, %14 : vector<32x256xf32>
      %cst_14 = arith.constant 0.000000e+00 : f32
      %16 = vector.broadcast %cst_14 : f32 to vector<32x256xf32>
      %17 = arith.maximumf %15, %16 : vector<32x256xf32>
      %18 = arith.truncf %17 : vector<32x256xf32> to vector<32x256xbf16>
      %c0_15 = arith.constant 0 : index
      %c0_16 = arith.constant 0 : index
      %19 = vector.load %arg6[%c0_15, %c0_16] : memref<32x256xbf16, #tpu.memory_space<vmem>>, vector<32x256xbf16>
      tpu.vector_store %arg6[%c0_15, %c0_16], %18 {strides = array<i32>} : memref<32x256xbf16, #tpu.memory_space<vmem>>, vector<32x256xbf16>,
    } else {
    }
    return
  }
  func.func @transform_0(%arg0: i32, %arg1: i32, %arg2: i32) -> (i32, i32) {
    %c0_i32 = arith.constant 0 : i32
    return %arg0, %arg2 : i32, i32
  }
  func.func @transform_1(%arg0: i32, %arg1: i32, %arg2: i32) -> (i32, i32) {
    %c0_i32 = arith.constant 0 : i32
    return %arg2, %arg1 : i32, i32
  }
  func.func @transform_2(%arg0: i32, %arg1: i32, %arg2: i32) -> (i32, i32) {
    %c0_i32 = arith.constant 0 : i32
    %c0_i32_0 = arith.constant 0 : i32
    return %c0_i32, %arg1 : i32, i32
  }
  func.func @transform_3(%arg0: i32, %arg1: i32, %arg2: i32) -> (i32, i32) {
    %c0_i32 = arith.constant 0 : i32
    return %arg0, %arg1 : i32, i32
  }
}

module attributes {stable_mosaic.version = 11 : i64} {
  func.func @_mha_self_kernel(%arg0: i32, %arg1: memref<1x16x384xbf16, #tpu.memory_space<vmem>>, %arg2: memref<1x1x16xf32, #tpu.memory_space<vmem>>, %arg3: memref<1x16x128xbf16, #tpu.memory_space<vmem>>) attributes {dimension_semantics = [#tpu.dimension_semantics<parallel>], iteration_bounds = array<i64: 2>, scalar_prefetch = 0 : i64, scratch_operands = 0 : i64, tpu.core_type = #tpu.core_type<tc>, window_params = [{transform_indices = @transform_0, window_bounds = array<i64: 1, 16, 384>}, {transform_indices = @transform_1, window_bounds = array<i64: 1, 1, 16>}, {transform_indices = @transform_2, window_bounds = array<i64: 1, 16, 128>}]} {
    %c0 = arith.constant 0 : index
    %c0_0 = arith.constant 0 : index
    %c0_1 = arith.constant 0 : index
    %0 = vector.load %arg1[%c0, %c0_0, %c0_1] : memref<1x16x384xbf16, #tpu.memory_space<vmem>>, vector<1x16x384xbf16>
    %1 = vector.shape_cast %0 : vector<1x16x384xbf16> to vector<16x384xbf16>
    %2 = vector.extract_strided_slice %1 {offsets = [0, 0], sizes = [16, 128], strides = [1, 1]} : vector<16x384xbf16> to vector<16x128xbf16>
    %cst = arith.constant 1.767580e-01 : bf16
    %3 = vector.broadcast %cst : bf16 to vector<16x128xbf16>
    %4 = arith.mulf %2, %3 : vector<16x128xbf16>
    %5 = vector.shape_cast %4 : vector<16x128xbf16> to vector<16x4x32xbf16>
    %6 = vector.extract_strided_slice %1 {offsets = [0, 128], sizes = [16, 128], strides = [1, 1]} : vector<16x384xbf16> to vector<16x128xbf16>
    %7 = vector.shape_cast %6 : vector<16x128xbf16> to vector<16x4x32xbf16>
    %8 = vector.extract_strided_slice %1 {offsets = [0, 256], sizes = [16, 128], strides = [1, 1]} : vector<16x384xbf16> to vector<16x128xbf16>
    %9 = vector.shape_cast %8 : vector<16x128xbf16> to vector<16x4x32xbf16>
    %c0_2 = arith.constant 0 : index
    %c0_3 = arith.constant 0 : index
    %c0_4 = arith.constant 0 : index
    %10 = vector.load %arg2[%c0_2, %c0_3, %c0_4] : memref<1x1x16xf32, #tpu.memory_space<vmem>>, vector<1x1x16xf32>
    "tpu.trace_start"() <{level = 10 : i32, message = "qhd,khd->hqk"}> : () -> ()
    %cst_5 = arith.constant dense<0.000000e+00> : vector<4x16x16xf32>
    %11 = tpu.matmul %5, %7, %cst_5 {dimension_numbers = #tpu.dot_dimension_numbers<[2], [2], [0], [0], [0, 1, 0, 0, 1, 0], [1], [1]>} : vector<16x4x32xbf16>, vector<16x4x32xbf16>, vector<4x16x16xf32> -> vector<4x16x16xf32>
    %cst_6 = arith.constant 0.000000e+00 : f32
    "tpu.trace_stop"() : () -> ()
    %12 = vector.broadcast %cst_6 : f32 to vector<1x1x16xf32>
    %13 = arith.cmpf ogt, %10, %12 : vector<1x1x16xf32>
    %cst_7 = arith.constant -1.000000e+09 : f32
    %14 = vector.shape_cast %13 : vector<1x1x16xi1> to vector<1x1x16xi1>
    %15 = vector.broadcast %14 : vector<1x1x16xi1> to vector<4x16x16xi1>
    %16 = vector.broadcast %cst_7 : f32 to vector<4x16x16xf32>
    %17 = arith.select %15, %11, %16 : vector<4x16x16xi1>, vector<4x16x16xf32>
    %18 = tpu.iota {dimensions = array<i32: 0>} : vector<16x16xi32>
    %19 = tpu.iota {dimensions = array<i32: 1>} : vector<16x16xi32>
    %20 = arith.cmpi sge, %18, %19 : vector<16x16xi32>
    %21 = vector.shape_cast %20 : vector<16x16xi1> to vector<1x16x16xi1>
    %cst_8 = arith.constant -1.000000e+09 : f32
    %22 = vector.shape_cast %21 : vector<1x16x16xi1> to vector<1x16x16xi1>
    %23 = vector.broadcast %22 : vector<1x16x16xi1> to vector<4x16x16xi1>
    %24 = vector.broadcast %cst_8 : f32 to vector<4x16x16xf32>
    %25 = arith.select %23, %17, %24 : vector<4x16x16xi1>, vector<4x16x16xf32>
    %cst_9 = arith.constant dense<0xFF800000> : vector<4x16xf32>
    %26 = vector.multi_reduction <maximumf>, %25, %cst_9 [2] : vector<4x16x16xf32> to vector<4x16xf32>
    %27 = vector.shape_cast %26 : vector<4x16xf32> to vector<4x16x1xf32>
    %28 = vector.broadcast %27 : vector<4x16x1xf32> to vector<4x16x16xf32>
    %29 = arith.subf %25, %28 : vector<4x16x16xf32>
    %30 = math.exp %29 : vector<4x16x16xf32>
    %cst_10 = arith.constant dense<0.000000e+00> : vector<4x16xf32>
    %31 = vector.multi_reduction <add>, %30, %cst_10 [2] : vector<4x16x16xf32> to vector<4x16xf32>
    %32 = vector.shape_cast %31 : vector<4x16xf32> to vector<4x16x1xf32>
    %33 = tpu.reciprocal %32 {approx = true} : vector<4x16x1xf32> -> vector<4x16x1xf32>
    %34 = vector.broadcast %33 : vector<4x16x1xf32> to vector<4x16x16xf32>
    %35 = arith.mulf %30, %34 : vector<4x16x16xf32>
    %36 = arith.truncf %35 : vector<4x16x16xf32> to vector<4x16x16xbf16>
    "tpu.trace_start"() <{level = 10 : i32, message = "hqk,khd->qhd"}> : () -> ()
    %cst_11 = arith.constant dense<0.000000e+00> : vector<4x32x16xf32>
    %37 = tpu.matmul %9, %36, %cst_11 {dimension_numbers = #tpu.dot_dimension_numbers<[0], [2], [2], [1], [0, 1, 0, 2, 1, 1], [1], [0]>} : vector<16x4x32xbf16>, vector<4x16x16xbf16>, vector<4x32x16xf32> -> vector<4x32x16xf32>
    %38 = tpu.transpose %37, [2, 0, 1] : vector<4x32x16xf32> -> vector<16x4x32xf32>
    "tpu.trace_stop"() : () -> ()
    %39 = vector.shape_cast %38 : vector<16x4x32xf32> to vector<16x128xf32>
    %40 = arith.truncf %39 : vector<16x128xf32> to vector<16x128xbf16>
    %c0_12 = arith.constant 0 : index
    %c0_13 = arith.constant 0 : index
    %c0_14 = arith.constant 0 : index
    %41 = vector.load %arg3[%c0_12, %c0_13, %c0_14] : memref<1x16x128xbf16, #tpu.memory_space<vmem>>, vector<1x16x128xbf16>
    %42 = vector.shape_cast %41 : vector<1x16x128xbf16> to vector<16x128xbf16>
    %43 = vector.shape_cast %40 : vector<16x128xbf16> to vector<1x16x128xbf16>
    tpu.vector_store %arg3[%c0_12, %c0_13, %c0_14], %43 {strides = array<i32>} : memref<1x16x128xbf16, #tpu.memory_space<vmem>>, vector<1x16x128xbf16>,
    return
  }
  func.func @transform_0(%arg0: i32) -> (i32, i32, i32) {
    %c0_i32 = arith.constant 0 : i32
    %c0_i32_0 = arith.constant 0 : i32
    %c0_i32_1 = arith.constant 0 : i32
    return %arg0, %c0_i32, %c0_i32_0 : i32, i32, i32
  }
  func.func @transform_1(%arg0: i32) -> (i32, i32, i32) {
    %c0_i32 = arith.constant 0 : i32
    %c0_i32_0 = arith.constant 0 : i32
    %c0_i32_1 = arith.constant 0 : i32
    return %arg0, %c0_i32, %c0_i32_0 : i32, i32, i32
  }
  func.func @transform_2(%arg0: i32) -> (i32, i32, i32) {
    %c0_i32 = arith.constant 0 : i32
    %c0_i32_0 = arith.constant 0 : i32
    %c0_i32_1 = arith.constant 0 : i32
    return %arg0, %c0_i32, %c0_i32_0 : i32, i32, i32
  }
}

module attributes {stable_mosaic.version = 11 : i64} {
  func.func @_linear_kernel(%arg0: i32, %arg1: i32, %arg2: i32, %arg3: memref<32x128xbf16, #tpu.memory_space<vmem>>, %arg4: memref<128x128xbf16, #tpu.memory_space<vmem>>, %arg5: memref<1x128xf32, #tpu.memory_space<vmem>>, %arg6: memref<32x128xbf16, #tpu.memory_space<vmem>>, %arg7: memref<32x128xf32, #tpu.memory_space<vmem>>) attributes {dimension_semantics = [#tpu.dimension_semantics<parallel>, #tpu.dimension_semantics<parallel>, #tpu.dimension_semantics<arbitrary>], iteration_bounds = array<i64: 1, 1, 1>, scalar_prefetch = 0 : i64, scratch_operands = 1 : i64, tpu.core_type = #tpu.core_type<tc>, window_params = [{transform_indices = @transform_0, window_bounds = array<i64: 32, 128>}, {transform_indices = @transform_1, window_bounds = array<i64: 128, 128>}, {transform_indices = @transform_2, window_bounds = array<i64: 1, 128>}, {transform_indices = @transform_3, window_bounds = array<i64: 32, 128>}]} {
    %c0_i32 = arith.constant 0 : i32
    %0 = arith.cmpi eq, %arg2, %c0_i32 : i32
    %1 = arith.extui %0 : i1 to i32
    %c0_i32_0 = arith.constant 0 : i32
    %2 = arith.cmpi ne, %1, %c0_i32_0 : i32
    scf.if %2 {
      %cst_10 = arith.constant 0.000000e+00 : f32
      %12 = vector.broadcast %cst_10 : f32 to vector<32x128xf32>
      %c0_11 = arith.constant 0 : index
      %c0_12 = arith.constant 0 : index
      %13 = vector.load %arg7[%c0_11, %c0_12] : memref<32x128xf32, #tpu.memory_space<vmem>>, vector<32x128xf32>
      tpu.vector_store %arg7[%c0_11, %c0_12], %12 {strides = array<i32>} : memref<32x128xf32, #tpu.memory_space<vmem>>, vector<32x128xf32>,
    } else {
    }
    %c0 = arith.constant 0 : index
    %c0_1 = arith.constant 0 : index
    %3 = vector.load %arg7[%c0, %c0_1] : memref<32x128xf32, #tpu.memory_space<vmem>>, vector<32x128xf32>
    %c0_2 = arith.constant 0 : index
    %c0_3 = arith.constant 0 : index
    %4 = vector.load %arg3[%c0_2, %c0_3] : memref<32x128xbf16, #tpu.memory_space<vmem>>, vector<32x128xbf16>
    %c0_4 = arith.constant 0 : index
    %c0_5 = arith.constant 0 : index
    %5 = vector.load %arg4[%c0_4, %c0_5] : memref<128x128xbf16, #tpu.memory_space<vmem>>, vector<128x128xbf16>
    %cst = arith.constant dense<0.000000e+00> : vector<32x128xf32>
    %6 = tpu.matmul %4, %5, %cst {dimension_numbers = #tpu.dot_dimension_numbers<[1], [0], [0], [1], [0, 0, 1, 1], [], []>} : vector<32x128xbf16>, vector<128x128xbf16>, vector<32x128xf32> -> vector<32x128xf32>
    %7 = arith.addf %3, %6 : vector<32x128xf32>
    %c0_6 = arith.constant 0 : index
    %c0_7 = arith.constant 0 : index
    %8 = vector.load %arg7[%c0_6, %c0_7] : memref<32x128xf32, #tpu.memory_space<vmem>>, vector<32x128xf32>
    tpu.vector_store %arg7[%c0_6, %c0_7], %7 {strides = array<i32>} : memref<32x128xf32, #tpu.memory_space<vmem>>, vector<32x128xf32>,
    %c0_i32_8 = arith.constant 0 : i32
    %9 = arith.cmpi eq, %arg2, %c0_i32_8 : i32
    %10 = arith.extui %9 : i1 to i32
    %c0_i32_9 = arith.constant 0 : i32
    %11 = arith.cmpi ne, %10, %c0_i32_9 : i32
    scf.if %11 {
      %c0_10 = arith.constant 0 : index
      %c0_11 = arith.constant 0 : index
      %12 = vector.load %arg7[%c0_10, %c0_11] : memref<32x128xf32, #tpu.memory_space<vmem>>, vector<32x128xf32>
      %c0_12 = arith.constant 0 : index
      %c0_13 = arith.constant 0 : index
      %13 = vector.load %arg5[%c0_12, %c0_13] : memref<1x128xf32, #tpu.memory_space<vmem>>, vector<1x128xf32>
      %14 = vector.broadcast %13 : vector<1x128xf32> to vector<32x128xf32>
      %15 = arith.addf %12, %14 : vector<32x128xf32>
      %16 = arith.truncf %15 : vector<32x128xf32> to vector<32x128xbf16>
      %c0_14 = arith.constant 0 : index
      %c0_15 = arith.constant 0 : index
      %17 = vector.load %arg6[%c0_14, %c0_15] : memref<32x128xbf16, #tpu.memory_space<vmem>>, vector<32x128xbf16>
      tpu.vector_store %arg6[%c0_14, %c0_15], %16 {strides = array<i32>} : memref<32x128xbf16, #tpu.memory_space<vmem>>, vector<32x128xbf16>,
    } else {
    }
    return
  }
  func.func @transform_0(%arg0: i32, %arg1: i32, %arg2: i32) -> (i32, i32) {
    %c0_i32 = arith.constant 0 : i32
    return %arg0, %arg2 : i32, i32
  }
  func.func @transform_1(%arg0: i32, %arg1: i32, %arg2: i32) -> (i32, i32) {
    %c0_i32 = arith.constant 0 : i32
    return %arg2, %arg1 : i32, i32
  }
  func.func @transform_2(%arg0: i32, %arg1: i32, %arg2: i32) -> (i32, i32) {
    %c0_i32 = arith.constant 0 : i32
    %c0_i32_0 = arith.constant 0 : i32
    return %c0_i32, %arg1 : i32, i32
  }
  func.func @transform_3(%arg0: i32, %arg1: i32, %arg2: i32) -> (i32, i32) {
    %c0_i32 = arith.constant 0 : i32
    return %arg0, %arg1 : i32, i32
  }
}

module attributes {stable_mosaic.version = 11 : i64} {
  func.func @_linear_kernel(%arg0: i32, %arg1: i32, %arg2: i32, %arg3: memref<32x128xbf16, #tpu.memory_space<vmem>>, %arg4: memref<128x256xbf16, #tpu.memory_space<vmem>>, %arg5: memref<1x256xf32, #tpu.memory_space<vmem>>, %arg6: memref<32x256xf32, #tpu.memory_space<vmem>>, %arg7: memref<32x256xf32, #tpu.memory_space<vmem>>) attributes {dimension_semantics = [#tpu.dimension_semantics<parallel>, #tpu.dimension_semantics<parallel>, #tpu.dimension_semantics<arbitrary>], iteration_bounds = array<i64: 1, 1, 1>, scalar_prefetch = 0 : i64, scratch_operands = 1 : i64, tpu.core_type = #tpu.core_type<tc>, window_params = [{transform_indices = @transform_0, window_bounds = array<i64: 32, 128>}, {transform_indices = @transform_1, window_bounds = array<i64: 128, 256>}, {transform_indices = @transform_2, window_bounds = array<i64: 1, 256>}, {transform_indices = @transform_3, window_bounds = array<i64: 32, 256>}]} {
    %c0_i32 = arith.constant 0 : i32
    %0 = arith.cmpi eq, %arg2, %c0_i32 : i32
    %1 = arith.extui %0 : i1 to i32
    %c0_i32_0 = arith.constant 0 : i32
    %2 = arith.cmpi ne, %1, %c0_i32_0 : i32
    scf.if %2 {
      %cst_10 = arith.constant 0.000000e+00 : f32
      %12 = vector.broadcast %cst_10 : f32 to vector<32x256xf32>
      %c0_11 = arith.constant 0 : index
      %c0_12 = arith.constant 0 : index
      %13 = vector.load %arg7[%c0_11, %c0_12] : memref<32x256xf32, #tpu.memory_space<vmem>>, vector<32x256xf32>
      tpu.vector_store %arg7[%c0_11, %c0_12], %12 {strides = array<i32>} : memref<32x256xf32, #tpu.memory_space<vmem>>, vector<32x256xf32>,
    } else {
    }
    %c0 = arith.constant 0 : index
    %c0_1 = arith.constant 0 : index
    %3 = vector.load %arg7[%c0, %c0_1] : memref<32x256xf32, #tpu.memory_space<vmem>>, vector<32x256xf32>
    %c0_2 = arith.constant 0 : index
    %c0_3 = arith.constant 0 : index
    %4 = vector.load %arg3[%c0_2, %c0_3] : memref<32x128xbf16, #tpu.memory_space<vmem>>, vector<32x128xbf16>
    %c0_4 = arith.constant 0 : index
    %c0_5 = arith.constant 0 : index
    %5 = vector.load %arg4[%c0_4, %c0_5] : memref<128x256xbf16, #tpu.memory_space<vmem>>, vector<128x256xbf16>
    %cst = arith.constant dense<0.000000e+00> : vector<32x256xf32>
    %6 = tpu.matmul %4, %5, %cst {dimension_numbers = #tpu.dot_dimension_numbers<[1], [0], [0], [1], [0, 0, 1, 1], [], []>} : vector<32x128xbf16>, vector<128x256xbf16>, vector<32x256xf32> -> vector<32x256xf32>
    %7 = arith.addf %3, %6 : vector<32x256xf32>
    %c0_6 = arith.constant 0 : index
    %c0_7 = arith.constant 0 : index
    %8 = vector.load %arg7[%c0_6, %c0_7] : memref<32x256xf32, #tpu.memory_space<vmem>>, vector<32x256xf32>
    tpu.vector_store %arg7[%c0_6, %c0_7], %7 {strides = array<i32>} : memref<32x256xf32, #tpu.memory_space<vmem>>, vector<32x256xf32>,
    %c0_i32_8 = arith.constant 0 : i32
    %9 = arith.cmpi eq, %arg2, %c0_i32_8 : i32
    %10 = arith.extui %9 : i1 to i32
    %c0_i32_9 = arith.constant 0 : i32
    %11 = arith.cmpi ne, %10, %c0_i32_9 : i32
    scf.if %11 {
      %c0_10 = arith.constant 0 : index
      %c0_11 = arith.constant 0 : index
      %12 = vector.load %arg7[%c0_10, %c0_11] : memref<32x256xf32, #tpu.memory_space<vmem>>, vector<32x256xf32>
      %c0_12 = arith.constant 0 : index
      %c0_13 = arith.constant 0 : index
      %13 = vector.load %arg5[%c0_12, %c0_13] : memref<1x256xf32, #tpu.memory_space<vmem>>, vector<1x256xf32>
      %14 = vector.broadcast %13 : vector<1x256xf32> to vector<32x256xf32>
      %15 = arith.addf %12, %14 : vector<32x256xf32>
      %c0_14 = arith.constant 0 : index
      %c0_15 = arith.constant 0 : index
      %16 = vector.load %arg6[%c0_14, %c0_15] : memref<32x256xf32, #tpu.memory_space<vmem>>, vector<32x256xf32>
      tpu.vector_store %arg6[%c0_14, %c0_15], %15 {strides = array<i32>} : memref<32x256xf32, #tpu.memory_space<vmem>>, vector<32x256xf32>,
    } else {
    }
    return
  }
  func.func @transform_0(%arg0: i32, %arg1: i32, %arg2: i32) -> (i32, i32) {
    %c0_i32 = arith.constant 0 : i32
    return %arg0, %arg2 : i32, i32
  }
  func.func @transform_1(%arg0: i32, %arg1: i32, %arg2: i32) -> (i32, i32) {
    %c0_i32 = arith.constant 0 : i32
    return %arg2, %arg1 : i32, i32
  }
  func.func @transform_2(%arg0: i32, %arg1: i32, %arg2: i32) -> (i32, i32) {
    %c0_i32 = arith.constant 0 : i32
    %c0_i32_0 = arith.constant 0 : i32
    return %c0_i32, %arg1 : i32, i32
  }
  func.func @transform_3(%arg0: i32, %arg1: i32, %arg2: i32) -> (i32, i32) {
    %c0_i32 = arith.constant 0 : i32
    return %arg0, %arg1 : i32, i32
  }
}

module attributes {stable_mosaic.version = 11 : i64} {
  func.func @_mha_cross_kernel(%arg0: i32, %arg1: memref<1x16x128xbf16, #tpu.memory_space<vmem>>, %arg2: memref<1x16x256xbf16, #tpu.memory_space<vmem>>, %arg3: memref<1x1x16xf32, #tpu.memory_space<vmem>>, %arg4: memref<1x16x128xbf16, #tpu.memory_space<vmem>>) attributes {dimension_semantics = [#tpu.dimension_semantics<parallel>], iteration_bounds = array<i64: 2>, scalar_prefetch = 0 : i64, scratch_operands = 0 : i64, tpu.core_type = #tpu.core_type<tc>, window_params = [{transform_indices = @transform_0, window_bounds = array<i64: 1, 16, 128>}, {transform_indices = @transform_1, window_bounds = array<i64: 1, 16, 256>}, {transform_indices = @transform_2, window_bounds = array<i64: 1, 1, 16>}, {transform_indices = @transform_3, window_bounds = array<i64: 1, 16, 128>}]} {
    %c0 = arith.constant 0 : index
    %c0_0 = arith.constant 0 : index
    %c0_1 = arith.constant 0 : index
    %0 = vector.load %arg1[%c0, %c0_0, %c0_1] : memref<1x16x128xbf16, #tpu.memory_space<vmem>>, vector<1x16x128xbf16>
    %1 = vector.shape_cast %0 : vector<1x16x128xbf16> to vector<16x128xbf16>
    %cst = arith.constant 1.767580e-01 : bf16
    %2 = vector.broadcast %cst : bf16 to vector<16x128xbf16>
    %3 = arith.mulf %1, %2 : vector<16x128xbf16>
    %4 = vector.shape_cast %3 : vector<16x128xbf16> to vector<16x4x32xbf16>
    %c0_2 = arith.constant 0 : index
    %c0_3 = arith.constant 0 : index
    %c0_4 = arith.constant 0 : index
    %5 = vector.load %arg2[%c0_2, %c0_3, %c0_4] : memref<1x16x256xbf16, #tpu.memory_space<vmem>>, vector<1x16x256xbf16>
    %6 = vector.shape_cast %5 : vector<1x16x256xbf16> to vector<16x256xbf16>
    %7 = vector.extract_strided_slice %6 {offsets = [0, 0], sizes = [16, 128], strides = [1, 1]} : vector<16x256xbf16> to vector<16x128xbf16>
    %8 = vector.shape_cast %7 : vector<16x128xbf16> to vector<16x4x32xbf16>
    %9 = vector.extract_strided_slice %6 {offsets = [0, 128], sizes = [16, 128], strides = [1, 1]} : vector<16x256xbf16> to vector<16x128xbf16>
    %10 = vector.shape_cast %9 : vector<16x128xbf16> to vector<16x4x32xbf16>
    %c0_5 = arith.constant 0 : index
    %c0_6 = arith.constant 0 : index
    %c0_7 = arith.constant 0 : index
    %11 = vector.load %arg3[%c0_5, %c0_6, %c0_7] : memref<1x1x16xf32, #tpu.memory_space<vmem>>, vector<1x1x16xf32>
    "tpu.trace_start"() <{level = 10 : i32, message = "qhd,khd->hqk"}> : () -> ()
    %cst_8 = arith.constant dense<0.000000e+00> : vector<4x16x16xf32>
    %12 = tpu.matmul %4, %8, %cst_8 {dimension_numbers = #tpu.dot_dimension_numbers<[2], [2], [0], [0], [0, 1, 0, 0, 1, 0], [1], [1]>} : vector<16x4x32xbf16>, vector<16x4x32xbf16>, vector<4x16x16xf32> -> vector<4x16x16xf32>
    %cst_9 = arith.constant 0.000000e+00 : f32
    "tpu.trace_stop"() : () -> ()
    %13 = vector.broadcast %cst_9 : f32 to vector<1x1x16xf32>
    %14 = arith.cmpf ogt, %11, %13 : vector<1x1x16xf32>
    %cst_10 = arith.constant -1.000000e+09 : f32
    %15 = vector.shape_cast %14 : vector<1x1x16xi1> to vector<1x1x16xi1>
    %16 = vector.broadcast %15 : vector<1x1x16xi1> to vector<4x16x16xi1>
    %17 = vector.broadcast %cst_10 : f32 to vector<4x16x16xf32>
    %18 = arith.select %16, %12, %17 : vector<4x16x16xi1>, vector<4x16x16xf32>
    %cst_11 = arith.constant dense<0xFF800000> : vector<4x16xf32>
    %19 = vector.multi_reduction <maximumf>, %18, %cst_11 [2] : vector<4x16x16xf32> to vector<4x16xf32>
    %20 = vector.shape_cast %19 : vector<4x16xf32> to vector<4x16x1xf32>
    %21 = vector.broadcast %20 : vector<4x16x1xf32> to vector<4x16x16xf32>
    %22 = arith.subf %18, %21 : vector<4x16x16xf32>
    %23 = math.exp %22 : vector<4x16x16xf32>
    %cst_12 = arith.constant dense<0.000000e+00> : vector<4x16xf32>
    %24 = vector.multi_reduction <add>, %23, %cst_12 [2] : vector<4x16x16xf32> to vector<4x16xf32>
    %25 = vector.shape_cast %24 : vector<4x16xf32> to vector<4x16x1xf32>
    %26 = tpu.reciprocal %25 {approx = true} : vector<4x16x1xf32> -> vector<4x16x1xf32>
    %27 = vector.broadcast %26 : vector<4x16x1xf32> to vector<4x16x16xf32>
    %28 = arith.mulf %23, %27 : vector<4x16x16xf32>
    %29 = arith.truncf %28 : vector<4x16x16xf32> to vector<4x16x16xbf16>
    "tpu.trace_start"() <{level = 10 : i32, message = "hqk,khd->qhd"}> : () -> ()
    %cst_13 = arith.constant dense<0.000000e+00> : vector<4x32x16xf32>
    %30 = tpu.matmul %10, %29, %cst_13 {dimension_numbers = #tpu.dot_dimension_numbers<[0], [2], [2], [1], [0, 1, 0, 2, 1, 1], [1], [0]>} : vector<16x4x32xbf16>, vector<4x16x16xbf16>, vector<4x32x16xf32> -> vector<4x32x16xf32>
    %31 = tpu.transpose %30, [2, 0, 1] : vector<4x32x16xf32> -> vector<16x4x32xf32>
    "tpu.trace_stop"() : () -> ()
    %32 = vector.shape_cast %31 : vector<16x4x32xf32> to vector<16x128xf32>
    %33 = arith.truncf %32 : vector<16x128xf32> to vector<16x128xbf16>
    %c0_14 = arith.constant 0 : index
    %c0_15 = arith.constant 0 : index
    %c0_16 = arith.constant 0 : index
    %34 = vector.load %arg4[%c0_14, %c0_15, %c0_16] : memref<1x16x128xbf16, #tpu.memory_space<vmem>>, vector<1x16x128xbf16>
    %35 = vector.shape_cast %34 : vector<1x16x128xbf16> to vector<16x128xbf16>
    %36 = vector.shape_cast %33 : vector<16x128xbf16> to vector<1x16x128xbf16>
    tpu.vector_store %arg4[%c0_14, %c0_15, %c0_16], %36 {strides = array<i32>} : memref<1x16x128xbf16, #tpu.memory_space<vmem>>, vector<1x16x128xbf16>,
    return
  }
  func.func @transform_0(%arg0: i32) -> (i32, i32, i32) {
    %c0_i32 = arith.constant 0 : i32
    %c0_i32_0 = arith.constant 0 : i32
    %c0_i32_1 = arith.constant 0 : i32
    return %arg0, %c0_i32, %c0_i32_0 : i32, i32, i32
  }
  func.func @transform_1(%arg0: i32) -> (i32, i32, i32) {
    %c0_i32 = arith.constant 0 : i32
    %c0_i32_0 = arith.constant 0 : i32
    %c0_i32_1 = arith.constant 0 : i32
    return %arg0, %c0_i32, %c0_i32_0 : i32, i32, i32
  }
  func.func @transform_2(%arg0: i32) -> (i32, i32, i32) {
    %c0_i32 = arith.constant 0 : i32
    %c0_i32_0 = arith.constant 0 : i32
    %c0_i32_1 = arith.constant 0 : i32
    return %arg0, %c0_i32, %c0_i32_0 : i32, i32, i32
  }
  func.func @transform_3(%arg0: i32) -> (i32, i32, i32) {
    %c0_i32 = arith.constant 0 : i32
    %c0_i32_0 = arith.constant 0 : i32
    %c0_i32_1 = arith.constant 0 : i32
    return %arg0, %c0_i32, %c0_i32_0 : i32, i32, i32
  }
}

</mosaic_0001>

<bundles_post_ra>
// kernel: transformer_forward.41
= control target key start
LH: loop header
LB: loop body
LE: loop exit
PB: predicated region body
PF: predicated region fallthrough
CT: control target
= control target key end

     0   :  { %s306_s1 = inlined_call_operand.vmem [shape: bf16[128,128], index: 1, kind: input, shape index: {}]   ;;  %s307_s0 = inlined_call_operand.vmem [shape: bf16[32,128], index: 0, kind: input, shape index: {}]   ;;  %s308_s2 = inlined_call_operand.vmem [shape: f32[1,128], index: 2, kind: input, shape index: {}]   ;;  %s309_s3 = inlined_call_operand.vmem [shape: f32[32,128], index: 3, kind: output, shape index: {}]  }
   0x1   :  { %v231_v0 = vld [vmem:[%s306_s1 + $0x38] sm:$0xff]   ;;  %v232_v1 = vld [vmem:[%s306_s1 + $0x30] sm:$0xff]   ;;  %v233_v2 = vld [vmem:[%s306_s1 + $0x28] sm:$0xff]  }
   0x2   :  { %211 = vmatprep.subr.bf16.mxu0 %v231_v0  ;;  %v234_v3 = vld [vmem:[%s306_s1 + $0x20] sm:$0xff]   ;;  %v235_v5 = vld [vmem:[%s306_s1 + $0x18] sm:$0xff]   ;;  %v236_v6 = vld [vmem:[%s306_s1 + $0x10] sm:$0xff]  }
   0x3   :  { %212 = vmatpush3.bf16.msra.mxu0 %v231_v0  ;;  %v239_v4 = vld [vmem:[%s307_s0] sm:$0xff]   ;;  %v237_v7 = vld [vmem:[%s306_s1 + $0x8] sm:$0xff]  }
   0x4   :  { %213 = vmatprep.subr.bf16.mxu0 %v232_v1  ;;  %227 = vmatprep.mubr.bf16.mxu0 %v239_v4  ;;  %v238_v8 = vld [vmem:[%s306_s1] sm:$0xff]   ;;  %v240_v9 = vld [vmem:[%s307_s0 + $0x8] sm:$0xff]  }
   0x5   :  { %v200_v10 = vld [vmem:[%s308_s2] ss:$0 sm:$0xff] }
   0x7   :  { %214 = vmatpush3.bf16.msra.mxu0 %v232_v1 }
   0x8   :  { %215 = vmatprep.subr.bf16.mxu0 %v233_v2 }
   0xb   :  { %216 = vmatpush3.bf16.msra.mxu0 %v233_v2 }
   0xc   :  { %217 = vmatprep.subr.bf16.mxu0 %v234_v3 }
   0xf   :  { %218 = vmatpush3.bf16.msra.mxu0 %v234_v3 }
  0x10   :  { %219 = vmatprep.subr.bf16.mxu0 %v235_v5 }
  0x13   :  { %220 = vmatpush3.bf16.msra.mxu0 %v235_v5 }
  0x14   :  { %221 = vmatprep.subr.bf16.mxu0 %v236_v6 }
  0x17   :  { %222 = vmatpush3.bf16.msra.mxu0 %v236_v6 }
  0x18   :  { %223 = vmatprep.subr.bf16.mxu0 %v237_v7 }
  0x1b   :  { %224 = vmatpush3.bf16.msra.mxu0 %v237_v7 }
  0x1c   :  { %225 = vmatprep.subr.bf16.mxu0 %v238_v8 }
  0x1f   :  { %226 = vmatpush3.bf16.msra.mxu0 %v238_v8 }
  0x22   :  { %228 = vmatmul.mubr.bf16.vlgmr.msra.gmra.mxu0 %v240_v9 }
  0xe2   :  { %v229_v11 = vpop.f32.mrf.mxu0 }
  0xe3   :  { %v180_v12 = vadd.f32 %v229_v11, %v200_v10 }
  0xe4   :  { %v141_v13 = vpop.f32.mrf.mxu0 }
  0xe5   :  { %184 = vst [vmem:[%s309_s3 + $0x10] sm:$0xff] %v180_v12  ;;  %v178_v14 = vadd.f32 %v200_v10, %v141_v13 }
  0xe6   :  { %v230_v15 = vpop.f32.mrf.mxu0 }
  0xe7   :  { %182 = vst [vmem:[%s309_s3] sm:$0xff] %v178_v14  ;;  %v181_v16 = vadd.f32 %v230_v15, %v200_v10 }
  0xe8   :  { %v144_v17 = vpop.f32.mrf.mxu0 }
  0xe9   :  { %185 = vst [vmem:[%s309_s3 + $0x18] sm:$0xff] %v181_v16  ;;  %v179_v18 = vadd.f32 %v200_v10, %v144_v17 }
  0xeb   :  { %183 = vst [vmem:[%s309_s3 + $0x8] sm:$0xff] %v179_v18 }

// kernel: transformer_forward.39
= control target key start
LH: loop header
LB: loop body
LE: loop exit
PB: predicated region body
PF: predicated region fallthrough
CT: control target
= control target key end

     0   :  { %v548_v1 = vmov 0   ;;  %v362_v27 = vlaneseq  ;;  %s674_s1 = inlined_call_operand.vmem [shape: bf16[128,384], index: 1, kind: input, shape index: {}]   ;;  %s675_s0 = inlined_call_operand.vmem [shape: bf16[32,128], index: 0, kind: input, shape index: {}]   ;;  %s676_s2 = inlined_call_operand.vmem [shape: f32[1,384], index: 2, kind: input, shape index: {}]   ;;  %s677_s3 = inlined_call_operand.vmem [shape: bf16[32,384], index: 3, kind: output, shape index: {}]  }
   0x1   :  { %v514_v0 = vld [vmem:[%s674_s1 + $0xac] ss:$12 sps:$4 sm:$0xff]   ;;  %251 = vmatprep.mubr.bf16.mxu0 %v548_v1  ;;  %v516_v2 = vld [vmem:[%s674_s1 + $0xa8] ss:$12 sps:$4 sm:$0xff]   ;;  %v517_v3 = vld [vmem:[%s674_s1 + $0xb0] ss:$12 sps:$4 sm:$0xff]  }
   0x2   :  { %219 = vmatprep.subr.bf16.mxu0 %v514_v0  ;;  %v518_v4 = vld [vmem:[%s674_s1 + $0x94] ss:$12 sps:$4 sm:$0xff]   ;;  %v520_v5 = vld [vmem:[%s674_s1 + $0x90] ss:$12 sps:$4 sm:$0xff]   ;;  %493 = vmatprep.subr.bf16.mxu1 %v517_v3  ;;  %v521_v6 = vld [vmem:[%s674_s1 + $0x98] ss:$12 sps:$4 sm:$0xff]  }
   0x3   :  { %220 = vmatpush1.bf16.msra.mxu0 %v516_v2  ;;  %494 = vmatpush3.bf16.msra.mxu1 %v517_v3  ;;  %v522_v7 = vld [vmem:[%s674_s1 + $0x7c] ss:$12 sps:$4 sm:$0xff]   ;;  %v525_v8 = vld [vmem:[%s674_s1 + $0x80] ss:$12 sps:$4 sm:$0xff]   ;;  %v524_v9 = vld [vmem:[%s674_s1 + $0x78] ss:$12 sps:$4 sm:$0xff]  }
   0x4   :  { %221 = vmatprep.subr.bf16.mxu0 %v518_v4  ;;  %495 = vmatprep.subr.bf16.mxu1 %v521_v6  ;;  %v526_v10 = vld [vmem:[%s674_s1 + $0x64] ss:$12 sps:$4 sm:$0xff]   ;;  %v529_v11 = vld [vmem:[%s674_s1 + $0x68] ss:$12 sps:$4 sm:$0xff]   ;;  %v528_v12 = vld [vmem:[%s674_s1 + $0x60] ss:$12 sps:$4 sm:$0xff]  }
   0x5   :  { %v530_v13 = vld [vmem:[%s674_s1 + $0x4c] ss:$12 sps:$4 sm:$0xff]   ;;  %v533_v14 = vld [vmem:[%s674_s1 + $0x50] ss:$12 sps:$4 sm:$0xff]   ;;  %v532_v15 = vld [vmem:[%s674_s1 + $0x48] ss:$12 sps:$4 sm:$0xff]  }
   0x6   :  { %v534_v16 = vld [vmem:[%s674_s1 + $0x34] ss:$12 sps:$4 sm:$0xff]   ;;  %v536_v17 = vld [vmem:[%s674_s1 + $0x30] ss:$12 sps:$4 sm:$0xff]   ;;  %v537_v18 = vld [vmem:[%s674_s1 + $0x38] ss:$12 sps:$4 sm:$0xff]  }
   0x7   :  { %222 = vmatpush1.bf16.msra.mxu0 %v520_v5  ;;  %496 = vmatpush3.bf16.msra.mxu1 %v521_v6  ;;  %v546_v19 = vld [vmem:[%s675_s0] sm:$0xff]   ;;  %v538_v20 = vld [vmem:[%s674_s1 + $0x1c] ss:$12 sps:$4 sm:$0xff]   ;;  %v363_v28 = vshrl.u32 %v362_v27, 7 }
   0x8   :  { %223 = vmatprep.subr.bf16.mxu0 %v522_v7  ;;  %497 = vmatprep.subr.bf16.mxu1 %v525_v8  ;;  %v541_v21 = vld [vmem:[%s674_s1 + $0x20] ss:$12 sps:$4 sm:$0xff]   ;;  %v540_v22 = vld [vmem:[%s674_s1 + $0x18] ss:$12 sps:$4 sm:$0xff]   ;;  %v545_v24 = vld [vmem:[%s674_s1 + $0x8] ss:$12 sps:$4 sm:$0xff]  }
   0x9   :  { %509 = vmatprep.mubr.bf16.mxu1 %v546_v19  ;;  %v542_v23 = vld [vmem:[%s674_s1 + $0x4] ss:$12 sps:$4 sm:$0xff]   ;;  %v544_v25 = vld [vmem:[%s674_s1] ss:$12 sps:$4 sm:$0xff]   ;;  %v364_v29 = vsub.s32 0, %v363_v28  ;;  %v368_v30 = vsub.s32 1, %v363_v28 }
   0xa   :  { %v547_v26 = vld [vmem:[%s675_s0 + $0x8] sm:$0xff]   ;;  %v372_v31 = vsub.s32 2, %v363_v28  ;;  %v360_v32 = vld [vmem:[%s676_s2] sm:$0x7] }
   0xb   :  { %224 = vmatpush1.bf16.msra.mxu0 %v524_v9  ;;  %498 = vmatpush3.bf16.msra.mxu1 %v525_v8  ;;  %v365_v33 = vrot.slane %v360_v32, %v364_v29  ;;  %v369_v34 = vrot.slane %v360_v32, %v368_v30 }
   0xc   :  { %225 = vmatprep.subr.bf16.mxu0 %v526_v10  ;;  %499 = vmatprep.subr.bf16.mxu1 %v529_v11  ;;  %v373_v35 = vrot.slane %v360_v32, %v372_v31 }
   0xf   :  { %226 = vmatpush1.bf16.msra.mxu0 %v528_v12  ;;  %500 = vmatpush3.bf16.msra.mxu1 %v529_v11 }
  0x10   :  { %227 = vmatprep.subr.bf16.mxu0 %v530_v13  ;;  %501 = vmatprep.subr.bf16.mxu1 %v533_v14 }
  0x13   :  { %228 = vmatpush1.bf16.msra.mxu0 %v532_v15  ;;  %502 = vmatpush3.bf16.msra.mxu1 %v533_v14 }
  0x14   :  { %229 = vmatprep.subr.bf16.mxu0 %v534_v16  ;;  %503 = vmatprep.subr.bf16.mxu1 %v537_v18 }
  0x17   :  { %230 = vmatpush1.bf16.msra.mxu0 %v536_v17  ;;  %504 = vmatpush3.bf16.msra.mxu1 %v537_v18 }
  0x18   :  { %231 = vmatprep.subr.bf16.mxu0 %v538_v20  ;;  %505 = vmatprep.subr.bf16.mxu1 %v541_v21 }
  0x1b   :  { %232 = vmatpush1.bf16.msra.mxu0 %v540_v22  ;;  %506 = vmatpush3.bf16.msra.mxu1 %v541_v21 }
  0x1c   :  { %233 = vmatprep.subr.bf16.mxu0 %v542_v23  ;;  %507 = vmatprep.subr.bf16.mxu1 %v545_v24 }
  0x1f   :  { %234 = vmatpush1.bf16.msra.mxu0 %v544_v25  ;;  %508 = vmatpush3.bf16.msra.mxu1 %v545_v24 }
  0x22   :  { %252 = vmatmul.mubr.bf16.vlgmr.msra.gmra.mxu0 %v546_v19  ;;  %510 = vmatmul.mubr.bf16.vlgmr.msra.gmra.mxu1 %v547_v26 }
  0x23   :  { %261 = vmatprep.mubr.bf16.mxu0 %v548_v1 }
  0x2a   :  { %262 = vmatmul.mubr.bf16.gmra.mxu0 %v547_v26 }
  0xe2   :  { %v253_v36 = vpop.f32.mrf.mxu0  ;;  %v511_v38 = vpop.f32.mrf.mxu1 }
  0xe3   :  { %v377_v39 = vadd.f32 %v365_v33, %v253_v36  ;;  %v385_v41 = vadd.f32 %v511_v38, %v373_v35 }
  0xe4   :  { %v255_v37 = vpop.f32.mrf.mxu0  ;;  %v306_v43 = vpop.f32.mrf.mxu1 }
  0xe5   :  { %v378_v40 = vadd.f32 %v369_v34, %v255_v37  ;;  %v480_v45 = vpack.c.bf16 %v385_v41, %v385_v41  ;;  %v379_v46 = vadd.f32 %v373_v35, %v306_v43 }
  0xe6   :  { %v257_v42 = vpop.f32.mrf.mxu0  ;;  %v512_v48 = vpop.f32.mrf.mxu1 }
  0xe7   :  { %v475_v44 = vpack.c.bf16 %v378_v40, %v377_v39  ;;  %434 = vst [vmem:[%s677_s3 + $0x20] sm:$0xf] %v480_v45  ;;  %v380_v49 = vadd.f32 %v365_v33, %v257_v42  ;;  %v476_v50 = vpack.c.bf16 %v379_v46, %v379_v46  ;;  %v388_v52 = vadd.f32 %v512_v48, %v373_v35 }
  0xe8   :  { %v259_v47 = vpop.f32.mrf.mxu0  ;;  %v309_v54 = vpop.f32.mrf.mxu1 }
  0xe9   :  { %429 = vst [vmem:[%s677_s3] sm:$0xff] %v475_v44  ;;  %v381_v51 = vadd.f32 %v369_v34, %v259_v47  ;;  %430 = vst [vmem:[%s677_s3 + $0x8] sm:$0xf] %v476_v50  ;;  %v482_v56 = vpack.c.bf16 %v388_v52, %v388_v52  ;;  %v382_v57 = vadd.f32 %v373_v35, %v309_v54 }
  0xea   :  { %v263_v53 = vpop.f32.mrf.mxu0 }
  0xeb   :  { %v477_v55 = vpack.c.bf16 %v381_v51, %v380_v49  ;;  %436 = vst [vmem:[%s677_s3 + $0x2c] sm:$0xf] %v482_v56  ;;  %v383_v59 = vadd.f32 %v365_v33, %v263_v53  ;;  %v478_v60 = vpack.c.bf16 %v382_v57, %v382_v57 }
  0xec   :  { %v265_v58 = vpop.f32.mrf.mxu0 }
  0xed   :  { %431 = vst [vmem:[%s677_s3 + $0xc] sm:$0xff] %v477_v55  ;;  %v384_v61 = vadd.f32 %v369_v34, %v265_v58  ;;  %432 = vst [vmem:[%s677_s3 + $0x14] sm:$0xf] %v478_v60 }
  0xee   :  { %v267_v62 = vpop.f32.mrf.mxu0 }
  0xef   :  { %v479_v63 = vpack.c.bf16 %v384_v61, %v383_v59  ;;  %v386_v1 = vadd.f32 %v365_v33, %v267_v62 }
  0xf0   :  { %v269_v0 = vpop.f32.mrf.mxu0 }
  0xf1   :  { %433 = vst [vmem:[%s677_s3 + $0x18] sm:$0xff] %v479_v63  ;;  %v387_v2 = vadd.f32 %v369_v34, %v269_v0 }
  0xf3   :  { %v481_v3 = vpack.c.bf16 %v387_v2, %v386_v1 }
  0xf5   :  { %435 = vst [vmem:[%s677_s3 + $0x24] sm:$0xff] %v481_v3 }

// kernel: transformer_forward.40
= control target key start
LH: loop header
LB: loop body
LE: loop exit
PB: predicated region body
PF: predicated region fallthrough
CT: control target
= control target key end

     0   :  { %s1640_s9 = smov 0   ;;  %s1786_s0 = inlined_call_operand.vmem [shape: bf16[2,16,384], index: 0, kind: input, shape index: {}]   ;;  %s1787_s1 = inlined_call_operand.vmem [shape: f32[2,1,16], index: 1, kind: input, shape index: {}]   ;;  %s1788_s2 = inlined_call_operand.vmem [shape: bf16[2,16,128], index: 2, kind: output, shape index: {}]  }
   0x1 LB: > { %s1412_s10 = sadd.s32 4294967295, %s1615_s9   ;;  %p1416_p0 = scmp.ge.s32.totalorder %s1615_s9, 1  ;;  %s1615_s9 = sphi %s1640_s9, %s12_s9  }
   0x2   : > { %p120_p1 = scmp.lt.s32.totalorder %s1615_s9, 3 }
   0x4   : > { %p121_p2 = pnand %p1416_p0, %p120_p1 }
   0x5   : > { %p145_p3 = scmp.lt.s32.totalorder (!%p121_p2), %s1412_s10, 1  ;;  %s1617_s15 = smov (!%p121_p2), 64  }
   0x6   : > { %124 = sbr.rel (%p121_p2) target bundleno = 1255 (0x4e7), region = 28  ;;  %s1618_s16 = smov (!%p121_p2), 96  }
   0x7   : > { %s1619_s17 = smov (!%p121_p2), 32  }
   0xb   : > { %s1790_s10 = smov (!%p145_p3, %s1412_s10), 1  ;;  %v1620_v4 = vmov 0.0   ;;  %vm1621_vm0 = vmmov 0   ;;  %vm300_vm1 = vcmask 261120   ;;  %v488_v41 = vlaneseq }
   0xc   : > { %s1544_s11 = smul.u32 24, %s1790_s10  ;;  %1484 = vmatprep.subr.bf16.mxu0 %v1620_v4  ;;  %1492 = vmatprep.subr.bf16.mxu1 %v1620_v4  ;;  %s152_s20 = scalar_lea.vmem %s1787_s1, %s1790_s10  ;;  %v1622_v45 = vmov 0   ;;  %vm501_vm4 = vcmask 130048   ;;  %vm1332_vm5 = vcmask 523264   ;;  %vm1335_vm6 = vcmask 785408  }
   0xd   : > { %1488 = vmatprep.mubr.msk.bf16.mxu0 %vm1621_vm0, %v1620_v4  ;;  %1496 = vmatprep.mubr.msk.bf16.mxu1 %vm1621_vm0, %v1620_v4  ;;  %v216_v42 = vld [vmem:[%s152_s20] sm:$0x1]  ;;  %v1682_v43 = vshrl.u32 %v488_v41, 7  ;;  %s1452_s21 = sshll.u32 %s1790_s10, 3 }
   0xe   : > { %s1654_s14 = scalar_lea.vmem %s1786_s0, %s1544_s11  ;;  %vm486_vm2 = vcmp.gt.f32.partialorder %v216_v42, 0.0  ;;  %s157_s24 = scalar_lea.vmem %s1788_s2, %s1452_s21 }
   0xf   : > { %v160_v0 = vld [vmem:[%s1654_s14] sm:$0xff]  ;;  %v162_v1 = vld [vmem:[%s1654_s14 + $0xc] sm:$0xff]  ;;  %v490_v44 = vsub.s32 0, %v1682_v43  ;;  %v487_v46 = vsel %vm486_vm2, 1, %v1622_v45 }
  0x10   : > { %190 = vrot.lane.b32.xlu1 %v160_v0, %s1617_s15  ;;  %184 = vrot.lane.b32.xlu0 %v160_v0, %s1618_s16  ;;  %v164_v2 = vmul.bf16 1043676725, %v160_v0  ;;  %v165_v3 = vmul.bf16 1043676725, %v162_v1  ;;  %v182_v6 = vrot.slane %v160_v0, 4  ;;  %v183_v7 = vrot.slane %v162_v1, 4 }
  0x11   : > { %v491_v47 = vrot.slane %v487_v46, %v490_v44 }
  0x12   : > { %v1424_v5 = vcombine.low %v164_v2, %v165_v3  ;;  %v1420_v8 = vcombine.low %v182_v6, %v183_v7 }
  0x13   : > { %vm492_vm3 = vcmp.eq.s32.totalorder %v491_v47, 1 }
  0x14   : > { %192 = vrot.lane.b32.xlu1 %v162_v1, %s1617_s15  ;;  %186 = vrot.lane.b32.xlu0 %v162_v1, %s1618_s16 }
  0x18   : > { %196 = vrot.lane.b32.xlu0 %v160_v0, %s1619_s17  ;;  %198 = vrot.lane.b32.xlu1 %v162_v1, %s1619_s17 }
  0x1c   : > { %168 = vrot.lane.b32.xlu0 %v164_v2, %s1618_s16  ;;  %170 = vrot.lane.b32.xlu1 %v165_v3, %s1618_s16 }
  0x20   : > { %172 = vrot.lane.b32.xlu0 %v164_v2, %s1617_s15  ;;  %174 = vrot.lane.b32.xlu1 %v165_v3, %s1617_s15 }
  0x24   : > { %176 = vrot.lane.b32.xlu0 %v164_v2, %s1619_s17  ;;  %178 = vrot.lane.b32.xlu1 %v165_v3, %s1619_s17 }
  0x42   : > { %233 = vxpose.xlu0.c.b16.start.end [1/1] (short) (narrow) %v1420_v8, 32 }
  0x82   : > { %v191_v9 = vpop.permute.xlu1 %190  ;;  %v185_v10 = vpop.permute.xlu0 %184 }
  0x83   : > { %v194_v11 = vrot.slane %v191_v9, 4  ;;  %v188_v14 = vrot.slane %v185_v10, 4 }
  0x86   : > { %v193_v12 = vpop.permute.xlu1 %192  ;;  %v187_v13 = vpop.permute.xlu0 %186 }
  0x87   : > { %v195_v15 = vrot.slane %v193_v12, 4  ;;  %v189_v16 = vrot.slane %v187_v13, 4 }
  0x89   : > { %v1421_v17 = vcombine.low %v188_v14, %v189_v16  ;;  %v1422_v18 = vcombine.low %v194_v11, %v195_v15  ;;  %v1702_v16 = vld [vmem:[%s1654_s14 + $0x14] sm:$0xf] }
  0x8a   : > { %v199_v19 = vpop.permute.xlu1 %198  ;;  %v197_v20 = vpop.permute.xlu0 %196 }
  0x8b   : > { %249 = vxpose.xlu1.c.b16.start.end [1/1] (short) (narrow) %v1421_v17, 32  ;;  %265 = vxpose.xlu0.c.b16.start.end [1/1] (short) (narrow) %v1422_v18, 32  ;;  %v201_v21 = vrot.slane %v199_v19, 4  ;;  %v200_v22 = vrot.slane %v197_v20, 4  ;;  %v1705_v17 = vld [vmem:[%s1654_s14 + $0x8] sm:$0xf] }
  0x8c   : > { %v1432_v18 = vcombine.low %v1705_v17, %v1702_v16 }
  0x8d   : > { %v1423_v23 = vcombine.low %v200_v22, %v201_v21 }
  0x8e   : > { %v169_v24 = vpop.permute.xlu0 %168  ;;  %v171_v29 = vpop.permute.xlu1 %170 }
  0x8f   : > { %v1426_v37 = vcombine.low %v169_v24, %v171_v29 }
  0x90   : > { %281 = vxpose.xlu0.c.b16.start.end [1/1] (short) (narrow) %v1423_v23, 32 }
  0x92   : > { %v173_v25 = vpop.permute.xlu0 %172  ;;  %v175_v30 = vpop.permute.xlu1 %174 }
  0x93   : > { %v1428_v38 = vcombine.low %v173_v25, %v175_v30 }
  0x96   : > { %v177_v26 = vpop.permute.xlu0 %176  ;;  %v179_v31 = vpop.permute.xlu1 %178 }
  0x97   : > { %v1430_v40 = vcombine.low %v177_v26, %v179_v31 }
  0xa4   : > { %v241_v27 = vpop.trf.xlu0 }
  0xa8   : > { %v242_v28 = vpop.trf.xlu0 }
  0xa9   : > { %1485 = vmatpush3.bf16.msra.mxu0 %v242_v28 }
  0xaa   : > { %1486 = vmatprep.subr.bf16.mxu0 %v1620_v4 }
  0xad   : > { %1487 = vmatpush3.bf16.msra.mxu0 %v241_v27 }
  0xae   : > { %1500 = vmatprep.subr.bf16.mxu0 %v1620_v4 }
  0xb0   : > { %1489 = vmatmul.mubr.msk.bf16.vlgmr.msra.gmra.mxu0 %vm300_vm1, %v1424_v5 }
  0xb1   : > { %1504 = vmatprep.mubr.msk.bf16.mxu0 %vm1621_vm0, %v1620_v4 }
  0xed   : > { %v257_v32 = vpop.trf.xlu1  ;;  %v273_v33 = vpop.trf.xlu0 }
  0xf1   : > { %v258_v34 = vpop.trf.xlu1  ;;  %v274_v35 = vpop.trf.xlu0 }
  0xf2   : > { %1493 = vmatpush3.bf16.msra.mxu1 %v258_v34  ;;  %1501 = vmatpush3.bf16.msra.mxu0 %v274_v35 }
  0xf3   : > { %1494 = vmatprep.subr.bf16.mxu1 %v1620_v4  ;;  %1502 = vmatprep.subr.bf16.mxu0 %v1620_v4 }
  0xf5   : > { %v289_v36 = vpop.trf.xlu0 }
  0xf6   : > { %1495 = vmatpush3.bf16.msra.mxu1 %v257_v32  ;;  %1503 = vmatpush3.bf16.msra.mxu0 %v273_v33 }
  0xf7   : > { %1508 = vmatprep.subr.bf16.mxu1 %v1620_v4 }
  0xf9   : > { %1497 = vmatmul.mubr.msk.bf16.vlgmr.msra.gmra.mxu1 %vm300_vm1, %v1426_v37  ;;  %v290_v39 = vpop.trf.xlu0  ;;  %1505 = vmatmul.mubr.msk.bf16.vlgmr.msra.gmra.mxu0 %vm300_vm1, %v1428_v38 }
  0xfa   : > { %1509 = vmatpush3.bf16.msra.mxu1 %v290_v39  ;;  %1512 = vmatprep.mubr.msk.bf16.mxu1 %vm1621_vm0, %v1620_v4 }
  0xfb   : > { %1510 = vmatprep.subr.bf16.mxu1 %v1620_v4 }
  0xfe   : > { %1511 = vmatpush3.bf16.msra.mxu1 %v289_v36 }
 0x101   : > { %1513 = vmatmul.mubr.msk.bf16.vlgmr.msra.gmra.mxu1 %vm300_vm1, %v1430_v40 }
 0x170   : > { %v338_v48 = vpop.f32.mrf.mxu0 }
 0x171   : > { %v493_v49 = vsel %vm492_vm3, %v338_v48, -1e+09 }
 0x172   : > { %v1490_v50 = vpop.f32.mrf.mxu0  ;;  %v502_v51 = vsel %vm501_vm4, %v493_v49, -inf }
 0x173   : > { %503 = vmax.xlane.f32.xlu1 %v502_v51 }
 0x174   : > { %v341_v52 = vpop.f32.mrf.mxu0 }
 0x175   : > { %v494_v53 = vsel %vm492_vm3, %v341_v52, -1e+09 }
 0x176   : > { %v505_v54 = vsel %vm501_vm4, %v494_v53, -inf  ;;  %v1491_v55 = vpop.f32.mrf.mxu0 }
 0x177   : > { %506 = vmax.xlane.f32.xlu0 %v505_v54 }
 0x1b9   : > { %v385_v56 = vpop.f32.mrf.mxu1  ;;  %v432_v57 = vpop.f32.mrf.mxu0 }
 0x1ba   : > { %v495_v58 = vsel %vm492_vm3, %v385_v56, -1e+09  ;;  %v497_v59 = vsel %vm492_vm3, %v432_v57, -1e+09 }
 0x1bb   : > { %v1498_v60 = vpop.f32.mrf.mxu1  ;;  %v1506_v61 = vpop.f32.mrf.mxu0  ;;  %v508_v62 = vsel %vm501_vm4, %v495_v58, -inf  ;;  %v514_v63 = vsel %vm501_vm4, %v497_v59, -inf }
 0x1bc   : > { %509 = vmax.xlane.f32.xlu1 %v508_v62  ;;  %515 = vmax.xlane.f32.xlu0 %v514_v63 }
 0x1bd   : > { %v388_v0 = vpop.f32.mrf.mxu1  ;;  %v435_v1 = vpop.f32.mrf.mxu0 }
 0x1be   : > { %v496_v2 = vsel %vm492_vm3, %v388_v0, -1e+09  ;;  %v498_v6 = vsel %vm492_vm3, %v435_v1, -1e+09 }
 0x1bf   : > { %v1499_v3 = vpop.f32.mrf.mxu1  ;;  %v1507_v4 = vpop.f32.mrf.mxu0  ;;  %v511_v5 = vsel %vm501_vm4, %v496_v2, -inf  ;;  %v517_v11 = vsel %vm501_vm4, %v498_v6, -inf }
 0x1c0   : > { %512 = vmax.xlane.f32.xlu1 %v511_v5 }
 0x1c1   : > { %v479_v7 = vpop.f32.mrf.mxu1 }
 0x1c2   : > { %v499_v8 = vsel %vm492_vm3, %v479_v7, -1e+09 }
 0x1c3   : > { %v1514_v9 = vpop.f32.mrf.mxu1  ;;  %v520_v10 = vsel %vm501_vm4, %v499_v8, -inf }
 0x1c4   : > { %521 = vmax.xlane.f32.xlu0 %v520_v10  ;;  %518 = vmax.xlane.f32.xlu1 %v517_v11 }
 0x1c5   : > { %v482_v12 = vpop.f32.mrf.mxu1 }
 0x1c6   : > { %v500_v13 = vsel %vm492_vm3, %v482_v12, -1e+09 }
 0x1c7   : > { %v1515_v14 = vpop.f32.mrf.mxu1  ;;  %v523_v15 = vsel %vm501_vm4, %v500_v13, -inf }
 0x1c8   : > { %524 = vmax.xlane.f32.xlu1 %v523_v15 }
 0x1d9   : > { %206 = vrot.lane.b32.xlu1 %v1702_v16, %s1618_s16 }
 0x1da   : > { %204 = vrot.lane.b32.xlu0 %v1705_v17, %s1618_s16 }
 0x1dd   : > { %210 = vrot.lane.b32.xlu1 %v1702_v16, %s1617_s15 }
 0x1de   : > { %208 = vrot.lane.b32.xlu0 %v1705_v17, %s1617_s15 }
 0x1e1   : > { %212 = vrot.lane.b32.xlu1 %v1705_v17, %s1619_s17 }
 0x1e2   : > { %214 = vrot.lane.b32.xlu0 %v1702_v16, %s1619_s17 }
 0x1fc   : > { %v504_v19 = vpop.xlane.xlu1 %503 }
 0x1fd   : > { %v526_v20 = vsub.f32 %v493_v49, %v504_v19 }
 0x1ff   : > { %v534_v21 = vmul.f32 1.442695, %v526_v20 }
 0x200   : > { %v507_v22 = vpop.xlane.xlu0 %506 }
 0x201   : > { %1577 = vpow2.f32 %v534_v21  ;;  %v527_v23 = vsub.f32 %v494_v53, %v507_v22 }
 0x203   : > { %v536_v24 = vmul.f32 1.442695, %v527_v23 }
 0x205   : > { %1579 = vpow2.f32 %v536_v24 }
 0x20e   : > { %v1721_v25 = vpop.eup %1577 }
 0x20f   : > { %v550_v26 = vsel %vm501_vm4, %v1721_v25, 0.0 }
 0x210   : > { %551 = vadd.xlane.f32.xlu1 %v550_v26 }
 0x212   : > { %v1725_v27 = vpop.eup %1579 }
 0x213   : > { %v553_v28 = vsel %vm501_vm4, %v1725_v27, 0.0 }
 0x214   : > { %554 = vadd.xlane.f32.xlu0 %v553_v28 }
 0x245   : > { %v510_v29 = vpop.xlane.xlu1 %509  ;;  %v516_v30 = vpop.xlane.xlu0 %515 }
 0x246   : > { %v528_v31 = vsub.f32 %v495_v58, %v510_v29  ;;  %v530_v33 = vsub.f32 %v497_v59, %v516_v30 }
 0x248   : > { %v538_v32 = vmul.f32 1.442695, %v528_v31  ;;  %v542_v36 = vmul.f32 1.442695, %v530_v33 }
 0x249   : > { %v513_v34 = vpop.xlane.xlu1 %512 }
 0x24a   : > { %1581 = vpow2.f32 %v538_v32  ;;  %v529_v35 = vsub.f32 %v496_v2, %v513_v34 }
 0x24c   : > { %v540_v37 = vmul.f32 1.442695, %v529_v35 }
 0x24d   : > { %v522_v38 = vpop.xlane.xlu0 %521  ;;  %v519_v39 = vpop.xlane.xlu1 %518 }
 0x24e   : > { %1583 = vpow2.f32 %v540_v37  ;;  %v532_v40 = vsub.f32 %v499_v8, %v522_v38  ;;  %v531_v41 = vsub.f32 %v498_v6, %v519_v39 }
 0x24f   : > { %1585 = vpow2.f32 %v542_v36 }
 0x250   : > { %v544_v42 = vmul.f32 1.442695, %v531_v41  ;;  %v546_v44 = vmul.f32 1.442695, %v532_v40 }
 0x251   : > { %v525_v45 = vpop.xlane.xlu1 %524  ;;  %v205_v61 = vpop.permute.xlu0 %204 }
 0x252   : > { %v533_v46 = vsub.f32 %v500_v13, %v525_v45  ;;  %1587 = vpow2.f32 %v544_v42 }
 0x253   : > { %1589 = vpow2.f32 %v546_v44 }
 0x254   : > { %v548_v47 = vmul.f32 1.442695, %v533_v46 }
 0x255   : > { %v207_v60 = vpop.permute.xlu1 %206  ;;  %v209_v63 = vpop.permute.xlu0 %208 }
 0x256   : > { %1591 = vpow2.f32 %v548_v47  ;;  %v1433_v0 = vcombine.low %v205_v61, %v207_v60 }
 0x257   : > { %v1582_v48 = vpop.eup %1581 }
 0x258   : > { %v556_v49 = vsel %vm501_vm4, %v1582_v48, 0.0 }
 0x259   : > { %557 = vadd.xlane.f32.xlu0 %v556_v49  ;;  %v211_v62 = vpop.permute.xlu1 %210  ;;  %v215_v2 = vpop.permute.xlu0 %214 }
 0x25a   : > { %v1434_v4 = vcombine.low %v209_v63, %v211_v62 }
 0x25b   : > { %v1584_v50 = vpop.eup %1583 }
 0x25c   : > { %v559_v51 = vsel %vm501_vm4, %v1584_v50, 0.0  ;;  %v1731_v52 = vpop.eup %1585 }
 0x25d   : > { %560 = vadd.xlane.f32.xlu1 %v559_v51  ;;  %v562_v54 = vsel %vm501_vm4, %v1731_v52, 0.0  ;;  %v213_v1 = vpop.permute.xlu1 %212 }
 0x25e   : > { %v1435_v3 = vcombine.low %v213_v1, %v215_v2  ;;  %v1623_v1 = vmov 1983009808  }
 0x25f   : > { %v1733_v53 = vpop.eup %1587  ;;  %v1037_v2 = vunpack.c.l.s4 %v1623_v1 }
 0x260   : > { %v565_v55 = vsel %vm501_vm4, %v1733_v53, 0.0  ;;  %v1739_v56 = vpop.eup %1589 }
 0x261   : > { %563 = vadd.xlane.f32.xlu1 %v562_v54  ;;  %566 = vadd.xlane.f32.xlu0 %v565_v55  ;;  %v568_v59 = vsel %vm501_vm4, %v1739_v56, 0.0 }
 0x263   : > { %v1741_v57 = vpop.eup %1591 }
 0x264   : > { %v571_v58 = vsel %vm501_vm4, %v1741_v57, 0.0 }
 0x265   : > { %572 = vadd.xlane.f32.xlu1 %v571_v58  ;;  %569 = vadd.xlane.f32.xlu0 %v568_v59 }
 0x292   : > { %626 = vxpose.xlu1.c.b16.start.end [1/1] (short) (narrow) %v1433_v0, 32  ;;  %610 = vxpose.xlu0.c.b16.start.end [1/1] (short) (narrow) %v1432_v18, 32 }
 0x297   : > { %658 = vxpose.xlu1.c.b16.start.end [1/1] (short) (narrow) %v1435_v3, 32  ;;  %642 = vxpose.xlu0.c.b16.start.end [1/1] (short) (narrow) %v1434_v4, 32  ;;  %v1624_v3 = vmov 1934713408  }
 0x298   : > { %v1069_v4 = vunpack.c.l.s4 %v1624_v3 }
 0x299   : > { %v552_v5 = vpop.xlane.xlu1 %551 }
 0x29a   : > { %1593 = vrcp.f32 %v552_v5 }
 0x29d   : > { %v555_v6 = vpop.xlane.xlu0 %554 }
 0x29e   : > { %1595 = vrcp.f32 %v555_v6  ;;  %v1038_v6 = vunpack.c.0.s8 %v1037_v2 }
 0x2a7   : > { %v1594_v7 = vpop.eup %1593 }
 0x2a8   : > { %v582_v9 = vmul.f32 %v1594_v7, %v1721_v25 }
 0x2ab   : > { %v1596_v8 = vpop.eup %1595 }
 0x2ac   : > { %v583_v10 = vmul.f32 %v1596_v8, %v1725_v27  ;;  %v1070_v8 = vunpack.c.0.s8 %v1069_v4 }
 0x2ae   : > { %v590_v11 = vpack.c.bf16 %v583_v10, %v582_v9  ;;  %v1041_v9 = vsub.s32 %v1038_v6, %v1682_v43 }
 0x2b0   : > { %1540 = vmatprep.subr.msk.bf16.mxu0 %vm501_vm4, %v590_v11  ;;  %v681_v12 = vsel %vm501_vm4, %v590_v11, 0 }
 0x2b1   : > { %1517 = vmatpush3.bf16.xpose.msra.mxu0 %v681_v12 }
 0x2e2   : > { %v558_v13 = vpop.xlane.xlu0 %557 }
 0x2e3   : > { %1597 = vrcp.f32 %v558_v13 }
 0x2e6   : > { %v561_v14 = vpop.xlane.xlu1 %560 }
 0x2e7   : > { %1599 = vrcp.f32 %v561_v14 }
 0x2ea   : > { %v564_v15 = vpop.xlane.xlu1 %563  ;;  %v567_v16 = vpop.xlane.xlu0 %566 }
 0x2eb   : > { %1601 = vrcp.f32 %v564_v15 }
 0x2ec   : > { %1603 = vrcp.f32 %v567_v16  ;;  %v1073_v16 = vsub.s32 %v1070_v8, %v1682_v43 }
 0x2ee   : > { %v573_v17 = vpop.xlane.xlu1 %572  ;;  %v570_v18 = vpop.xlane.xlu0 %569 }
 0x2ef   : > { %1605 = vrcp.f32 %v573_v17 }
 0x2f0   : > { %1607 = vrcp.f32 %v570_v18  ;;  %v1598_v19 = vpop.eup %1597 }
 0x2f1   : > { %v584_v23 = vmul.f32 %v1598_v19, %v1582_v48 }
 0x2f4   : > { %v1600_v20 = vpop.eup %1599  ;;  %v634_v21 = vpop.trf.xlu1 }
 0x2f5   : > { %v618_v22 = vpop.trf.xlu0  ;;  %v585_v24 = vmul.f32 %v1600_v20, %v1584_v50  ;;  %1524 = vmatprep.mubr.msk.bf16.mxu1 %vm501_vm4, %v634_v21 }
 0x2f6   : > { %1518 = vmatprep.mubr.msk.bf16.mxu0 %vm501_vm4, %v618_v22 }
 0x2f7   : > { %v591_v25 = vpack.c.bf16 %v585_v24, %v584_v23 }
 0x2f8   : > { %v1602_v26 = vpop.eup %1601  ;;  %v635_v35 = vpop.trf.xlu1 }
 0x2f9   : > { %v1604_v27 = vpop.eup %1603  ;;  %v619_v28 = vpop.trf.xlu0  ;;  %1541 = vmatprep.subr.msk.bf16.mxu1 %vm501_vm4, %v591_v25  ;;  %v739_v29 = vsel %vm501_vm4, %v591_v25, 0  ;;  %v586_v30 = vmul.f32 %v1602_v26, %v1731_v52 }
 0x2fa   : > { %1519 = vmatmul.mubr.msk.bf16.vlgmr.msra.gmra.mxu0 %vm501_vm4, %v619_v28  ;;  %1523 = vmatpush3.bf16.xpose.msra.mxu1 %v739_v29  ;;  %v587_v31 = vmul.f32 %v1604_v27, %v1733_v53 }
 0x2fc   : > { %v1606_v32 = vpop.eup %1605  ;;  %v592_v33 = vpack.c.bf16 %v587_v31, %v586_v30  ;;  %v666_v41 = vpop.trf.xlu1 }
 0x2fd   : > { %v1608_v34 = vpop.eup %1607  ;;  %v589_v36 = vmul.f32 %v1606_v32, %v1741_v57  ;;  %v650_v37 = vpop.trf.xlu0 }
 0x2fe   : > { %1542 = vmatprep.subr.msk.bf16.mxu0 %vm501_vm4, %v592_v33  ;;  %v797_v38 = vsel %vm501_vm4, %v592_v33, 0  ;;  %v588_v39 = vmul.f32 %v1608_v34, %v1739_v56  ;;  %1530 = vmatprep.mubr.msk.bf16.mxu0 %vm501_vm4, %v650_v37 }
 0x2ff   : > { %1529 = vmatpush3.bf16.xpose.msra.mxu0 %v797_v38 }
 0x300   : > { %v593_v40 = vpack.c.bf16 %v589_v36, %v588_v39  ;;  %v667_v45 = vpop.trf.xlu1 }
 0x301   : > { %1525 = vmatmul.mubr.msk.bf16.vlgmr.msra.gmra.mxu1 %vm501_vm4, %v635_v35  ;;  %v651_v44 = vpop.trf.xlu0 }
 0x302   : > { %1543 = vmatprep.subr.msk.bf16.mxu1 %vm501_vm4, %v593_v40  ;;  %v855_v42 = vsel %vm501_vm4, %v593_v40, 0  ;;  %1536 = vmatprep.mubr.msk.bf16.mxu1 %vm501_vm4, %v666_v41 }
 0x303   : > { %1535 = vmatpush3.bf16.xpose.msra.mxu1 %v855_v42 }
 0x306   : > { %1531 = vmatmul.mubr.msk.bf16.vlgmr.msra.gmra.mxu0 %vm501_vm4, %v651_v44 }
 0x30a   : > { %1537 = vmatmul.mubr.msk.bf16.vlgmr.msra.gmra.mxu1 %vm501_vm4, %v667_v45 }
 0x3ba   : > { %v1520_v46 = vpop.f32.mrf.mxu0 }
 0x3bc   : > { %v717_v47 = vpop.f32.mrf.mxu0 }
 0x3bd   : > { %906 = vxpose.xlu0.b32.start [1/4] (short) (narrow) %v717_v47, 16 }
 0x3be   : > { %v1521_v48 = vpop.f32.mrf.mxu0 }
 0x3c0   : > { %v720_v49 = vpop.f32.mrf.mxu0 }
 0x3c1   : > { %907 = vxpose.xlu0.b32.cont [2/4] (short) (narrow) %v720_v49, 16  ;;  %v1526_v50 = vpop.f32.mrf.mxu1 }
 0x3c3   : > { %v775_v51 = vpop.f32.mrf.mxu1 }
 0x3c4   : > { %938 = vxpose.xlu1.b32.start [1/4] (short) (narrow) %v775_v51, 16 }
 0x3c5   : > { %908 = vxpose.xlu0.b32.cont [3/4] (short) (narrow) %v1520_v46, 16  ;;  %v1527_v52 = vpop.f32.mrf.mxu1 }
 0x3c6   : > { %v1532_v53 = vpop.f32.mrf.mxu0 }
 0x3c7   : > { %v778_v54 = vpop.f32.mrf.mxu1 }
 0x3c8   : > { %939 = vxpose.xlu1.b32.cont [2/4] (short) (narrow) %v778_v54, 16  ;;  %v833_v55 = vpop.f32.mrf.mxu0 }
 0x3c9   : > { %909 = vxpose.xlu0.b32.end [4/4] (short) (narrow) %v1521_v48, 16 }
 0x3ca   : > { %v1533_v56 = vpop.f32.mrf.mxu0  ;;  %v1538_v57 = vpop.f32.mrf.mxu1 }
 0x3cc   : > { %940 = vxpose.xlu1.b32.cont [3/4] (short) (narrow) %v1526_v50, 16  ;;  %v836_v58 = vpop.f32.mrf.mxu0  ;;  %v891_v59 = vpop.f32.mrf.mxu1 }
 0x3cd   : > { %970 = vxpose.xlu0.b32.start [1/4] (short) (narrow) %v833_v55, 16 }
 0x3ce   : > { %v1539_v60 = vpop.f32.mrf.mxu1 }
 0x3d0   : > { %941 = vxpose.xlu1.b32.end [4/4] (short) (narrow) %v1527_v52, 16  ;;  %v894_v61 = vpop.f32.mrf.mxu1 }
 0x3d1   : > { %971 = vxpose.xlu0.b32.cont [2/4] (short) (narrow) %v836_v58, 16 }
 0x3d4   : > { %1002 = vxpose.xlu1.b32.start [1/4] (short) (narrow) %v891_v59, 16 }
 0x3d5   : > { %972 = vxpose.xlu0.b32.cont [3/4] (short) (narrow) %v1532_v53, 16 }
 0x3d8   : > { %1003 = vxpose.xlu1.b32.cont [2/4] (short) (narrow) %v894_v61, 16 }
 0x3d9   : > { %973 = vxpose.xlu0.b32.end [4/4] (short) (narrow) %v1533_v56, 16 }
 0x3dc   : > { %1004 = vxpose.xlu1.b32.cont [3/4] (short) (narrow) %v1538_v57, 16 }
 0x3e0   : > { %1005 = vxpose.xlu1.b32.end [4/4] (short) (narrow) %v1539_v60, 16 }
 0x439   : > { %v922_v62 = vpop.trf.xlu0 }
 0x43d   : > { %v923_v0 = vpop.trf.xlu0 }
 0x440   : > { %v954_v63 = vpop.trf.xlu1 }
 0x444   : > { %v955_v5 = vpop.trf.xlu1 }
 0x449   : > { %v986_v7 = vpop.trf.xlu0 }
 0x44a   : > { %v1034_v10 = vcombine.low %v922_v62, %v986_v7  ;;  %v1035_v11 = vcombine.high %v922_v62, %v986_v7 }
 0x44c   : > { %v1042_v17 = vrot.slane %v1034_v10, %v1041_v9  ;;  %v1049_v18 = vrot.slane %v1035_v11, %v1041_v9 }
 0x44d   : > { %v987_v13 = vpop.trf.xlu0 }
 0x44e   : > { %v1102_v21 = vcombine.low %v923_v0, %v987_v13  ;;  %v1103_v22 = vcombine.high %v923_v0, %v987_v13 }
 0x450   : > { %v1018_v12 = vpop.trf.xlu1  ;;  %v1110_v34 = vrot.slane %v1102_v21, %v1041_v9  ;;  %v1117_v35 = vrot.slane %v1103_v22, %v1041_v9 }
 0x451   : > { %v1050_v14 = vcombine.low %v954_v63, %v1018_v12  ;;  %v1051_v15 = vcombine.high %v954_v63, %v1018_v12 }
 0x453   : > { %v1058_v19 = vrot.slane %v1050_v14, %v1041_v9  ;;  %v1065_v20 = vrot.slane %v1051_v15, %v1041_v9 }
 0x454   : > { %v1019_v23 = vpop.trf.xlu1 }
 0x455   : > { %v1066_v24 = vcombine.low %v1042_v17, %v1058_v19  ;;  %v1067_v25 = vcombine.high %v1042_v17, %v1058_v19  ;;  %v1082_v26 = vcombine.low %v1049_v18, %v1065_v20  ;;  %v1083_v27 = vcombine.high %v1049_v18, %v1065_v20 }
 0x456   : > { %v1118_v28 = vcombine.low %v955_v5, %v1019_v23  ;;  %v1119_v29 = vcombine.high %v955_v5, %v1019_v23 }
 0x457   : > { %v1074_v30 = vrot.slane %v1066_v24, %v1073_v16  ;;  %v1081_v31 = vrot.slane %v1067_v25, %v1073_v16  ;;  %v1090_v32 = vrot.slane %v1082_v26, %v1073_v16  ;;  %v1097_v33 = vrot.slane %v1083_v27, %v1073_v16 }
 0x458   : > { %v1126_v43 = vrot.slane %v1118_v28, %v1041_v9  ;;  %v1133_v36 = vrot.slane %v1119_v29, %v1041_v9 }
 0x459   : > { %v1170_v37 = vcombine.low %v1074_v30, %v1081_v31  ;;  %v1444_v38 = vcombine.high %v1074_v30, %v1081_v31  ;;  %v1186_v39 = vcombine.low %v1090_v32, %v1097_v33  ;;  %v1445_v40 = vcombine.high %v1090_v32, %v1097_v33 }
 0x45a   : > { %v1134_v41 = vcombine.low %v1110_v34, %v1126_v43  ;;  %v1135_v42 = vcombine.high %v1110_v34, %v1126_v43  ;;  %v1150_v44 = vcombine.low %v1117_v35, %v1133_v36  ;;  %v1151_v45 = vcombine.high %v1117_v35, %v1133_v36 }
 0x45b   : > { %v1177_v46 = vrot.slane %v1170_v37, %v1041_v9  ;;  %v1185_v47 = vrot.slane %v1444_v38, %v1041_v9  ;;  %v1193_v48 = vrot.slane %v1186_v39, %v1041_v9  ;;  %v1201_v49 = vrot.slane %v1445_v40, %v1041_v9 }
 0x45c   : > { %v1142_v50 = vrot.slane %v1134_v41, %v1073_v16  ;;  %v1149_v51 = vrot.slane %v1135_v42, %v1073_v16  ;;  %v1158_v52 = vrot.slane %v1150_v44, %v1073_v16  ;;  %v1165_v53 = vrot.slane %v1151_v45, %v1073_v16 }
 0x45d   : > { %v1203_v54 = vcombine.high %v1177_v46, %v1185_v47  ;;  %v1219_v55 = vcombine.high %v1193_v48, %v1201_v49  ;;  %v1202_v56 = vcombine.low %v1177_v46, %v1185_v47  ;;  %v1218_v57 = vcombine.low %v1193_v48, %v1201_v49 }
 0x45e   : > { %v1238_v58 = vcombine.low %v1142_v50, %v1149_v51  ;;  %v1446_v59 = vcombine.high %v1142_v50, %v1149_v51  ;;  %v1254_v60 = vcombine.low %v1158_v52, %v1165_v53  ;;  %v1447_v61 = vcombine.high %v1158_v52, %v1165_v53 }
 0x45f   : > { %v1210_v62 = vrot.slane %v1202_v56, %v1073_v16  ;;  %v1226_v63 = vrot.slane %v1218_v57, %v1073_v16  ;;  %v1217_v4 = vrot.slane %v1203_v54, %v1073_v16  ;;  %v1233_v5 = vrot.slane %v1219_v55, %v1073_v16 }
 0x460   : > { %v1245_v0 = vrot.slane %v1238_v58, %v1041_v9  ;;  %v1253_v1 = vrot.slane %v1446_v59, %v1041_v9  ;;  %v1261_v2 = vrot.slane %v1254_v60, %v1041_v9  ;;  %v1269_v3 = vrot.slane %v1447_v61, %v1041_v9 }
 0x461   : > { %v1234_v6 = vcombine.low %v1210_v62, %v1226_v63  ;;  %v1236_v17 = vcombine.low %v1217_v4, %v1233_v5  ;;  %v1235_v19 = vcombine.high %v1210_v62, %v1226_v63  ;;  %v1237_v24 = vcombine.high %v1217_v4, %v1233_v5 }
 0x462   : > { %v1271_v7 = vcombine.high %v1245_v0, %v1253_v1  ;;  %v1287_v8 = vcombine.high %v1261_v2, %v1269_v3  ;;  %v1270_v10 = vcombine.low %v1245_v0, %v1253_v1  ;;  %v1286_v11 = vcombine.low %v1261_v2, %v1269_v3 }
 0x464   : > { %v1285_v12 = vrot.slane %v1271_v7, %v1073_v16  ;;  %v1301_v13 = vrot.slane %v1287_v8, %v1073_v16  ;;  %v1278_v14 = vrot.slane %v1270_v10, %v1073_v16  ;;  %v1294_v15 = vrot.slane %v1286_v11, %v1073_v16 }
 0x466   : > { %v1304_v18 = vcombine.low %v1285_v12, %v1301_v13  ;;  %v1303_v20 = vcombine.high %v1278_v14, %v1294_v15  ;;  %v1302_v21 = vcombine.low %v1278_v14, %v1294_v15  ;;  %v1305_v9 = vcombine.high %v1285_v12, %v1301_v13 }
 0x468   : > { %v1566_v22 = vpack.i.bf16 %v1304_v18, %v1236_v17  ;;  %v1561_v23 = vpack.i.bf16 %v1303_v20, %v1235_v19  ;;  %v1571_v25 = vpack.i.bf16 %v1305_v9, %v1237_v24 }
 0x46a   : > { %1567 = vrot.lane.b32.xlu1 %v1566_v22, %s1617_s15  ;;  %1562 = vrot.lane.b32.xlu0 %v1561_v23, %s1619_s17 }
 0x46e   : > { %1572 = vrot.lane.b32.xlu1 %v1571_v25, %s1618_s16 }
 0x4dc   : > { %v1568_v26 = vpop.permute.xlu1 %1567  ;;  %v1563_v27 = vpop.permute.xlu0 %1562 }
 0x4dd   : > { %v1565_v16 = vunpack.i.h.bf16 %v1563_v27  ;;  %v1564_v28 = vunpack.i.l.bf16 %v1563_v27  ;;  %v1570_v29 = vunpack.i.h.bf16 %v1568_v26  ;;  %v1569_v30 = vunpack.i.l.bf16 %v1568_v26 }
 0x4df   : > { %v1330_v31 = vsel %vm300_vm1, %v1234_v6, %v1564_v28  ;;  %v1331_v32 = vsel %vm300_vm1, %v1302_v21, %v1565_v16 }
 0x4e0   : > { %v1573_v33 = vpop.permute.xlu1 %1572  ;;  %v1333_v43 = vsel %vm1332_vm5, %v1330_v31, %v1569_v30  ;;  %v1334_v36 = vsel %vm1332_vm5, %v1331_v32, %v1570_v29 }
 0x4e1   : > { %v1575_v34 = vunpack.i.h.bf16 %v1573_v33  ;;  %v1574_v35 = vunpack.i.l.bf16 %v1573_v33 }
 0x4e3   : > { %v1336_v37 = vsel %vm1335_vm6, %v1333_v43, %v1574_v35  ;;  %v1337_v38 = vsel %vm1335_vm6, %v1334_v36, %v1575_v34 }
 0x4e4   : > { %v1458_v39 = vpack.c.bf16 %v1337_v38, %v1336_v37 }
 0x4e6   : > { %1459 = vst [vmem:[%s157_s24] sm:$0xff] %v1458_v39  }
 0x4e7 PF: > { %s12_s9 = sadd.s32 1, %s1615_s9  }
 0x4e8   : > { %p9_p4 = scmp.ge.s32.totalorder %s12_s9, 4  }
 0x4ea   :  { %11 = sbr.rel (!%p9_p4) target bundleno = 1 (0x1), region = 61 }

// kernel: transformer_forward.42
= control target key start
LH: loop header
LB: loop body
LE: loop exit
PB: predicated region body
PF: predicated region fallthrough
CT: control target
= control target key end

     0   :  { %s181_s0 = inlined_call_operand.vmem [shape: f32[32,128], index: 0, kind: input, shape index: {}]   ;;  %s182_s1 = inlined_call_operand.vmem [shape: f32[32,128], index: 1, kind: input, shape index: {}]   ;;  %s183_s2 = inlined_call_operand.vmem [shape: f32[1,128], index: 2, kind: input, shape index: {}]   ;;  %s184_s3 = inlined_call_operand.vmem [shape: f32[1,128], index: 3, kind: input, shape index: {}]   ;;  %s185_s4 = inlined_call_operand.vmem [shape: f32[32,128], index: 4, kind: output, shape index: {}]  }
   0x1   :  { %v17_v0 = vld [vmem:[%s181_s0] sm:$0xff]  ;;  %v19_v2 = vld [vmem:[%s181_s0 + $0x10] sm:$0xff]  ;;  %v18_v5 = vld [vmem:[%s181_s0 + $0x8] sm:$0xff] }
   0x2   :  { %v21_v1 = vld [vmem:[%s182_s1] sm:$0xff]  ;;  %v23_v4 = vld [vmem:[%s182_s1 + $0x10] sm:$0xff]  ;;  %v22_v6 = vld [vmem:[%s182_s1 + $0x8] sm:$0xff] }
   0x3   :  { %v25_v3 = vadd.f32 %v21_v1, %v17_v0  ;;  %v27_v7 = vadd.f32 %v23_v4, %v19_v2  ;;  %v20_v8 = vld [vmem:[%s181_s0 + $0x18] sm:$0xff]  ;;  %v26_v10 = vadd.f32 %v22_v6, %v18_v5  ;;  %v104_v41 = vld [vmem:[%s183_s2] ss:$0 sm:$0xff] }
   0x4   :  { %v24_v9 = vld [vmem:[%s182_s1 + $0x18] sm:$0xff]  ;;  %v105_v43 = vld [vmem:[%s184_s3] ss:$0 sm:$0xff] }
   0x5   :  { %29 = vadd.xlane.f32.xlu0 %v25_v3  ;;  %33 = vadd.xlane.f32.xlu1 %v27_v7  ;;  %v28_v11 = vadd.f32 %v24_v9, %v20_v8 }
   0x9   :  { %31 = vadd.xlane.f32.xlu0 %v26_v10  ;;  %35 = vadd.xlane.f32.xlu1 %v28_v11 }
  0x8e   :  { %v30_v12 = vpop.xlane.xlu0 %29  ;;  %v34_v14 = vpop.xlane.xlu1 %33 }
  0x8f   :  { %v38_v13 = vmul.f32 0.0078125, %v30_v12  ;;  %v40_v15 = vmul.f32 0.0078125, %v34_v14 }
  0x91   :  { %v42_v16 = vsub.f32 %v25_v3, %v38_v13  ;;  %v44_v17 = vsub.f32 %v27_v7, %v40_v15 }
  0x92   :  { %v32_v18 = vpop.xlane.xlu0 %31  ;;  %v36_v21 = vpop.xlane.xlu1 %35 }
  0x93   :  { %v39_v19 = vmul.f32 0.0078125, %v32_v18  ;;  %v46_v20 = vmul.f32 %v42_v16, %v42_v16  ;;  %v41_v22 = vmul.f32 0.0078125, %v36_v21  ;;  %v48_v24 = vmul.f32 %v44_v17, %v44_v17 }
  0x95   :  { %v43_v23 = vsub.f32 %v26_v10, %v39_v19  ;;  %50 = vadd.xlane.f32.xlu0 %v46_v20  ;;  %v45_v25 = vsub.f32 %v28_v11, %v41_v22 }
  0x97   :  { %v47_v26 = vmul.f32 %v43_v23, %v43_v23  ;;  %v49_v27 = vmul.f32 %v45_v25, %v45_v25 }
  0x99   :  { %54 = vadd.xlane.f32.xlu0 %v48_v24  ;;  %52 = vadd.xlane.f32.xlu1 %v47_v26 }
  0x9d   :  { %56 = vadd.xlane.f32.xlu1 %v49_v27 }
 0x11e   :  { %v51_v28 = vpop.xlane.xlu0 %50 }
 0x11f   :  { %v58_v29 = vmul.f32 0.0078125, %v51_v28 }
 0x121   :  { %v62_v30 = vadd.f32 1e-05, %v58_v29 }
 0x122   :  { %v53_v31 = vpop.xlane.xlu1 %52  ;;  %v55_v32 = vpop.xlane.xlu0 %54 }
 0x123   :  { %106 = vrsqrt.f32 %v62_v30  ;;  %v59_v33 = vmul.f32 0.0078125, %v53_v31  ;;  %v60_v34 = vmul.f32 0.0078125, %v55_v32 }
 0x125   :  { %v63_v35 = vadd.f32 1e-05, %v59_v33  ;;  %v64_v36 = vadd.f32 1e-05, %v60_v34 }
 0x126   :  { %v57_v37 = vpop.xlane.xlu1 %56 }
 0x127   :  { %108 = vrsqrt.f32 %v63_v35  ;;  %v61_v38 = vmul.f32 0.0078125, %v57_v37 }
 0x128   :  { %110 = vrsqrt.f32 %v64_v36 }
 0x129   :  { %v65_v39 = vadd.f32 1e-05, %v61_v38 }
 0x12b   :  { %112 = vrsqrt.f32 %v65_v39 }
 0x130   :  { %v107_v40 = vpop.eup %106 }
 0x131   :  { %v70_v42 = vmul.f32 %v107_v40, %v42_v16 }
 0x133   :  { %v81_v44 = vmul.f32 %v104_v41, %v70_v42 }
 0x134   :  { %v109_v45 = vpop.eup %108 }
 0x135   :  { %v111_v46 = vpop.eup %110  ;;  %v92_v47 = vadd.f32 %v105_v43, %v81_v44  ;;  %v71_v48 = vmul.f32 %v109_v45, %v43_v23 }
 0x136   :  { %v72_v49 = vmul.f32 %v111_v46, %v44_v17 }
 0x137   :  { %96 = vst [vmem:[%s185_s4] sm:$0xff] %v92_v47  ;;  %v82_v50 = vmul.f32 %v104_v41, %v71_v48 }
 0x138   :  { %v113_v51 = vpop.eup %112  ;;  %v83_v52 = vmul.f32 %v104_v41, %v72_v49 }
 0x139   :  { %v93_v53 = vadd.f32 %v105_v43, %v82_v50  ;;  %v73_v54 = vmul.f32 %v113_v51, %v45_v25 }
 0x13a   :  { %v94_v55 = vadd.f32 %v105_v43, %v83_v52 }
 0x13b   :  { %97 = vst [vmem:[%s185_s4 + $0x8] sm:$0xff] %v93_v53  ;;  %v84_v56 = vmul.f32 %v104_v41, %v73_v54 }
 0x13c   :  { %98 = vst [vmem:[%s185_s4 + $0x10] sm:$0xff] %v94_v55 }
 0x13d   :  { %v95_v57 = vadd.f32 %v105_v43, %v84_v56 }
 0x13f   :  { %99 = vst [vmem:[%s185_s4 + $0x18] sm:$0xff] %v95_v57 }

// kernel: transformer_forward.44
= control target key start
LH: loop header
LB: loop body
LE: loop exit
PB: predicated region body
PF: predicated region fallthrough
CT: control target
= control target key end

     0   :  { %s444_s1 = inlined_call_operand.vmem [shape: bf16[256,128], index: 1, kind: input, shape index: {}]   ;;  %s445_s0 = inlined_call_operand.vmem [shape: bf16[32,256], index: 0, kind: input, shape index: {}]   ;;  %s446_s2 = inlined_call_operand.vmem [shape: f32[1,128], index: 2, kind: input, shape index: {}]   ;;  %s447_s3 = inlined_call_operand.vmem [shape: f32[32,128], index: 3, kind: output, shape index: {}]  }
   0x1   :  { %v327_v0 = vld [vmem:[%s444_s1 + $0x78] sm:$0xff]   ;;  %v329_v2 = vld [vmem:[%s444_s1 + $0x70] sm:$0xff]   ;;  %v331_v4 = vld [vmem:[%s444_s1 + $0x68] sm:$0xff]  }
   0x2   :  { %v328_v1 = vld [vmem:[%s444_s1 + $0x38] sm:$0xff]   ;;  %283 = vmatprep.subr.bf16.mxu0 %v327_v0  ;;  %311 = vmatprep.subr.bf16.mxu1 %v327_v0  ;;  %v330_v3 = vld [vmem:[%s444_s1 + $0x30] sm:$0xff]   ;;  %v332_v5 = vld [vmem:[%s444_s1 + $0x28] sm:$0xff]  }
   0x3   :  { %284 = vmatpush3.bf16.msra.mxu0 %v328_v1  ;;  %319 = vmatpush3.bf16.msra.mxu1 %v328_v1  ;;  %v333_v6 = vld [vmem:[%s444_s1 + $0x60] sm:$0xff]   ;;  %v335_v8 = vld [vmem:[%s444_s1 + $0x58] sm:$0xff]   ;;  %v337_v10 = vld [vmem:[%s444_s1 + $0x50] sm:$0xff]  }
   0x4   :  { %285 = vmatprep.subr.bf16.mxu0 %v329_v2  ;;  %312 = vmatprep.subr.bf16.mxu1 %v329_v2  ;;  %v334_v7 = vld [vmem:[%s444_s1 + $0x20] sm:$0xff]   ;;  %v336_v9 = vld [vmem:[%s444_s1 + $0x18] sm:$0xff]   ;;  %v338_v13 = vld [vmem:[%s444_s1 + $0x10] sm:$0xff]  }
   0x5   :  { %v345_v11 = vld [vmem:[%s445_s0 + $0x4] ss:$8 sps:$4 sm:$0xff]   ;;  %v348_v12 = vld [vmem:[%s445_s0 + $0x14] ss:$8 sps:$4 sm:$0xff]   ;;  %v343_v18 = vld [vmem:[%s445_s0] ss:$8 sps:$4 sm:$0xff]  }
   0x6   :  { %v339_v14 = vld [vmem:[%s444_s1 + $0x48] sm:$0xff]   ;;  %211 = vmatprep.mubr.bf16.mxu0 %v345_v11  ;;  %219 = vmatprep.mubr.bf16.mxu1 %v348_v12  ;;  %v341_v16 = vld [vmem:[%s444_s1 + $0x40] sm:$0xff]   ;;  %v346_v19 = vld [vmem:[%s445_s0 + $0x10] ss:$8 sps:$4 sm:$0xff]  }
   0x7   :  { %286 = vmatpush3.bf16.msra.mxu0 %v330_v3  ;;  %320 = vmatpush3.bf16.msra.mxu1 %v330_v3  ;;  %v340_v15 = vld [vmem:[%s444_s1 + $0x8] sm:$0xff]   ;;  %v342_v17 = vld [vmem:[%s444_s1] sm:$0xff]  }
   0x8   :  { %287 = vmatprep.subr.bf16.mxu0 %v331_v4  ;;  %313 = vmatprep.subr.bf16.mxu1 %v331_v4  ;;  %v282_v23 = vld [vmem:[%s446_s2] ss:$0 sm:$0xff] }
   0xb   :  { %288 = vmatpush3.bf16.msra.mxu0 %v332_v5  ;;  %321 = vmatpush3.bf16.msra.mxu1 %v332_v5 }
   0xc   :  { %289 = vmatprep.subr.bf16.mxu0 %v333_v6  ;;  %314 = vmatprep.subr.bf16.mxu1 %v333_v6 }
   0xf   :  { %290 = vmatpush3.bf16.msra.mxu0 %v334_v7  ;;  %322 = vmatpush3.bf16.msra.mxu1 %v334_v7 }
  0x10   :  { %291 = vmatprep.subr.bf16.mxu0 %v335_v8  ;;  %315 = vmatprep.subr.bf16.mxu1 %v335_v8 }
  0x13   :  { %292 = vmatpush3.bf16.msra.mxu0 %v336_v9  ;;  %323 = vmatpush3.bf16.msra.mxu1 %v336_v9 }
  0x14   :  { %293 = vmatprep.subr.bf16.mxu0 %v337_v10  ;;  %316 = vmatprep.subr.bf16.mxu1 %v337_v10 }
  0x17   :  { %294 = vmatpush3.bf16.msra.mxu0 %v338_v13  ;;  %324 = vmatpush3.bf16.msra.mxu1 %v338_v13 }
  0x18   :  { %295 = vmatprep.subr.bf16.mxu0 %v339_v14  ;;  %317 = vmatprep.subr.bf16.mxu1 %v339_v14 }
  0x1b   :  { %296 = vmatpush3.bf16.msra.mxu0 %v340_v15  ;;  %325 = vmatpush3.bf16.msra.mxu1 %v340_v15 }
  0x1c   :  { %297 = vmatprep.subr.bf16.mxu0 %v341_v16  ;;  %318 = vmatprep.subr.bf16.mxu1 %v341_v16 }
  0x1f   :  { %298 = vmatpush3.bf16.msra.mxu0 %v342_v17  ;;  %326 = vmatpush3.bf16.msra.mxu1 %v342_v17 }
  0x22   :  { %212 = vmatmul.mubr.bf16.vlgmr.msra.gmra.mxu0 %v343_v18  ;;  %220 = vmatmul.mubr.bf16.vlgmr.msra.gmra.mxu1 %v346_v19 }
  0xe2   :  { %v299_v20 = vpop.f32.mrf.mxu0  ;;  %v305_v21 = vpop.f32.mrf.mxu1 }
  0xe4   :  { %v300_v22 = vpop.f32.mrf.mxu0  ;;  %v306_v24 = vpop.f32.mrf.mxu1 }
  0xe5   :  { %v301_v25 = vadd.f32 %v300_v22, %v299_v20  ;;  %v307_v26 = vadd.f32 %v306_v24, %v305_v21 }
  0xe6   :  { %v302_v27 = vpop.f32.mrf.mxu0  ;;  %v308_v28 = vpop.f32.mrf.mxu1 }
  0xe7   :  { %v250_v29 = vadd.f32 %v301_v25, %v282_v23  ;;  %v252_v30 = vadd.f32 %v307_v26, %v282_v23 }
  0xe8   :  { %v303_v31 = vpop.f32.mrf.mxu0  ;;  %v309_v32 = vpop.f32.mrf.mxu1 }
  0xe9   :  { %254 = vst [vmem:[%s447_s3] sm:$0xff] %v250_v29  ;;  %256 = vst [vmem:[%s447_s3 + $0x10] sm:$0xff] %v252_v30  ;;  %v304_v33 = vadd.f32 %v303_v31, %v302_v27  ;;  %v310_v34 = vadd.f32 %v309_v32, %v308_v28 }
  0xeb   :  { %v251_v35 = vadd.f32 %v304_v33, %v282_v23  ;;  %v253_v36 = vadd.f32 %v310_v34, %v282_v23 }
  0xed   :  { %255 = vst [vmem:[%s447_s3 + $0x8] sm:$0xff] %v251_v35  ;;  %257 = vst [vmem:[%s447_s3 + $0x18] sm:$0xff] %v253_v36 }

// kernel: transformer_forward.43
= control target key start
LH: loop header
LB: loop body
LE: loop exit
PB: predicated region body
PF: predicated region fallthrough
CT: control target
= control target key end

     0   :  { %v356_v1 = vmov 0   ;;  %v229_v19 = vlaneseq  ;;  %s446_s1 = inlined_call_operand.vmem [shape: bf16[128,256], index: 1, kind: input, shape index: {}]   ;;  %s447_s0 = inlined_call_operand.vmem [shape: bf16[32,128], index: 0, kind: input, shape index: {}]   ;;  %s448_s2 = inlined_call_operand.vmem [shape: f32[1,256], index: 2, kind: input, shape index: {}]   ;;  %s449_s3 = inlined_call_operand.vmem [shape: bf16[32,256], index: 3, kind: output, shape index: {}]  }
   0x1   :  { %v330_v0 = vld [vmem:[%s446_s1 + $0x74] ss:$8 sps:$4 sm:$0xff]   ;;  %179 = vmatprep.mubr.bf16.mxu0 %v356_v1  ;;  %189 = vmatprep.mubr.bf16.mxu1 %v356_v1  ;;  %v332_v2 = vld [vmem:[%s446_s1 + $0x70] ss:$8 sps:$4 sm:$0xff]   ;;  %v333_v3 = vld [vmem:[%s446_s1 + $0x64] ss:$8 sps:$4 sm:$0xff]  }
   0x2   :  { %147 = vmatprep.subr.bf16.mxu0 %v330_v0  ;;  %313 = vmatprep.subr.bf16.mxu1 %v330_v0  ;;  %v335_v4 = vld [vmem:[%s446_s1 + $0x60] ss:$8 sps:$4 sm:$0xff]   ;;  %v336_v5 = vld [vmem:[%s446_s1 + $0x54] ss:$8 sps:$4 sm:$0xff]   ;;  %v338_v6 = vld [vmem:[%s446_s1 + $0x50] ss:$8 sps:$4 sm:$0xff]  }
   0x3   :  { %148 = vmatpush1.bf16.msra.mxu0 %v332_v2  ;;  %321 = vmatpush1.bf16.msra.mxu1 %v332_v2  ;;  %v339_v7 = vld [vmem:[%s446_s1 + $0x44] ss:$8 sps:$4 sm:$0xff]   ;;  %v341_v8 = vld [vmem:[%s446_s1 + $0x40] ss:$8 sps:$4 sm:$0xff]   ;;  %v342_v9 = vld [vmem:[%s446_s1 + $0x34] ss:$8 sps:$4 sm:$0xff]  }
   0x4   :  { %149 = vmatprep.subr.bf16.mxu0 %v333_v3  ;;  %314 = vmatprep.subr.bf16.mxu1 %v333_v3  ;;  %v344_v10 = vld [vmem:[%s446_s1 + $0x30] ss:$8 sps:$4 sm:$0xff]   ;;  %v345_v11 = vld [vmem:[%s446_s1 + $0x24] ss:$8 sps:$4 sm:$0xff]   ;;  %v347_v12 = vld [vmem:[%s446_s1 + $0x20] ss:$8 sps:$4 sm:$0xff]  }
   0x5   :  { %v348_v13 = vld [vmem:[%s446_s1 + $0x14] ss:$8 sps:$4 sm:$0xff]   ;;  %v350_v14 = vld [vmem:[%s446_s1 + $0x10] ss:$8 sps:$4 sm:$0xff]   ;;  %v351_v15 = vld [vmem:[%s446_s1 + $0x4] ss:$8 sps:$4 sm:$0xff]  }
   0x6   :  { %v353_v16 = vld [vmem:[%s446_s1] ss:$8 sps:$4 sm:$0xff]   ;;  %v230_v20 = vshrl.u32 %v229_v19, 7 }
   0x7   :  { %150 = vmatpush1.bf16.msra.mxu0 %v335_v4  ;;  %322 = vmatpush1.bf16.msra.mxu1 %v335_v4  ;;  %v354_v17 = vld [vmem:[%s447_s0] sm:$0xff]   ;;  %v355_v18 = vld [vmem:[%s447_s0 + $0x8] sm:$0xff]  }
   0x8   :  { %151 = vmatprep.subr.bf16.mxu0 %v336_v5  ;;  %315 = vmatprep.subr.bf16.mxu1 %v336_v5  ;;  %v231_v21 = vsub.s32 0, %v230_v20  ;;  %v227_v22 = vld [vmem:[%s448_s2] sm:$0x3]  ;;  %v235_v23 = vsub.s32 1, %v230_v20 }
   0xa   :  { %v232_v24 = vrot.slane %v227_v22, %v231_v21  ;;  %v236_v25 = vrot.slane %v227_v22, %v235_v23 }
   0xb   :  { %152 = vmatpush1.bf16.msra.mxu0 %v338_v6  ;;  %323 = vmatpush1.bf16.msra.mxu1 %v338_v6 }
   0xc   :  { %153 = vmatprep.subr.bf16.mxu0 %v339_v7  ;;  %316 = vmatprep.subr.bf16.mxu1 %v339_v7 }
   0xf   :  { %154 = vmatpush1.bf16.msra.mxu0 %v341_v8  ;;  %324 = vmatpush1.bf16.msra.mxu1 %v341_v8 }
  0x10   :  { %155 = vmatprep.subr.bf16.mxu0 %v342_v9  ;;  %317 = vmatprep.subr.bf16.mxu1 %v342_v9 }
  0x13   :  { %156 = vmatpush1.bf16.msra.mxu0 %v344_v10  ;;  %325 = vmatpush1.bf16.msra.mxu1 %v344_v10 }
  0x14   :  { %157 = vmatprep.subr.bf16.mxu0 %v345_v11  ;;  %318 = vmatprep.subr.bf16.mxu1 %v345_v11 }
  0x17   :  { %158 = vmatpush1.bf16.msra.mxu0 %v347_v12  ;;  %326 = vmatpush1.bf16.msra.mxu1 %v347_v12 }
  0x18   :  { %159 = vmatprep.subr.bf16.mxu0 %v348_v13  ;;  %319 = vmatprep.subr.bf16.mxu1 %v348_v13 }
  0x1b   :  { %160 = vmatpush1.bf16.msra.mxu0 %v350_v14  ;;  %327 = vmatpush1.bf16.msra.mxu1 %v350_v14 }
  0x1c   :  { %161 = vmatprep.subr.bf16.mxu0 %v351_v15  ;;  %320 = vmatprep.subr.bf16.mxu1 %v351_v15 }
  0x1f   :  { %162 = vmatpush1.bf16.msra.mxu0 %v353_v16  ;;  %328 = vmatpush1.bf16.msra.mxu1 %v353_v16 }
  0x22   :  { %180 = vmatmul.mubr.bf16.vlgmr.msra.gmra.mxu0 %v354_v17  ;;  %190 = vmatmul.mubr.bf16.vlgmr.msra.gmra.mxu1 %v355_v18 }
  0xe2   :  { %v181_v26 = vpop.f32.mrf.mxu0  ;;  %v191_v27 = vpop.f32.mrf.mxu1 }
  0xe3   :  { %v239_v28 = vadd.f32 %v232_v24, %v181_v26  ;;  %v243_v29 = vadd.f32 %v232_v24, %v191_v27 }
  0xe4   :  { %v183_v30 = vpop.f32.mrf.mxu0  ;;  %v193_v31 = vpop.f32.mrf.mxu1 }
  0xe5   :  { %v240_v32 = vadd.f32 %v236_v25, %v183_v30  ;;  %v244_v33 = vadd.f32 %v236_v25, %v193_v31  ;;  %v247_v36 = vmax.f32 %v239_v28, 0.0  ;;  %v251_v37 = vmax.f32 %v243_v29, 0.0 }
  0xe6   :  { %v185_v34 = vpop.f32.mrf.mxu0  ;;  %v195_v35 = vpop.f32.mrf.mxu1 }
  0xe7   :  { %v248_v38 = vmax.f32 %v240_v32, 0.0  ;;  %v252_v39 = vmax.f32 %v244_v33, 0.0  ;;  %v241_v40 = vadd.f32 %v232_v24, %v185_v34  ;;  %v245_v41 = vadd.f32 %v232_v24, %v195_v35 }
  0xe8   :  { %v187_v42 = vpop.f32.mrf.mxu0  ;;  %v197_v43 = vpop.f32.mrf.mxu1 }
  0xe9   :  { %v309_v44 = vpack.c.bf16 %v248_v38, %v247_v36  ;;  %v311_v45 = vpack.c.bf16 %v252_v39, %v251_v37  ;;  %v242_v46 = vadd.f32 %v236_v25, %v187_v42  ;;  %v246_v47 = vadd.f32 %v236_v25, %v197_v43 }
  0xea   :  { %v249_v48 = vmax.f32 %v241_v40, 0.0  ;;  %v253_v49 = vmax.f32 %v245_v41, 0.0 }
  0xeb   :  { %279 = vst [vmem:[%s449_s3] sm:$0xff] %v309_v44  ;;  %281 = vst [vmem:[%s449_s3 + $0x10] sm:$0xff] %v311_v45  ;;  %v250_v50 = vmax.f32 %v242_v46, 0.0  ;;  %v254_v51 = vmax.f32 %v246_v47, 0.0 }
  0xed   :  { %v310_v52 = vpack.c.bf16 %v250_v50, %v249_v48  ;;  %v312_v53 = vpack.c.bf16 %v254_v51, %v253_v49 }
  0xef   :  { %280 = vst [vmem:[%s449_s3 + $0x8] sm:$0xff] %v310_v52  ;;  %282 = vst [vmem:[%s449_s3 + $0x18] sm:$0xff] %v312_v53 }

// kernel: transformer_forward.58
= control target key start
LH: loop header
LB: loop body
LE: loop exit
PB: predicated region body
PF: predicated region fallthrough
CT: control target
= control target key end

     0   :  { %v348_v1 = vmov 0   ;;  %v229_v19 = vlaneseq  ;;  %s438_s1 = inlined_call_operand.vmem [shape: bf16[128,256], index: 1, kind: input, shape index: {}]   ;;  %s439_s0 = inlined_call_operand.vmem [shape: bf16[32,128], index: 0, kind: input, shape index: {}]   ;;  %s440_s2 = inlined_call_operand.vmem [shape: f32[1,256], index: 2, kind: input, shape index: {}]   ;;  %s441_s3 = inlined_call_operand.vmem [shape: bf16[32,256], index: 3, kind: output, shape index: {}]  }
   0x1   :  { %v322_v0 = vld [vmem:[%s438_s1 + $0x74] ss:$8 sps:$4 sm:$0xff]   ;;  %179 = vmatprep.mubr.bf16.mxu0 %v348_v1  ;;  %189 = vmatprep.mubr.bf16.mxu1 %v348_v1  ;;  %v324_v2 = vld [vmem:[%s438_s1 + $0x70] ss:$8 sps:$4 sm:$0xff]   ;;  %v325_v3 = vld [vmem:[%s438_s1 + $0x64] ss:$8 sps:$4 sm:$0xff]  }
   0x2   :  { %147 = vmatprep.subr.bf16.mxu0 %v322_v0  ;;  %305 = vmatprep.subr.bf16.mxu1 %v322_v0  ;;  %v327_v4 = vld [vmem:[%s438_s1 + $0x60] ss:$8 sps:$4 sm:$0xff]   ;;  %v328_v5 = vld [vmem:[%s438_s1 + $0x54] ss:$8 sps:$4 sm:$0xff]   ;;  %v330_v6 = vld [vmem:[%s438_s1 + $0x50] ss:$8 sps:$4 sm:$0xff]  }
   0x3   :  { %148 = vmatpush1.bf16.msra.mxu0 %v324_v2  ;;  %313 = vmatpush1.bf16.msra.mxu1 %v324_v2  ;;  %v331_v7 = vld [vmem:[%s438_s1 + $0x44] ss:$8 sps:$4 sm:$0xff]   ;;  %v333_v8 = vld [vmem:[%s438_s1 + $0x40] ss:$8 sps:$4 sm:$0xff]   ;;  %v334_v9 = vld [vmem:[%s438_s1 + $0x34] ss:$8 sps:$4 sm:$0xff]  }
   0x4   :  { %149 = vmatprep.subr.bf16.mxu0 %v325_v3  ;;  %306 = vmatprep.subr.bf16.mxu1 %v325_v3  ;;  %v336_v10 = vld [vmem:[%s438_s1 + $0x30] ss:$8 sps:$4 sm:$0xff]   ;;  %v337_v11 = vld [vmem:[%s438_s1 + $0x24] ss:$8 sps:$4 sm:$0xff]   ;;  %v339_v12 = vld [vmem:[%s438_s1 + $0x20] ss:$8 sps:$4 sm:$0xff]  }
   0x5   :  { %v340_v13 = vld [vmem:[%s438_s1 + $0x14] ss:$8 sps:$4 sm:$0xff]   ;;  %v342_v14 = vld [vmem:[%s438_s1 + $0x10] ss:$8 sps:$4 sm:$0xff]   ;;  %v343_v15 = vld [vmem:[%s438_s1 + $0x4] ss:$8 sps:$4 sm:$0xff]  }
   0x6   :  { %v345_v16 = vld [vmem:[%s438_s1] ss:$8 sps:$4 sm:$0xff]   ;;  %v230_v20 = vshrl.u32 %v229_v19, 7 }
   0x7   :  { %150 = vmatpush1.bf16.msra.mxu0 %v327_v4  ;;  %314 = vmatpush1.bf16.msra.mxu1 %v327_v4  ;;  %v346_v17 = vld [vmem:[%s439_s0] sm:$0xff]   ;;  %v347_v18 = vld [vmem:[%s439_s0 + $0x8] sm:$0xff]  }
   0x8   :  { %151 = vmatprep.subr.bf16.mxu0 %v328_v5  ;;  %307 = vmatprep.subr.bf16.mxu1 %v328_v5  ;;  %v231_v21 = vsub.s32 0, %v230_v20  ;;  %v235_v22 = vsub.s32 1, %v230_v20  ;;  %v227_v23 = vld [vmem:[%s440_s2] sm:$0x3] }
   0xa   :  { %v232_v24 = vrot.slane %v227_v23, %v231_v21  ;;  %v236_v25 = vrot.slane %v227_v23, %v235_v22 }
   0xb   :  { %152 = vmatpush1.bf16.msra.mxu0 %v330_v6  ;;  %315 = vmatpush1.bf16.msra.mxu1 %v330_v6 }
   0xc   :  { %153 = vmatprep.subr.bf16.mxu0 %v331_v7  ;;  %308 = vmatprep.subr.bf16.mxu1 %v331_v7 }
   0xf   :  { %154 = vmatpush1.bf16.msra.mxu0 %v333_v8  ;;  %316 = vmatpush1.bf16.msra.mxu1 %v333_v8 }
  0x10   :  { %155 = vmatprep.subr.bf16.mxu0 %v334_v9  ;;  %309 = vmatprep.subr.bf16.mxu1 %v334_v9 }
  0x13   :  { %156 = vmatpush1.bf16.msra.mxu0 %v336_v10  ;;  %317 = vmatpush1.bf16.msra.mxu1 %v336_v10 }
  0x14   :  { %157 = vmatprep.subr.bf16.mxu0 %v337_v11  ;;  %310 = vmatprep.subr.bf16.mxu1 %v337_v11 }
  0x17   :  { %158 = vmatpush1.bf16.msra.mxu0 %v339_v12  ;;  %318 = vmatpush1.bf16.msra.mxu1 %v339_v12 }
  0x18   :  { %159 = vmatprep.subr.bf16.mxu0 %v340_v13  ;;  %311 = vmatprep.subr.bf16.mxu1 %v340_v13 }
  0x1b   :  { %160 = vmatpush1.bf16.msra.mxu0 %v342_v14  ;;  %319 = vmatpush1.bf16.msra.mxu1 %v342_v14 }
  0x1c   :  { %161 = vmatprep.subr.bf16.mxu0 %v343_v15  ;;  %312 = vmatprep.subr.bf16.mxu1 %v343_v15 }
  0x1f   :  { %162 = vmatpush1.bf16.msra.mxu0 %v345_v16  ;;  %320 = vmatpush1.bf16.msra.mxu1 %v345_v16 }
  0x22   :  { %180 = vmatmul.mubr.bf16.vlgmr.msra.gmra.mxu0 %v346_v17  ;;  %190 = vmatmul.mubr.bf16.vlgmr.msra.gmra.mxu1 %v347_v18 }
  0xe2   :  { %v181_v26 = vpop.f32.mrf.mxu0  ;;  %v191_v27 = vpop.f32.mrf.mxu1 }
  0xe3   :  { %v239_v30 = vadd.f32 %v232_v24, %v181_v26  ;;  %v243_v31 = vadd.f32 %v232_v24, %v191_v27 }
  0xe4   :  { %v183_v28 = vpop.f32.mrf.mxu0  ;;  %v193_v29 = vpop.f32.mrf.mxu1 }
  0xe5   :  { %v240_v32 = vadd.f32 %v236_v25, %v183_v28  ;;  %v244_v33 = vadd.f32 %v236_v25, %v193_v29 }
  0xe6   :  { %v185_v34 = vpop.f32.mrf.mxu0  ;;  %v195_v35 = vpop.f32.mrf.mxu1 }
  0xe7   :  { %v301_v36 = vpack.c.bf16 %v240_v32, %v239_v30  ;;  %v303_v37 = vpack.c.bf16 %v244_v33, %v243_v31  ;;  %v241_v40 = vadd.f32 %v232_v24, %v185_v34  ;;  %v245_v41 = vadd.f32 %v232_v24, %v195_v35 }
  0xe8   :  { %v187_v38 = vpop.f32.mrf.mxu0  ;;  %v197_v39 = vpop.f32.mrf.mxu1 }
  0xe9   :  { %271 = vst [vmem:[%s441_s3] sm:$0xff] %v301_v36  ;;  %273 = vst [vmem:[%s441_s3 + $0x10] sm:$0xff] %v303_v37  ;;  %v242_v42 = vadd.f32 %v236_v25, %v187_v38  ;;  %v246_v43 = vadd.f32 %v236_v25, %v197_v39 }
  0xeb   :  { %v302_v44 = vpack.c.bf16 %v242_v42, %v241_v40  ;;  %v304_v45 = vpack.c.bf16 %v246_v43, %v245_v41 }
  0xed   :  { %272 = vst [vmem:[%s441_s3 + $0x8] sm:$0xff] %v302_v44  ;;  %274 = vst [vmem:[%s441_s3 + $0x18] sm:$0xff] %v304_v45 }

// kernel: transformer_forward.54
= control target key start
LH: loop header
LB: loop body
LE: loop exit
PB: predicated region body
PF: predicated region fallthrough
CT: control target
= control target key end

     0   :  { %s1659_s9 = smov 0   ;;  %s1819_s0 = inlined_call_operand.vmem [shape: bf16[2,16,384], index: 0, kind: input, shape index: {}]   ;;  %s1820_s1 = inlined_call_operand.vmem [shape: f32[2,1,16], index: 1, kind: input, shape index: {}]   ;;  %s1821_s2 = inlined_call_operand.vmem [shape: bf16[2,16,128], index: 2, kind: output, shape index: {}]  }
   0x1 LB: > { %s1431_s10 = sadd.s32 4294967295, %s1634_s9   ;;  %p1435_p0 = scmp.ge.s32.totalorder %s1634_s9, 1  ;;  %s1634_s9 = sphi %s1659_s9, %s12_s9  }
   0x2   : > { %p120_p1 = scmp.lt.s32.totalorder %s1634_s9, 3 }
   0x4   : > { %p121_p2 = pnand %p1435_p0, %p120_p1 }
   0x5   : > { %p145_p3 = scmp.lt.s32.totalorder (!%p121_p2), %s1431_s10, 1  ;;  %s1636_s15 = smov (!%p121_p2), 64  }
   0x6   : > { %124 = sbr.rel (%p121_p2) target bundleno = 1256 (0x4e8), region = 28  ;;  %s1637_s16 = smov (!%p121_p2), 96  }
   0x7   : > { %s1638_s17 = smov (!%p121_p2), 32  }
   0xb   : > { %s1823_s10 = smov (!%p145_p3, %s1431_s10), 1  ;;  %v1639_v4 = vmov 0.0   ;;  %vm1640_vm0 = vmmov 0   ;;  %vm300_vm1 = vcmask 261120   ;;  %v488_v41 = vlaneseq }
   0xc   : > { %s1563_s11 = smul.u32 24, %s1823_s10  ;;  %1503 = vmatprep.subr.bf16.mxu0 %v1639_v4  ;;  %1511 = vmatprep.subr.bf16.mxu1 %v1639_v4  ;;  %s152_s20 = scalar_lea.vmem %s1820_s1, %s1823_s10  ;;  %v1641_v45 = vmov 0   ;;  %vm520_vm5 = vcmask 130048   ;;  %vm1351_vm7 = vcmask 523264   ;;  %vm1354_vm8 = vcmask 785408  }
   0xd   : > { %1507 = vmatprep.mubr.msk.bf16.mxu0 %vm1640_vm0, %v1639_v4  ;;  %1515 = vmatprep.mubr.msk.bf16.mxu1 %vm1640_vm0, %v1639_v4  ;;  %v216_v42 = vld [vmem:[%s152_s20] sm:$0x1]  ;;  %v1701_v43 = vshrl.u32 %v488_v41, 7  ;;  %v505_v48 = vand.u32 127, %v488_v41  ;;  %s1471_s21 = sshll.u32 %s1823_s10, 3 }
   0xe   : > { %s1673_s14 = scalar_lea.vmem %s1819_s0, %s1563_s11  ;;  %vm486_vm2 = vcmp.gt.f32.partialorder %v216_v42, 0.0  ;;  %s157_s24 = scalar_lea.vmem %s1821_s2, %s1471_s21 }
   0xf   : > { %v160_v0 = vld [vmem:[%s1673_s14] sm:$0xff]  ;;  %v162_v1 = vld [vmem:[%s1673_s14 + $0xc] sm:$0xff]  ;;  %v490_v44 = vsub.s32 0, %v1701_v43  ;;  %v487_v46 = vsel %vm486_vm2, 1, %v1641_v45  ;;  %vm506_vm4 = vcmp.ge.s32.totalorder %v1701_v43, %v505_v48  ;;  %v503_v49 = vadd.s32 8, %v1701_v43 }
  0x10   : > { %190 = vrot.lane.b32.xlu1 %v160_v0, %s1636_s15  ;;  %184 = vrot.lane.b32.xlu0 %v160_v0, %s1637_s16  ;;  %v164_v2 = vmul.bf16 1043676725, %v160_v0  ;;  %v165_v3 = vmul.bf16 1043676725, %v162_v1  ;;  %v182_v6 = vrot.slane %v160_v0, 4  ;;  %v183_v7 = vrot.slane %v162_v1, 4 }
  0x11   : > { %v491_v47 = vrot.slane %v487_v46, %v490_v44  ;;  %vm507_vm6 = vcmp.ge.s32.totalorder %v503_v49, %v505_v48 }
  0x12   : > { %v1443_v5 = vcombine.low %v164_v2, %v165_v3  ;;  %v1439_v8 = vcombine.low %v182_v6, %v183_v7 }
  0x13   : > { %vm492_vm3 = vcmp.eq.s32.totalorder %v491_v47, 1 }
  0x14   : > { %192 = vrot.lane.b32.xlu1 %v162_v1, %s1636_s15  ;;  %186 = vrot.lane.b32.xlu0 %v162_v1, %s1637_s16 }
  0x18   : > { %196 = vrot.lane.b32.xlu0 %v160_v0, %s1638_s17  ;;  %198 = vrot.lane.b32.xlu1 %v162_v1, %s1638_s17 }
  0x1c   : > { %168 = vrot.lane.b32.xlu0 %v164_v2, %s1637_s16  ;;  %170 = vrot.lane.b32.xlu1 %v165_v3, %s1637_s16 }
  0x20   : > { %172 = vrot.lane.b32.xlu0 %v164_v2, %s1636_s15  ;;  %174 = vrot.lane.b32.xlu1 %v165_v3, %s1636_s15 }
  0x24   : > { %176 = vrot.lane.b32.xlu0 %v164_v2, %s1638_s17  ;;  %178 = vrot.lane.b32.xlu1 %v165_v3, %s1638_s17 }
  0x42   : > { %233 = vxpose.xlu0.c.b16.start.end [1/1] (short) (narrow) %v1439_v8, 32 }
  0x82   : > { %v191_v9 = vpop.permute.xlu1 %190  ;;  %v185_v10 = vpop.permute.xlu0 %184 }
  0x83   : > { %v194_v11 = vrot.slane %v191_v9, 4  ;;  %v188_v14 = vrot.slane %v185_v10, 4 }
  0x86   : > { %v193_v12 = vpop.permute.xlu1 %192  ;;  %v187_v13 = vpop.permute.xlu0 %186 }
  0x87   : > { %v195_v15 = vrot.slane %v193_v12, 4  ;;  %v189_v16 = vrot.slane %v187_v13, 4 }
  0x89   : > { %v1440_v17 = vcombine.low %v188_v14, %v189_v16  ;;  %v1441_v18 = vcombine.low %v194_v11, %v195_v15 }
  0x8a   : > { %v199_v19 = vpop.permute.xlu1 %198  ;;  %v197_v20 = vpop.permute.xlu0 %196 }
  0x8b   : > { %249 = vxpose.xlu1.c.b16.start.end [1/1] (short) (narrow) %v1440_v17, 32  ;;  %265 = vxpose.xlu0.c.b16.start.end [1/1] (short) (narrow) %v1441_v18, 32  ;;  %v201_v21 = vrot.slane %v199_v19, 4  ;;  %v200_v22 = vrot.slane %v197_v20, 4 }
  0x8d   : > { %v1442_v23 = vcombine.low %v200_v22, %v201_v21 }
  0x8e   : > { %v169_v24 = vpop.permute.xlu0 %168  ;;  %v171_v29 = vpop.permute.xlu1 %170 }
  0x8f   : > { %v1445_v37 = vcombine.low %v169_v24, %v171_v29 }
  0x90   : > { %281 = vxpose.xlu0.c.b16.start.end [1/1] (short) (narrow) %v1442_v23, 32 }
  0x92   : > { %v173_v25 = vpop.permute.xlu0 %172  ;;  %v175_v30 = vpop.permute.xlu1 %174 }
  0x93   : > { %v1447_v38 = vcombine.low %v173_v25, %v175_v30 }
  0x96   : > { %v177_v26 = vpop.permute.xlu0 %176  ;;  %v179_v31 = vpop.permute.xlu1 %178 }
  0x97   : > { %v1449_v40 = vcombine.low %v177_v26, %v179_v31  ;;  %v1735_v26 = vld [vmem:[%s1673_s14 + $0x14] sm:$0xf] }
  0xa4   : > { %v241_v27 = vpop.trf.xlu0 }
  0xa8   : > { %v242_v28 = vpop.trf.xlu0 }
  0xa9   : > { %1504 = vmatpush3.bf16.msra.mxu0 %v242_v28 }
  0xaa   : > { %1505 = vmatprep.subr.bf16.mxu0 %v1639_v4 }
  0xad   : > { %1506 = vmatpush3.bf16.msra.mxu0 %v241_v27  ;;  %v1738_v27 = vld [vmem:[%s1673_s14 + $0x8] sm:$0xf] }
  0xae   : > { %1519 = vmatprep.subr.bf16.mxu0 %v1639_v4  ;;  %v1451_v28 = vcombine.low %v1738_v27, %v1735_v26 }
  0xb0   : > { %1508 = vmatmul.mubr.msk.bf16.vlgmr.msra.gmra.mxu0 %vm300_vm1, %v1443_v5 }
  0xb1   : > { %1523 = vmatprep.mubr.msk.bf16.mxu0 %vm1640_vm0, %v1639_v4 }
  0xed   : > { %v257_v32 = vpop.trf.xlu1  ;;  %v273_v33 = vpop.trf.xlu0 }
  0xf1   : > { %v258_v34 = vpop.trf.xlu1  ;;  %v274_v35 = vpop.trf.xlu0 }
  0xf2   : > { %1512 = vmatpush3.bf16.msra.mxu1 %v258_v34  ;;  %1520 = vmatpush3.bf16.msra.mxu0 %v274_v35 }
  0xf3   : > { %1513 = vmatprep.subr.bf16.mxu1 %v1639_v4  ;;  %1521 = vmatprep.subr.bf16.mxu0 %v1639_v4 }
  0xf5   : > { %v289_v36 = vpop.trf.xlu0 }
  0xf6   : > { %1514 = vmatpush3.bf16.msra.mxu1 %v257_v32  ;;  %1522 = vmatpush3.bf16.msra.mxu0 %v273_v33 }
  0xf7   : > { %1527 = vmatprep.subr.bf16.mxu1 %v1639_v4 }
  0xf9   : > { %1516 = vmatmul.mubr.msk.bf16.vlgmr.msra.gmra.mxu1 %vm300_vm1, %v1445_v37  ;;  %v290_v39 = vpop.trf.xlu0  ;;  %1524 = vmatmul.mubr.msk.bf16.vlgmr.msra.gmra.mxu0 %vm300_vm1, %v1447_v38 }
  0xfa   : > { %1528 = vmatpush3.bf16.msra.mxu1 %v290_v39  ;;  %1531 = vmatprep.mubr.msk.bf16.mxu1 %vm1640_vm0, %v1639_v4 }
  0xfb   : > { %1529 = vmatprep.subr.bf16.mxu1 %v1639_v4 }
  0xfe   : > { %1530 = vmatpush3.bf16.msra.mxu1 %v289_v36 }
 0x101   : > { %1532 = vmatmul.mubr.msk.bf16.vlgmr.msra.gmra.mxu1 %vm300_vm1, %v1449_v40 }
 0x170   : > { %v338_v50 = vpop.f32.mrf.mxu0 }
 0x171   : > { %v493_v51 = vsel %vm492_vm3, %v338_v50, -1e+09 }
 0x172   : > { %v1509_v52 = vpop.f32.mrf.mxu0  ;;  %v512_v53 = vsel %vm506_vm4, %v493_v51, -1e+09 }
 0x173   : > { %v521_v54 = vsel %vm520_vm5, %v512_v53, -inf }
 0x174   : > { %522 = vmax.xlane.f32.xlu1 %v521_v54  ;;  %v341_v55 = vpop.f32.mrf.mxu0 }
 0x175   : > { %v494_v56 = vsel %vm492_vm3, %v341_v55, -1e+09 }
 0x176   : > { %v513_v57 = vsel %vm507_vm6, %v494_v56, -1e+09  ;;  %v1510_v58 = vpop.f32.mrf.mxu0 }
 0x177   : > { %v524_v59 = vsel %vm520_vm5, %v513_v57, -inf }
 0x178   : > { %525 = vmax.xlane.f32.xlu0 %v524_v59 }
 0x1b9   : > { %v385_v60 = vpop.f32.mrf.mxu1  ;;  %v432_v61 = vpop.f32.mrf.mxu0 }
 0x1ba   : > { %v495_v62 = vsel %vm492_vm3, %v385_v60, -1e+09  ;;  %v497_v63 = vsel %vm492_vm3, %v432_v61, -1e+09 }
 0x1bb   : > { %v1517_v0 = vpop.f32.mrf.mxu1  ;;  %v1525_v1 = vpop.f32.mrf.mxu0  ;;  %v514_v2 = vsel %vm506_vm4, %v495_v62, -1e+09  ;;  %v516_v3 = vsel %vm506_vm4, %v497_v63, -1e+09 }
 0x1bc   : > { %v527_v4 = vsel %vm520_vm5, %v514_v2, -inf  ;;  %v533_v5 = vsel %vm520_vm5, %v516_v3, -inf }
 0x1bd   : > { %v388_v6 = vpop.f32.mrf.mxu1  ;;  %528 = vmax.xlane.f32.xlu1 %v527_v4  ;;  %534 = vmax.xlane.f32.xlu0 %v533_v5  ;;  %v435_v7 = vpop.f32.mrf.mxu0 }
 0x1be   : > { %v496_v8 = vsel %vm492_vm3, %v388_v6, -1e+09  ;;  %v498_v9 = vsel %vm492_vm3, %v435_v7, -1e+09 }
 0x1bf   : > { %v1518_v10 = vpop.f32.mrf.mxu1  ;;  %v1526_v11 = vpop.f32.mrf.mxu0  ;;  %v515_v12 = vsel %vm507_vm6, %v496_v8, -1e+09  ;;  %v517_v15 = vsel %vm507_vm6, %v498_v9, -1e+09 }
 0x1c0   : > { %v530_v13 = vsel %vm520_vm5, %v515_v12, -inf  ;;  %v536_v20 = vsel %vm520_vm5, %v517_v15, -inf }
 0x1c1   : > { %v479_v14 = vpop.f32.mrf.mxu1  ;;  %531 = vmax.xlane.f32.xlu1 %v530_v13 }
 0x1c2   : > { %v499_v16 = vsel %vm492_vm3, %v479_v14, -1e+09 }
 0x1c3   : > { %v1533_v17 = vpop.f32.mrf.mxu1  ;;  %v518_v18 = vsel %vm506_vm4, %v499_v16, -1e+09 }
 0x1c4   : > { %v539_v19 = vsel %vm520_vm5, %v518_v18, -inf }
 0x1c5   : > { %v482_v21 = vpop.f32.mrf.mxu1  ;;  %540 = vmax.xlane.f32.xlu0 %v539_v19  ;;  %537 = vmax.xlane.f32.xlu1 %v536_v20 }
 0x1c6   : > { %v500_v22 = vsel %vm492_vm3, %v482_v21, -1e+09 }
 0x1c7   : > { %v1534_v23 = vpop.f32.mrf.mxu1  ;;  %v519_v24 = vsel %vm507_vm6, %v500_v22, -1e+09 }
 0x1c8   : > { %v542_v25 = vsel %vm520_vm5, %v519_v24, -inf }
 0x1c9   : > { %543 = vmax.xlane.f32.xlu1 %v542_v25 }
 0x1da   : > { %206 = vrot.lane.b32.xlu1 %v1735_v26, %s1637_s16 }
 0x1db   : > { %204 = vrot.lane.b32.xlu0 %v1738_v27, %s1637_s16 }
 0x1de   : > { %210 = vrot.lane.b32.xlu1 %v1735_v26, %s1636_s15 }
 0x1df   : > { %208 = vrot.lane.b32.xlu0 %v1738_v27, %s1636_s15 }
 0x1e2   : > { %212 = vrot.lane.b32.xlu1 %v1738_v27, %s1638_s17 }
 0x1e3   : > { %214 = vrot.lane.b32.xlu0 %v1735_v26, %s1638_s17 }
 0x1fd   : > { %v523_v29 = vpop.xlane.xlu1 %522 }
 0x1fe   : > { %v545_v30 = vsub.f32 %v512_v53, %v523_v29 }
 0x200   : > { %v553_v31 = vmul.f32 1.442695, %v545_v30 }
 0x201   : > { %v526_v32 = vpop.xlane.xlu0 %525 }
 0x202   : > { %1596 = vpow2.f32 %v553_v31  ;;  %v546_v33 = vsub.f32 %v513_v57, %v526_v32 }
 0x204   : > { %v555_v34 = vmul.f32 1.442695, %v546_v33 }
 0x206   : > { %1598 = vpow2.f32 %v555_v34 }
 0x20f   : > { %v1754_v35 = vpop.eup %1596 }
 0x210   : > { %v569_v36 = vsel %vm520_vm5, %v1754_v35, 0.0 }
 0x211   : > { %570 = vadd.xlane.f32.xlu1 %v569_v36 }
 0x213   : > { %v1758_v37 = vpop.eup %1598 }
 0x214   : > { %v572_v38 = vsel %vm520_vm5, %v1758_v37, 0.0 }
 0x215   : > { %573 = vadd.xlane.f32.xlu0 %v572_v38 }
 0x246   : > { %v529_v39 = vpop.xlane.xlu1 %528  ;;  %v535_v40 = vpop.xlane.xlu0 %534 }
 0x247   : > { %v547_v41 = vsub.f32 %v514_v2, %v529_v39  ;;  %v549_v44 = vsub.f32 %v516_v3, %v535_v40 }
 0x249   : > { %v557_v42 = vmul.f32 1.442695, %v547_v41  ;;  %v561_v47 = vmul.f32 1.442695, %v549_v44 }
 0x24a   : > { %v532_v45 = vpop.xlane.xlu1 %531 }
 0x24b   : > { %1600 = vpow2.f32 %v557_v42  ;;  %v548_v46 = vsub.f32 %v515_v12, %v532_v45 }
 0x24d   : > { %v559_v48 = vmul.f32 1.442695, %v548_v46 }
 0x24e   : > { %v541_v49 = vpop.xlane.xlu0 %540  ;;  %v538_v50 = vpop.xlane.xlu1 %537 }
 0x24f   : > { %1602 = vpow2.f32 %v559_v48  ;;  %v551_v51 = vsub.f32 %v518_v18, %v541_v49  ;;  %v550_v52 = vsub.f32 %v517_v15, %v538_v50 }
 0x250   : > { %1604 = vpow2.f32 %v561_v47 }
 0x251   : > { %v563_v53 = vmul.f32 1.442695, %v550_v52  ;;  %v565_v54 = vmul.f32 1.442695, %v551_v51 }
 0x252   : > { %v544_v55 = vpop.xlane.xlu1 %543  ;;  %v205_v7 = vpop.permute.xlu0 %204 }
 0x253   : > { %v552_v56 = vsub.f32 %v519_v24, %v544_v55  ;;  %1606 = vpow2.f32 %v563_v53 }
 0x254   : > { %1608 = vpow2.f32 %v565_v54 }
 0x255   : > { %v567_v57 = vmul.f32 1.442695, %v552_v56 }
 0x256   : > { %v207_v6 = vpop.permute.xlu1 %206  ;;  %v209_v9 = vpop.permute.xlu0 %208 }
 0x257   : > { %1610 = vpow2.f32 %v567_v57  ;;  %v1452_v10 = vcombine.low %v205_v7, %v207_v6 }
 0x258   : > { %v1601_v58 = vpop.eup %1600 }
 0x259   : > { %v575_v59 = vsel %vm520_vm5, %v1601_v58, 0.0 }
 0x25a   : > { %576 = vadd.xlane.f32.xlu0 %v575_v59  ;;  %v211_v8 = vpop.permute.xlu1 %210  ;;  %v215_v12 = vpop.permute.xlu0 %214 }
 0x25b   : > { %v1453_v14 = vcombine.low %v209_v9, %v211_v8 }
 0x25c   : > { %v1603_v60 = vpop.eup %1602 }
 0x25d   : > { %v578_v61 = vsel %vm520_vm5, %v1603_v60, 0.0  ;;  %v1764_v62 = vpop.eup %1604 }
 0x25e   : > { %579 = vadd.xlane.f32.xlu1 %v578_v61  ;;  %v581_v0 = vsel %vm520_vm5, %v1764_v62, 0.0  ;;  %v213_v11 = vpop.permute.xlu1 %212 }
 0x25f   : > { %v1454_v13 = vcombine.low %v213_v11, %v215_v12  ;;  %v1642_v11 = vmov 1983009808  }
 0x260   : > { %v1766_v63 = vpop.eup %1606  ;;  %v1056_v12 = vunpack.c.l.s4 %v1642_v11 }
 0x261   : > { %v584_v1 = vsel %vm520_vm5, %v1766_v63, 0.0  ;;  %v1772_v2 = vpop.eup %1608 }
 0x262   : > { %582 = vadd.xlane.f32.xlu1 %v581_v0  ;;  %585 = vadd.xlane.f32.xlu0 %v584_v1  ;;  %v587_v5 = vsel %vm520_vm5, %v1772_v2, 0.0 }
 0x264   : > { %v1774_v3 = vpop.eup %1610 }
 0x265   : > { %v590_v4 = vsel %vm520_vm5, %v1774_v3, 0.0 }
 0x266   : > { %591 = vadd.xlane.f32.xlu1 %v590_v4  ;;  %588 = vadd.xlane.f32.xlu0 %v587_v5 }
 0x293   : > { %645 = vxpose.xlu1.c.b16.start.end [1/1] (short) (narrow) %v1452_v10, 32  ;;  %629 = vxpose.xlu0.c.b16.start.end [1/1] (short) (narrow) %v1451_v28, 32 }
 0x298   : > { %677 = vxpose.xlu1.c.b16.start.end [1/1] (short) (narrow) %v1454_v13, 32  ;;  %661 = vxpose.xlu0.c.b16.start.end [1/1] (short) (narrow) %v1453_v14, 32  ;;  %v1643_v13 = vmov 1934713408  }
 0x299   : > { %v1088_v14 = vunpack.c.l.s4 %v1643_v13 }
 0x29a   : > { %v571_v15 = vpop.xlane.xlu1 %570 }
 0x29b   : > { %1612 = vrcp.f32 %v571_v15 }
 0x29e   : > { %v574_v16 = vpop.xlane.xlu0 %573 }
 0x29f   : > { %1614 = vrcp.f32 %v574_v16  ;;  %v1057_v16 = vunpack.c.0.s8 %v1056_v12 }
 0x2a8   : > { %v1613_v17 = vpop.eup %1612 }
 0x2a9   : > { %v601_v19 = vmul.f32 %v1613_v17, %v1754_v35 }
 0x2ac   : > { %v1615_v18 = vpop.eup %1614 }
 0x2ad   : > { %v602_v20 = vmul.f32 %v1615_v18, %v1758_v37  ;;  %v1089_v18 = vunpack.c.0.s8 %v1088_v14 }
 0x2af   : > { %v609_v21 = vpack.c.bf16 %v602_v20, %v601_v19  ;;  %v1060_v19 = vsub.s32 %v1057_v16, %v1701_v43 }
 0x2b1   : > { %1559 = vmatprep.subr.msk.bf16.mxu0 %vm520_vm5, %v609_v21  ;;  %v700_v22 = vsel %vm520_vm5, %v609_v21, 0 }
 0x2b2   : > { %1536 = vmatpush3.bf16.xpose.msra.mxu0 %v700_v22 }
 0x2e3   : > { %v577_v23 = vpop.xlane.xlu0 %576 }
 0x2e4   : > { %1616 = vrcp.f32 %v577_v23 }
 0x2e7   : > { %v580_v24 = vpop.xlane.xlu1 %579 }
 0x2e8   : > { %1618 = vrcp.f32 %v580_v24 }
 0x2eb   : > { %v583_v25 = vpop.xlane.xlu1 %582  ;;  %v586_v26 = vpop.xlane.xlu0 %585 }
 0x2ec   : > { %1620 = vrcp.f32 %v583_v25 }
 0x2ed   : > { %1622 = vrcp.f32 %v586_v26  ;;  %v1092_v26 = vsub.s32 %v1089_v18, %v1701_v43 }
 0x2ef   : > { %v592_v27 = vpop.xlane.xlu1 %591  ;;  %v589_v28 = vpop.xlane.xlu0 %588 }
 0x2f0   : > { %1624 = vrcp.f32 %v592_v27 }
 0x2f1   : > { %1626 = vrcp.f32 %v589_v28  ;;  %v1617_v29 = vpop.eup %1616 }
 0x2f2   : > { %v603_v33 = vmul.f32 %v1617_v29, %v1601_v58 }
 0x2f5   : > { %v1619_v30 = vpop.eup %1618  ;;  %v653_v31 = vpop.trf.xlu1 }
 0x2f6   : > { %v637_v32 = vpop.trf.xlu0  ;;  %v604_v34 = vmul.f32 %v1619_v30, %v1603_v60  ;;  %1543 = vmatprep.mubr.msk.bf16.mxu1 %vm520_vm5, %v653_v31 }
 0x2f7   : > { %1537 = vmatprep.mubr.msk.bf16.mxu0 %vm520_vm5, %v637_v32 }
 0x2f8   : > { %v610_v35 = vpack.c.bf16 %v604_v34, %v603_v33 }
 0x2f9   : > { %v1621_v36 = vpop.eup %1620  ;;  %v654_v46 = vpop.trf.xlu1 }
 0x2fa   : > { %v1623_v37 = vpop.eup %1622  ;;  %v638_v38 = vpop.trf.xlu0  ;;  %1560 = vmatprep.subr.msk.bf16.mxu1 %vm520_vm5, %v610_v35  ;;  %v758_v39 = vsel %vm520_vm5, %v610_v35, 0  ;;  %v605_v40 = vmul.f32 %v1621_v36, %v1764_v62 }
 0x2fb   : > { %1538 = vmatmul.mubr.msk.bf16.vlgmr.msra.gmra.mxu0 %vm520_vm5, %v638_v38  ;;  %1542 = vmatpush3.bf16.xpose.msra.mxu1 %v758_v39  ;;  %v606_v41 = vmul.f32 %v1623_v37, %v1766_v63 }
 0x2fd   : > { %v1625_v42 = vpop.eup %1624  ;;  %v611_v44 = vpack.c.bf16 %v606_v41, %v605_v40  ;;  %v685_v52 = vpop.trf.xlu1 }
 0x2fe   : > { %v1627_v45 = vpop.eup %1626  ;;  %v608_v47 = vmul.f32 %v1625_v42, %v1774_v3  ;;  %v669_v48 = vpop.trf.xlu0 }
 0x2ff   : > { %1561 = vmatprep.subr.msk.bf16.mxu0 %vm520_vm5, %v611_v44  ;;  %v816_v49 = vsel %vm520_vm5, %v611_v44, 0  ;;  %v607_v50 = vmul.f32 %v1627_v45, %v1772_v2  ;;  %1549 = vmatprep.mubr.msk.bf16.mxu0 %vm520_vm5, %v669_v48 }
 0x300   : > { %1548 = vmatpush3.bf16.xpose.msra.mxu0 %v816_v49 }
 0x301   : > { %v612_v51 = vpack.c.bf16 %v608_v47, %v607_v50  ;;  %v686_v55 = vpop.trf.xlu1 }
 0x302   : > { %1544 = vmatmul.mubr.msk.bf16.vlgmr.msra.gmra.mxu1 %vm520_vm5, %v654_v46  ;;  %v670_v54 = vpop.trf.xlu0 }
 0x303   : > { %1562 = vmatprep.subr.msk.bf16.mxu1 %vm520_vm5, %v612_v51  ;;  %v874_v53 = vsel %vm520_vm5, %v612_v51, 0  ;;  %1555 = vmatprep.mubr.msk.bf16.mxu1 %vm520_vm5, %v685_v52 }
 0x304   : > { %1554 = vmatpush3.bf16.xpose.msra.mxu1 %v874_v53 }
 0x307   : > { %1550 = vmatmul.mubr.msk.bf16.vlgmr.msra.gmra.mxu0 %vm520_vm5, %v670_v54 }
 0x30b   : > { %1556 = vmatmul.mubr.msk.bf16.vlgmr.msra.gmra.mxu1 %vm520_vm5, %v686_v55 }
 0x3bb   : > { %v1539_v56 = vpop.f32.mrf.mxu0 }
 0x3bd   : > { %v736_v57 = vpop.f32.mrf.mxu0 }
 0x3be   : > { %925 = vxpose.xlu0.b32.start [1/4] (short) (narrow) %v736_v57, 16 }
 0x3bf   : > { %v1540_v58 = vpop.f32.mrf.mxu0 }
 0x3c1   : > { %v739_v59 = vpop.f32.mrf.mxu0 }
 0x3c2   : > { %926 = vxpose.xlu0.b32.cont [2/4] (short) (narrow) %v739_v59, 16  ;;  %v1545_v60 = vpop.f32.mrf.mxu1 }
 0x3c4   : > { %v794_v61 = vpop.f32.mrf.mxu1 }
 0x3c5   : > { %957 = vxpose.xlu1.b32.start [1/4] (short) (narrow) %v794_v61, 16 }
 0x3c6   : > { %927 = vxpose.xlu0.b32.cont [3/4] (short) (narrow) %v1539_v56, 16  ;;  %v1546_v62 = vpop.f32.mrf.mxu1 }
 0x3c7   : > { %v1551_v63 = vpop.f32.mrf.mxu0 }
 0x3c8   : > { %v797_v0 = vpop.f32.mrf.mxu1 }
 0x3c9   : > { %958 = vxpose.xlu1.b32.cont [2/4] (short) (narrow) %v797_v0, 16  ;;  %v852_v1 = vpop.f32.mrf.mxu0 }
 0x3ca   : > { %928 = vxpose.xlu0.b32.end [4/4] (short) (narrow) %v1540_v58, 16 }
 0x3cb   : > { %v1552_v2 = vpop.f32.mrf.mxu0  ;;  %v1557_v3 = vpop.f32.mrf.mxu1 }
 0x3cd   : > { %959 = vxpose.xlu1.b32.cont [3/4] (short) (narrow) %v1545_v60, 16  ;;  %v855_v4 = vpop.f32.mrf.mxu0  ;;  %v910_v5 = vpop.f32.mrf.mxu1 }
 0x3ce   : > { %989 = vxpose.xlu0.b32.start [1/4] (short) (narrow) %v852_v1, 16 }
 0x3cf   : > { %v1558_v6 = vpop.f32.mrf.mxu1 }
 0x3d1   : > { %960 = vxpose.xlu1.b32.end [4/4] (short) (narrow) %v1546_v62, 16  ;;  %v913_v7 = vpop.f32.mrf.mxu1 }
 0x3d2   : > { %990 = vxpose.xlu0.b32.cont [2/4] (short) (narrow) %v855_v4, 16 }
 0x3d5   : > { %1021 = vxpose.xlu1.b32.start [1/4] (short) (narrow) %v910_v5, 16 }
 0x3d6   : > { %991 = vxpose.xlu0.b32.cont [3/4] (short) (narrow) %v1551_v63, 16 }
 0x3d9   : > { %1022 = vxpose.xlu1.b32.cont [2/4] (short) (narrow) %v913_v7, 16 }
 0x3da   : > { %992 = vxpose.xlu0.b32.end [4/4] (short) (narrow) %v1552_v2, 16 }
 0x3dd   : > { %1023 = vxpose.xlu1.b32.cont [3/4] (short) (narrow) %v1557_v3, 16 }
 0x3e1   : > { %1024 = vxpose.xlu1.b32.end [4/4] (short) (narrow) %v1558_v6, 16 }
 0x43a   : > { %v941_v8 = vpop.trf.xlu0 }
 0x43e   : > { %v942_v10 = vpop.trf.xlu0 }
 0x441   : > { %v973_v9 = vpop.trf.xlu1 }
 0x445   : > { %v974_v15 = vpop.trf.xlu1 }
 0x44a   : > { %v1005_v17 = vpop.trf.xlu0 }
 0x44b   : > { %v1053_v20 = vcombine.low %v941_v8, %v1005_v17  ;;  %v1054_v21 = vcombine.high %v941_v8, %v1005_v17 }
 0x44d   : > { %v1061_v27 = vrot.slane %v1053_v20, %v1060_v19  ;;  %v1068_v28 = vrot.slane %v1054_v21, %v1060_v19 }
 0x44e   : > { %v1006_v23 = vpop.trf.xlu0 }
 0x44f   : > { %v1121_v31 = vcombine.low %v942_v10, %v1006_v23  ;;  %v1122_v32 = vcombine.high %v942_v10, %v1006_v23 }
 0x451   : > { %v1037_v22 = vpop.trf.xlu1  ;;  %v1129_v45 = vrot.slane %v1121_v31, %v1060_v19  ;;  %v1136_v46 = vrot.slane %v1122_v32, %v1060_v19 }
 0x452   : > { %v1069_v24 = vcombine.low %v973_v9, %v1037_v22  ;;  %v1070_v25 = vcombine.high %v973_v9, %v1037_v22 }
 0x454   : > { %v1077_v29 = vrot.slane %v1069_v24, %v1060_v19  ;;  %v1084_v30 = vrot.slane %v1070_v25, %v1060_v19 }
 0x455   : > { %v1038_v33 = vpop.trf.xlu1 }
 0x456   : > { %v1085_v34 = vcombine.low %v1061_v27, %v1077_v29  ;;  %v1086_v35 = vcombine.high %v1061_v27, %v1077_v29  ;;  %v1101_v36 = vcombine.low %v1068_v28, %v1084_v30  ;;  %v1102_v37 = vcombine.high %v1068_v28, %v1084_v30 }
 0x457   : > { %v1137_v38 = vcombine.low %v974_v15, %v1038_v33  ;;  %v1138_v39 = vcombine.high %v974_v15, %v1038_v33 }
 0x458   : > { %v1093_v40 = vrot.slane %v1085_v34, %v1092_v26  ;;  %v1100_v41 = vrot.slane %v1086_v35, %v1092_v26  ;;  %v1109_v42 = vrot.slane %v1101_v36, %v1092_v26  ;;  %v1116_v44 = vrot.slane %v1102_v37, %v1092_v26 }
 0x459   : > { %v1145_v43 = vrot.slane %v1137_v38, %v1060_v19  ;;  %v1152_v47 = vrot.slane %v1138_v39, %v1060_v19 }
 0x45a   : > { %v1189_v48 = vcombine.low %v1093_v40, %v1100_v41  ;;  %v1463_v49 = vcombine.high %v1093_v40, %v1100_v41  ;;  %v1205_v50 = vcombine.low %v1109_v42, %v1116_v44  ;;  %v1464_v51 = vcombine.high %v1109_v42, %v1116_v44 }
 0x45b   : > { %v1153_v52 = vcombine.low %v1129_v45, %v1145_v43  ;;  %v1154_v53 = vcombine.high %v1129_v45, %v1145_v43  ;;  %v1169_v54 = vcombine.low %v1136_v46, %v1152_v47  ;;  %v1170_v55 = vcombine.high %v1136_v46, %v1152_v47 }
 0x45c   : > { %v1196_v56 = vrot.slane %v1189_v48, %v1060_v19  ;;  %v1204_v57 = vrot.slane %v1463_v49, %v1060_v19  ;;  %v1212_v58 = vrot.slane %v1205_v50, %v1060_v19  ;;  %v1220_v59 = vrot.slane %v1464_v51, %v1060_v19 }
 0x45d   : > { %v1161_v60 = vrot.slane %v1153_v52, %v1092_v26  ;;  %v1168_v61 = vrot.slane %v1154_v53, %v1092_v26  ;;  %v1177_v62 = vrot.slane %v1169_v54, %v1092_v26  ;;  %v1184_v63 = vrot.slane %v1170_v55, %v1092_v26 }
 0x45e   : > { %v1222_v0 = vcombine.high %v1196_v56, %v1204_v57  ;;  %v1238_v1 = vcombine.high %v1212_v58, %v1220_v59  ;;  %v1221_v2 = vcombine.low %v1196_v56, %v1204_v57  ;;  %v1237_v3 = vcombine.low %v1212_v58, %v1220_v59 }
 0x45f   : > { %v1257_v4 = vcombine.low %v1161_v60, %v1168_v61  ;;  %v1465_v5 = vcombine.high %v1161_v60, %v1168_v61  ;;  %v1273_v6 = vcombine.low %v1177_v62, %v1184_v63  ;;  %v1466_v7 = vcombine.high %v1177_v62, %v1184_v63 }
 0x460   : > { %v1229_v8 = vrot.slane %v1221_v2, %v1092_v26  ;;  %v1245_v9 = vrot.slane %v1237_v3, %v1092_v26  ;;  %v1236_v14 = vrot.slane %v1222_v0, %v1092_v26  ;;  %v1252_v15 = vrot.slane %v1238_v1, %v1092_v26 }
 0x461   : > { %v1264_v10 = vrot.slane %v1257_v4, %v1060_v19  ;;  %v1272_v11 = vrot.slane %v1465_v5, %v1060_v19  ;;  %v1280_v12 = vrot.slane %v1273_v6, %v1060_v19  ;;  %v1288_v13 = vrot.slane %v1466_v7, %v1060_v19 }
 0x462   : > { %v1253_v16 = vcombine.low %v1229_v8, %v1245_v9  ;;  %v1255_v27 = vcombine.low %v1236_v14, %v1252_v15  ;;  %v1254_v29 = vcombine.high %v1229_v8, %v1245_v9  ;;  %v1256_v34 = vcombine.high %v1236_v14, %v1252_v15 }
 0x463   : > { %v1290_v17 = vcombine.high %v1264_v10, %v1272_v11  ;;  %v1306_v18 = vcombine.high %v1280_v12, %v1288_v13  ;;  %v1289_v20 = vcombine.low %v1264_v10, %v1272_v11  ;;  %v1305_v21 = vcombine.low %v1280_v12, %v1288_v13 }
 0x465   : > { %v1304_v22 = vrot.slane %v1290_v17, %v1092_v26  ;;  %v1320_v23 = vrot.slane %v1306_v18, %v1092_v26  ;;  %v1297_v24 = vrot.slane %v1289_v20, %v1092_v26  ;;  %v1313_v25 = vrot.slane %v1305_v21, %v1092_v26 }
 0x467   : > { %v1323_v28 = vcombine.low %v1304_v22, %v1320_v23  ;;  %v1322_v30 = vcombine.high %v1297_v24, %v1313_v25  ;;  %v1321_v31 = vcombine.low %v1297_v24, %v1313_v25  ;;  %v1324_v19 = vcombine.high %v1304_v22, %v1320_v23 }
 0x469   : > { %v1585_v32 = vpack.i.bf16 %v1323_v28, %v1255_v27  ;;  %v1580_v33 = vpack.i.bf16 %v1322_v30, %v1254_v29  ;;  %v1590_v35 = vpack.i.bf16 %v1324_v19, %v1256_v34 }
 0x46b   : > { %1586 = vrot.lane.b32.xlu1 %v1585_v32, %s1636_s15  ;;  %1581 = vrot.lane.b32.xlu0 %v1580_v33, %s1638_s17 }
 0x46f   : > { %1591 = vrot.lane.b32.xlu1 %v1590_v35, %s1637_s16 }
 0x4dd   : > { %v1587_v36 = vpop.permute.xlu1 %1586  ;;  %v1582_v37 = vpop.permute.xlu0 %1581 }
 0x4de   : > { %v1584_v26 = vunpack.i.h.bf16 %v1582_v37  ;;  %v1583_v38 = vunpack.i.l.bf16 %v1582_v37  ;;  %v1589_v39 = vunpack.i.h.bf16 %v1587_v36  ;;  %v1588_v40 = vunpack.i.l.bf16 %v1587_v36 }
 0x4e0   : > { %v1349_v41 = vsel %vm300_vm1, %v1253_v16, %v1583_v38  ;;  %v1350_v42 = vsel %vm300_vm1, %v1321_v31, %v1584_v26 }
 0x4e1   : > { %v1592_v44 = vpop.permute.xlu1 %1591  ;;  %v1352_v43 = vsel %vm1351_vm7, %v1349_v41, %v1588_v40  ;;  %v1353_v47 = vsel %vm1351_vm7, %v1350_v42, %v1589_v39 }
 0x4e2   : > { %v1594_v45 = vunpack.i.h.bf16 %v1592_v44  ;;  %v1593_v46 = vunpack.i.l.bf16 %v1592_v44 }
 0x4e4   : > { %v1355_v48 = vsel %vm1354_vm8, %v1352_v43, %v1593_v46  ;;  %v1356_v49 = vsel %vm1354_vm8, %v1353_v47, %v1594_v45 }
 0x4e5   : > { %v1477_v50 = vpack.c.bf16 %v1356_v49, %v1355_v48 }
 0x4e7   : > { %1478 = vst [vmem:[%s157_s24] sm:$0xff] %v1477_v50  }
 0x4e8 PF: > { %s12_s9 = sadd.s32 1, %s1634_s9  }
 0x4e9   : > { %p9_p4 = scmp.ge.s32.totalorder %s12_s9, 4  }
 0x4eb   :  { %11 = sbr.rel (!%p9_p4) target bundleno = 1 (0x1), region = 61 }

// kernel: transformer_forward.57
= control target key start
LH: loop header
LB: loop body
LE: loop exit
PB: predicated region body
PF: predicated region fallthrough
CT: control target
= control target key end

     0   :  { %s335_s1 = inlined_call_operand.vmem [shape: bf16[128,128], index: 1, kind: input, shape index: {}]   ;;  %s336_s0 = inlined_call_operand.vmem [shape: bf16[32,128], index: 0, kind: input, shape index: {}]   ;;  %s337_s2 = inlined_call_operand.vmem [shape: f32[1,128], index: 2, kind: input, shape index: {}]   ;;  %s338_s3 = inlined_call_operand.vmem [shape: bf16[32,128], index: 3, kind: output, shape index: {}]  }
   0x1   :  { %v266_v0 = vld [vmem:[%s335_s1 + $0x38] sm:$0xff]   ;;  %v267_v1 = vld [vmem:[%s335_s1 + $0x30] sm:$0xff]   ;;  %v268_v2 = vld [vmem:[%s335_s1 + $0x28] sm:$0xff]  }
   0x2   :  { %246 = vmatprep.subr.bf16.mxu0 %v266_v0  ;;  %v269_v3 = vld [vmem:[%s335_s1 + $0x20] sm:$0xff]   ;;  %v270_v5 = vld [vmem:[%s335_s1 + $0x18] sm:$0xff]   ;;  %v271_v6 = vld [vmem:[%s335_s1 + $0x10] sm:$0xff]  }
   0x3   :  { %247 = vmatpush3.bf16.msra.mxu0 %v266_v0  ;;  %v274_v4 = vld [vmem:[%s336_s0] sm:$0xff]   ;;  %v272_v7 = vld [vmem:[%s335_s1 + $0x8] sm:$0xff]  }
   0x4   :  { %248 = vmatprep.subr.bf16.mxu0 %v267_v1  ;;  %262 = vmatprep.mubr.bf16.mxu0 %v274_v4  ;;  %v273_v8 = vld [vmem:[%s335_s1] sm:$0xff]   ;;  %v275_v9 = vld [vmem:[%s336_s0 + $0x8] sm:$0xff]  }
   0x5   :  { %v216_v11 = vld [vmem:[%s337_s2] ss:$0 sm:$0xff] }
   0x7   :  { %249 = vmatpush3.bf16.msra.mxu0 %v267_v1 }
   0x8   :  { %250 = vmatprep.subr.bf16.mxu0 %v268_v2 }
   0xb   :  { %251 = vmatpush3.bf16.msra.mxu0 %v268_v2 }
   0xc   :  { %252 = vmatprep.subr.bf16.mxu0 %v269_v3 }
   0xf   :  { %253 = vmatpush3.bf16.msra.mxu0 %v269_v3 }
  0x10   :  { %254 = vmatprep.subr.bf16.mxu0 %v270_v5 }
  0x13   :  { %255 = vmatpush3.bf16.msra.mxu0 %v270_v5 }
  0x14   :  { %256 = vmatprep.subr.bf16.mxu0 %v271_v6 }
  0x17   :  { %257 = vmatpush3.bf16.msra.mxu0 %v271_v6 }
  0x18   :  { %258 = vmatprep.subr.bf16.mxu0 %v272_v7 }
  0x1b   :  { %259 = vmatpush3.bf16.msra.mxu0 %v272_v7 }
  0x1c   :  { %260 = vmatprep.subr.bf16.mxu0 %v273_v8 }
  0x1f   :  { %261 = vmatpush3.bf16.msra.mxu0 %v273_v8 }
  0x22   :  { %263 = vmatmul.mubr.bf16.vlgmr.msra.gmra.mxu0 %v275_v9 }
  0xe2   :  { %v264_v10 = vpop.f32.mrf.mxu0 }
  0xe3   :  { %v180_v14 = vadd.f32 %v264_v10, %v216_v11 }
  0xe4   :  { %v141_v12 = vpop.f32.mrf.mxu0 }
  0xe5   :  { %v178_v17 = vadd.f32 %v216_v11, %v141_v12 }
  0xe6   :  { %v265_v13 = vpop.f32.mrf.mxu0 }
  0xe7   :  { %v181_v15 = vadd.f32 %v265_v13, %v216_v11 }
  0xe8   :  { %v144_v16 = vpop.f32.mrf.mxu0 }
  0xe9   :  { %v233_v18 = vpack.c.bf16 %v181_v15, %v180_v14  ;;  %v179_v19 = vadd.f32 %v216_v11, %v144_v16 }
  0xeb   :  { %235 = vst [vmem:[%s338_s3 + $0x8] sm:$0xff] %v233_v18   ;;  %v228_v20 = vpack.c.bf16 %v179_v19, %v178_v17 }
  0xed   :  { %229 = vst [vmem:[%s338_s3] sm:$0xff] %v228_v20  }

// kernel: transformer_forward.77
= control target key start
LH: loop header
LB: loop body
LE: loop exit
PB: predicated region body
PF: predicated region fallthrough
CT: control target
= control target key end

     0   :  { %v358_v2 = vmov 0   ;;  %s442_s0 = inlined_call_operand.vmem [shape: bf16[32,128], index: 0, kind: input, shape index: {}]   ;;  %s443_s1 = inlined_call_operand.vmem [shape: bf16[128,256], index: 1, kind: input, shape index: {}]   ;;  %s444_s2 = inlined_call_operand.vmem [shape: f32[1,256], index: 2, kind: input, shape index: {}]   ;;  %s445_s3 = inlined_call_operand.hbm [shape: f32[32,256], index: 3, kind: output, shape index: {}]  }
   0x1   :  { %v310_v0 = vld [vmem:[%s443_s1 + $0x74] ss:$8 sps:$4 sm:$0xff]   ;;  %v312_v1 = vld [vmem:[%s443_s1 + $0x70] ss:$8 sps:$4 sm:$0xff]   ;;  %180 = vmatprep.mubr.bf16.mxu0 %v358_v2  ;;  %190 = vmatprep.mubr.bf16.mxu1 %v358_v2  ;;  %v313_v3 = vld [vmem:[%s443_s1 + $0x64] ss:$8 sps:$4 sm:$0xff]  }
   0x2   :  { %148 = vmatprep.subr.bf16.mxu0 %v310_v0  ;;  %290 = vmatprep.subr.bf16.mxu1 %v310_v0  ;;  %v315_v4 = vld [vmem:[%s443_s1 + $0x60] ss:$8 sps:$4 sm:$0xff]   ;;  %v316_v5 = vld [vmem:[%s443_s1 + $0x54] ss:$8 sps:$4 sm:$0xff]   ;;  %v318_v6 = vld [vmem:[%s443_s1 + $0x50] ss:$8 sps:$4 sm:$0xff]  }
   0x3   :  { %149 = vmatpush1.bf16.msra.mxu0 %v312_v1  ;;  %298 = vmatpush1.bf16.msra.mxu1 %v312_v1  ;;  %v319_v7 = vld [vmem:[%s443_s1 + $0x44] ss:$8 sps:$4 sm:$0xff]   ;;  %v321_v8 = vld [vmem:[%s443_s1 + $0x40] ss:$8 sps:$4 sm:$0xff]   ;;  %v322_v9 = vld [vmem:[%s443_s1 + $0x34] ss:$8 sps:$4 sm:$0xff]  }
   0x4   :  { %150 = vmatprep.subr.bf16.mxu0 %v313_v3  ;;  %291 = vmatprep.subr.bf16.mxu1 %v313_v3 }
   0x7   :  { %151 = vmatpush1.bf16.msra.mxu0 %v315_v4  ;;  %299 = vmatpush1.bf16.msra.mxu1 %v315_v4 }
   0x8   :  { %152 = vmatprep.subr.bf16.mxu0 %v316_v5  ;;  %292 = vmatprep.subr.bf16.mxu1 %v316_v5 }
   0xb   :  { %153 = vmatpush1.bf16.msra.mxu0 %v318_v6  ;;  %300 = vmatpush1.bf16.msra.mxu1 %v318_v6 }
   0xc   :  { %154 = vmatprep.subr.bf16.mxu0 %v319_v7  ;;  %293 = vmatprep.subr.bf16.mxu1 %v319_v7 }
   0xd   :  { %8 = vsyncpa [#allocation4], 0  ;;  %v324_v10 = vld [vmem:[%s443_s1 + $0x30] ss:$8 sps:$4 sm:$0xff]   ;;  %v325_v11 = vld [vmem:[%s443_s1 + $0x24] ss:$8 sps:$4 sm:$0xff]   ;;  %v230_v19 = vlaneseq }
   0xe   :  { %v327_v12 = vld [vmem:[%s443_s1 + $0x20] ss:$8 sps:$4 sm:$0xff]   ;;  %v328_v13 = vld [vmem:[%s443_s1 + $0x14] ss:$8 sps:$4 sm:$0xff]   ;;  %v330_v14 = vld [vmem:[%s443_s1 + $0x10] ss:$8 sps:$4 sm:$0xff]  }
   0xf   :  { %155 = vmatpush1.bf16.msra.mxu0 %v321_v8  ;;  %301 = vmatpush1.bf16.msra.mxu1 %v321_v8  ;;  %v331_v15 = vld [vmem:[%s443_s1 + $0x4] ss:$8 sps:$4 sm:$0xff]   ;;  %v333_v16 = vld [vmem:[%s443_s1] ss:$8 sps:$4 sm:$0xff]   ;;  %v231_v20 = vshrl.u32 %v230_v19, 7 }
  0x10   :  { %156 = vmatprep.subr.bf16.mxu0 %v322_v9  ;;  %294 = vmatprep.subr.bf16.mxu1 %v322_v9  ;;  %v334_v17 = vld [vmem:[%s442_s0] sm:$0xff]   ;;  %v335_v18 = vld [vmem:[%s442_s0 + $0x8] sm:$0xff]   ;;  %s359_s0 = smov [#allocation3]  }
  0x11   :  { %v232_v21 = vsub.s32 0, %v231_v20  ;;  %v228_v22 = vld [vmem:[%s444_s2] sm:$0x3]  ;;  %v236_v23 = vsub.s32 1, %v231_v20  ;;  %s261_s1 = sshll.u32 %s359_s0, 4  ;;  %s262_s1 = int_to_ptr.vmem [resolvable:$true] %s261_s1 }
  0x12   :  { %s336_s2 = scalar_lea.vmem %s262_s1, 1024  ;;  %p341_p1 = scmp.lt.s32.totalorder %s262_s1, %s262_s1 }
  0x13   :  { %157 = vmatpush1.bf16.msra.mxu0 %v324_v10  ;;  %302 = vmatpush1.bf16.msra.mxu1 %v324_v10  ;;  %v233_v24 = vrot.slane %v228_v22, %v232_v21  ;;  %v237_v25 = vrot.slane %v228_v22, %v236_v23  ;;  %p337_p0 = scmp.ne.s32.totalorder %s262_s1, %s336_s2  ;;  %p342_p2 = scmp.lt.s32.totalorder %s336_s2, %s336_s2 }
  0x14   :  { %158 = vmatprep.subr.bf16.mxu0 %v325_v11  ;;  %295 = vmatprep.subr.bf16.mxu1 %v325_v11 }
  0x15   :  { %p343_p3 = por %p342_p2, %p341_p1 }
  0x17   :  { %159 = vmatpush1.bf16.msra.mxu0 %v327_v12  ;;  %303 = vmatpush1.bf16.msra.mxu1 %v327_v12  ;;  %p344_p4 = pnand %p343_p3, %p337_p0 }
  0x18   :  { %160 = vmatprep.subr.bf16.mxu0 %v328_v13  ;;  %296 = vmatprep.subr.bf16.mxu1 %v328_v13 }
  0x1b   :  { %161 = vmatpush1.bf16.msra.mxu0 %v330_v14  ;;  %304 = vmatpush1.bf16.msra.mxu1 %v330_v14 }
  0x1c   :  { %162 = vmatprep.subr.bf16.mxu0 %v331_v15  ;;  %297 = vmatprep.subr.bf16.mxu1 %v331_v15 }
  0x1f   :  { %163 = vmatpush1.bf16.msra.mxu0 %v333_v16  ;;  %305 = vmatpush1.bf16.msra.mxu1 %v333_v16 }
  0x22   :  { %181 = vmatmul.mubr.bf16.vlgmr.msra.gmra.mxu0 %v334_v17  ;;  %191 = vmatmul.mubr.bf16.vlgmr.msra.gmra.mxu1 %v335_v18 }
  0xe2   :  { %v182_v26 = vpop.f32.mrf.mxu0  ;;  %v192_v27 = vpop.f32.mrf.mxu1 }
  0xe3   :  { %v240_v28 = vadd.f32 %v233_v24, %v182_v26  ;;  %v244_v29 = vadd.f32 %v233_v24, %v192_v27 }
  0xe4   :  { %v184_v30 = vpop.f32.mrf.mxu0  ;;  %v194_v31 = vpop.f32.mrf.mxu1 }
  0xe5   :  { %248 = vst [vmem:[#allocation3] sm:$0xff] %v240_v28  ;;  %252 = vst [vmem:[#allocation3 + $0x20] sm:$0xff] %v244_v29  ;;  %v241_v32 = vadd.f32 %v237_v25, %v184_v30  ;;  %v245_v33 = vadd.f32 %v237_v25, %v194_v31 }
  0xe6   :  { %v186_v34 = vpop.f32.mrf.mxu0  ;;  %v196_v35 = vpop.f32.mrf.mxu1 }
  0xe7   :  { %249 = vst [vmem:[#allocation3 + $0x8] sm:$0xff] %v241_v32  ;;  %253 = vst [vmem:[#allocation3 + $0x28] sm:$0xff] %v245_v33  ;;  %v242_v36 = vadd.f32 %v233_v24, %v186_v34  ;;  %v246_v37 = vadd.f32 %v233_v24, %v196_v35 }
  0xe8   :  { %v188_v38 = vpop.f32.mrf.mxu0  ;;  %v198_v39 = vpop.f32.mrf.mxu1 }
  0xe9   :  { %250 = vst [vmem:[#allocation3 + $0x10] sm:$0xff] %v242_v36  ;;  %254 = vst [vmem:[#allocation3 + $0x30] sm:$0xff] %v246_v37  ;;  %v243_v40 = vadd.f32 %v237_v25, %v188_v38  ;;  %v247_v41 = vadd.f32 %v237_v25, %v198_v39 }
  0xeb   :  { %251 = vst [vmem:[#allocation3 + $0x18] sm:$0xff] %v243_v40  ;;  %255 = vst [vmem:[#allocation3 + $0x38] sm:$0xff] %v247_v41 }
  0xec   :  { %347 = shalt.err (!%p344_p4)
}
  0xed   :  { %s360_s23 = smov 256   ;;  %s361_s24 = smov 16  }
  0xee   :  { %267 = dma.vmem_to_hbm [thread:$0]  %s262_s1, 1024, %s445_s3, [#allocation4], %s360_s23, %s360_s23, %s361_s24  }
  0xef   :  { %356 = dma.done.wait [#allocation4], 1024  }
  0xf0   :  { %357 = vsyncadd [#allocation4], 4294966272 }
  0xf1   :  { %271 = vsyncpa [#allocation4], 1 }

// kernel: transformer_forward.59
= control target key start
LH: loop header
LB: loop body
LE: loop exit
PB: predicated region body
PF: predicated region fallthrough
CT: control target
= control target key end

     0   :  { %s1694_s12 = smov 0   ;;  %s1839_s0 = inlined_call_operand.vmem [shape: bf16[2,16,128], index: 0, kind: input, shape index: {}]   ;;  %s1840_s1 = inlined_call_operand.vmem [shape: bf16[2,16,256], index: 1, kind: input, shape index: {}]   ;;  %s1841_s2 = inlined_call_operand.vmem [shape: f32[2,1,16], index: 2, kind: input, shape index: {}]   ;;  %s1842_s3 = inlined_call_operand.vmem [shape: bf16[2,16,128], index: 3, kind: output, shape index: {}]  }
   0x1 LB: > { %s1457_s13 = sadd.s32 4294967295, %s1664_s12   ;;  %p1461_p0 = scmp.ge.s32.totalorder %s1664_s12, 1  ;;  %s1664_s12 = sphi %s1694_s12, %s13_s12  }
   0x2   : > { %p155_p1 = scmp.lt.s32.totalorder %s1664_s12, 3 }
   0x4   : > { %p156_p2 = pnand %p1461_p0, %p155_p1 }
   0x5   : > { %p187_p3 = scmp.lt.s32.totalorder (!%p156_p2), %s1457_s13, 1  ;;  %s1666_s19 = smov (!%p156_p2), 64  }
   0x6   : > { %159 = sbr.rel (%p156_p2) target bundleno = 1252 (0x4e4), region = 32  ;;  %s1667_s20 = smov (!%p156_p2), 96  }
   0x7   : > { %s1668_s24 = smov (!%p156_p2), 32  }
   0xb   : > { %s1844_s13 = smov (!%p187_p3, %s1457_s13), 1  ;;  %v1669_v6 = vmov 0.0   ;;  %vm1670_vm0 = vmmov 0   ;;  %vm333_vm1 = vcmask 261120   ;;  %v521_v44 = vlaneseq }
   0xc   : > { %s1501_s14 = sshll.u32 %s1844_s13, 4  ;;  %s1500_s18 = sshll.u32 %s1844_s13, 3  ;;  %1534 = vmatprep.subr.bf16.mxu0 %v1669_v6  ;;  %1542 = vmatprep.subr.bf16.mxu1 %v1669_v6  ;;  %v1671_v48 = vmov 0   ;;  %vm534_vm4 = vcmask 130048   ;;  %vm1365_vm5 = vcmask 523264   ;;  %vm1368_vm6 = vcmask 785408  }
   0xd   : > { %s196_s17 = scalar_lea.vmem %s1840_s1, %s1501_s14  ;;  %s191_s23 = scalar_lea.vmem %s1839_s0, %s1500_s18  ;;  %1538 = vmatprep.mubr.msk.bf16.mxu0 %vm1670_vm0, %v1669_v6  ;;  %1546 = vmatprep.mubr.msk.bf16.mxu1 %vm1670_vm0, %v1669_v6  ;;  %v1768_v46 = vshrl.u32 %v521_v44, 7 }
   0xe   : > { %v1708_v0 = vld [vmem:[%s196_s17] sm:$0xff]  ;;  %v1715_v1 = vld [vmem:[%s196_s17 + $0x8] sm:$0xff]  ;;  %s199_s27 = scalar_lea.vmem %s1841_s2, %s1844_s13  ;;  %s204_s30 = scalar_lea.vmem %s1842_s3, %s1500_s18 }
   0xf   : > { %233 = vrot.lane.b32.xlu1 %v1708_v0, %s1666_s19  ;;  %229 = vrot.lane.b32.xlu0 %v1708_v0, %s1667_s20  ;;  %v207_v2 = vld [vmem:[%s191_s23] sm:$0xf]  ;;  %v208_v3 = vld [vmem:[%s191_s23 + $0x4] sm:$0xf]  ;;  %v1468_v8 = vcombine.low %v1708_v0, %v1715_v1  ;;  %v523_v47 = vsub.s32 0, %v1768_v46 }
  0x10   : > { %v209_v4 = vmul.bf16 1043676725, %v207_v2  ;;  %v210_v5 = vmul.bf16 1043676725, %v208_v3  ;;  %v249_v45 = vld [vmem:[%s199_s27] sm:$0x1] }
  0x11   : > { %vm519_vm2 = vcmp.gt.f32.partialorder %v249_v45, 0.0 }
  0x12   : > { %v1472_v7 = vcombine.low %v209_v4, %v210_v5  ;;  %v520_v49 = vsel %vm519_vm2, 1, %v1671_v48 }
  0x13   : > { %235 = vrot.lane.b32.xlu1 %v1715_v1, %s1666_s19  ;;  %231 = vrot.lane.b32.xlu0 %v1715_v1, %s1667_s20  ;;  %v524_v50 = vrot.slane %v520_v49, %v523_v47 }
  0x15   : > { %vm525_vm3 = vcmp.eq.s32.totalorder %v524_v50, 1 }
  0x17   : > { %237 = vrot.lane.b32.xlu0 %v1708_v0, %s1668_s24  ;;  %239 = vrot.lane.b32.xlu1 %v1715_v1, %s1668_s24 }
  0x1b   : > { %213 = vrot.lane.b32.xlu0 %v209_v4, %s1667_s20  ;;  %215 = vrot.lane.b32.xlu1 %v210_v5, %s1667_s20 }
  0x1f   : > { %217 = vrot.lane.b32.xlu0 %v209_v4, %s1666_s19  ;;  %219 = vrot.lane.b32.xlu1 %v210_v5, %s1666_s19 }
  0x23   : > { %221 = vrot.lane.b32.xlu0 %v209_v4, %s1668_s24  ;;  %223 = vrot.lane.b32.xlu1 %v210_v5, %s1668_s24 }
  0x41   : > { %266 = vxpose.xlu0.c.b16.start.end [1/1] (short) (narrow) %v1468_v8, 32 }
  0x81   : > { %v234_v9 = vpop.permute.xlu1 %233  ;;  %v230_v10 = vpop.permute.xlu0 %229 }
  0x82   : > { %v245_v11 = vrot.slane %v234_v9, 4  ;;  %v243_v12 = vrot.slane %v230_v10, 4 }
  0x85   : > { %v236_v13 = vpop.permute.xlu1 %235  ;;  %v232_v14 = vpop.permute.xlu0 %231 }
  0x86   : > { %v246_v15 = vrot.slane %v236_v13, 4  ;;  %v244_v16 = vrot.slane %v232_v14, 4  ;;  %v1469_v17 = vcombine.low %v230_v10, %v232_v14  ;;  %v1470_v18 = vcombine.low %v234_v9, %v236_v13 }
  0x88   : > { %v1744_v19 = vcombine.low %v243_v12, %v244_v16  ;;  %282 = vxpose.xlu1.c.b16.start.end [1/1] (short) (narrow) %v1469_v17, 32  ;;  %298 = vxpose.xlu0.c.b16.start.end [1/1] (short) (narrow) %v1470_v18, 32  ;;  %v1746_v20 = vcombine.low %v245_v11, %v246_v15 }
  0x89   : > { %v240_v21 = vpop.permute.xlu1 %239  ;;  %v238_v22 = vpop.permute.xlu0 %237 }
  0x8a   : > { %v248_v23 = vrot.slane %v240_v21, 4  ;;  %v247_v24 = vrot.slane %v238_v22, 4  ;;  %v1471_v25 = vcombine.low %v238_v22, %v240_v21 }
  0x8c   : > { %v1748_v26 = vcombine.low %v247_v24, %v248_v23 }
  0x8d   : > { %314 = vxpose.xlu0.c.b16.start.end [1/1] (short) (narrow) %v1471_v25, 32  ;;  %v214_v27 = vpop.permute.xlu0 %213  ;;  %v216_v32 = vpop.permute.xlu1 %215 }
  0x8e   : > { %v1474_v40 = vcombine.low %v214_v27, %v216_v32 }
  0x91   : > { %v218_v28 = vpop.permute.xlu0 %217  ;;  %v220_v33 = vpop.permute.xlu1 %219 }
  0x92   : > { %v1476_v41 = vcombine.low %v218_v28, %v220_v33 }
  0x95   : > { %v222_v29 = vpop.permute.xlu0 %221  ;;  %v224_v34 = vpop.permute.xlu1 %223 }
  0x96   : > { %v1478_v43 = vcombine.low %v222_v29, %v224_v34 }
  0xa3   : > { %v274_v30 = vpop.trf.xlu0 }
  0xa7   : > { %v275_v31 = vpop.trf.xlu0 }
  0xa8   : > { %1535 = vmatpush3.bf16.msra.mxu0 %v275_v31 }
  0xa9   : > { %1536 = vmatprep.subr.bf16.mxu0 %v1669_v6 }
  0xac   : > { %1537 = vmatpush3.bf16.msra.mxu0 %v274_v30 }
  0xad   : > { %1550 = vmatprep.subr.bf16.mxu0 %v1669_v6 }
  0xaf   : > { %1539 = vmatmul.mubr.msk.bf16.vlgmr.msra.gmra.mxu0 %vm333_vm1, %v1472_v7 }
  0xb0   : > { %1554 = vmatprep.mubr.msk.bf16.mxu0 %vm1670_vm0, %v1669_v6 }
  0xea   : > { %v290_v35 = vpop.trf.xlu1  ;;  %v306_v36 = vpop.trf.xlu0 }
  0xee   : > { %v291_v37 = vpop.trf.xlu1  ;;  %v307_v38 = vpop.trf.xlu0 }
  0xef   : > { %1543 = vmatpush3.bf16.msra.mxu1 %v291_v37  ;;  %1551 = vmatpush3.bf16.msra.mxu0 %v307_v38 }
  0xf0   : > { %1544 = vmatprep.subr.bf16.mxu1 %v1669_v6  ;;  %1552 = vmatprep.subr.bf16.mxu0 %v1669_v6 }
  0xf2   : > { %v322_v39 = vpop.trf.xlu0 }
  0xf3   : > { %1545 = vmatpush3.bf16.msra.mxu1 %v290_v35  ;;  %1553 = vmatpush3.bf16.msra.mxu0 %v306_v36 }
  0xf4   : > { %1558 = vmatprep.subr.bf16.mxu1 %v1669_v6 }
  0xf6   : > { %1547 = vmatmul.mubr.msk.bf16.vlgmr.msra.gmra.mxu1 %vm333_vm1, %v1474_v40  ;;  %v323_v42 = vpop.trf.xlu0  ;;  %1555 = vmatmul.mubr.msk.bf16.vlgmr.msra.gmra.mxu0 %vm333_vm1, %v1476_v41 }
  0xf7   : > { %1559 = vmatpush3.bf16.msra.mxu1 %v323_v42  ;;  %1562 = vmatprep.mubr.msk.bf16.mxu1 %vm1670_vm0, %v1669_v6 }
  0xf8   : > { %1560 = vmatprep.subr.bf16.mxu1 %v1669_v6 }
  0xfb   : > { %1561 = vmatpush3.bf16.msra.mxu1 %v322_v39 }
  0xfe   : > { %1563 = vmatmul.mubr.msk.bf16.vlgmr.msra.gmra.mxu1 %vm333_vm1, %v1478_v43 }
 0x16f   : > { %v371_v51 = vpop.f32.mrf.mxu0 }
 0x170   : > { %v526_v52 = vsel %vm525_vm3, %v371_v51, -1e+09 }
 0x171   : > { %v1540_v53 = vpop.f32.mrf.mxu0  ;;  %v535_v54 = vsel %vm534_vm4, %v526_v52, -inf }
 0x172   : > { %536 = vmax.xlane.f32.xlu1 %v535_v54 }
 0x173   : > { %v374_v55 = vpop.f32.mrf.mxu0 }
 0x174   : > { %v527_v56 = vsel %vm525_vm3, %v374_v55, -1e+09 }
 0x175   : > { %v538_v57 = vsel %vm534_vm4, %v527_v56, -inf  ;;  %v1541_v58 = vpop.f32.mrf.mxu0 }
 0x176   : > { %539 = vmax.xlane.f32.xlu0 %v538_v57 }
 0x1b6   : > { %v418_v59 = vpop.f32.mrf.mxu1  ;;  %v465_v60 = vpop.f32.mrf.mxu0 }
 0x1b7   : > { %v528_v61 = vsel %vm525_vm3, %v418_v59, -1e+09  ;;  %v530_v62 = vsel %vm525_vm3, %v465_v60, -1e+09 }
 0x1b8   : > { %v1548_v63 = vpop.f32.mrf.mxu1  ;;  %v1556_v2 = vpop.f32.mrf.mxu0  ;;  %v541_v3 = vsel %vm534_vm4, %v528_v61, -inf  ;;  %v547_v4 = vsel %vm534_vm4, %v530_v62, -inf }
 0x1b9   : > { %542 = vmax.xlane.f32.xlu1 %v541_v3  ;;  %548 = vmax.xlane.f32.xlu0 %v547_v4  ;;  %v241_v3 = vrot.slane %v1708_v0, 4  ;;  %v242_v4 = vrot.slane %v1715_v1, 4 }
 0x1ba   : > { %v421_v5 = vpop.f32.mrf.mxu1  ;;  %v468_v6 = vpop.f32.mrf.mxu0 }
 0x1bb   : > { %v529_v7 = vsel %vm525_vm3, %v421_v5, -1e+09  ;;  %v531_v11 = vsel %vm525_vm3, %v468_v6, -1e+09  ;;  %v1480_v5 = vcombine.low %v241_v3, %v242_v4  ;;  %v1673_v4 = vmov 1934713408  }
 0x1bc   : > { %v1549_v8 = vpop.f32.mrf.mxu1  ;;  %v1557_v9 = vpop.f32.mrf.mxu0  ;;  %v544_v10 = vsel %vm534_vm4, %v529_v7, -inf  ;;  %v550_v16 = vsel %vm534_vm4, %v531_v11, -inf }
 0x1bd   : > { %545 = vmax.xlane.f32.xlu1 %v544_v10 }
 0x1be   : > { %v512_v12 = vpop.f32.mrf.mxu1 }
 0x1bf   : > { %v532_v13 = vsel %vm525_vm3, %v512_v12, -1e+09 }
 0x1c0   : > { %v1564_v14 = vpop.f32.mrf.mxu1  ;;  %v553_v15 = vsel %vm534_vm4, %v532_v13, -inf }
 0x1c1   : > { %554 = vmax.xlane.f32.xlu0 %v553_v15  ;;  %551 = vmax.xlane.f32.xlu1 %v550_v16 }
 0x1c2   : > { %v515_v17 = vpop.f32.mrf.mxu1 }
 0x1c3   : > { %v533_v18 = vsel %vm525_vm3, %v515_v17, -1e+09 }
 0x1c4   : > { %v1565_v21 = vpop.f32.mrf.mxu1  ;;  %v556_v22 = vsel %vm534_vm4, %v533_v18, -inf }
 0x1c5   : > { %557 = vmax.xlane.f32.xlu1 %v556_v22 }
 0x1fb   : > { %v537_v23 = vpop.xlane.xlu1 %536 }
 0x1fc   : > { %v559_v24 = vsub.f32 %v526_v52, %v537_v23 }
 0x1fe   : > { %v567_v25 = vmul.f32 1.442695, %v559_v24 }
 0x1ff   : > { %v540_v27 = vpop.xlane.xlu0 %539 }
 0x200   : > { %1626 = vpow2.f32 %v567_v25  ;;  %v560_v28 = vsub.f32 %v527_v56, %v540_v27 }
 0x202   : > { %v569_v29 = vmul.f32 1.442695, %v560_v28 }
 0x204   : > { %1628 = vpow2.f32 %v569_v29 }
 0x20d   : > { %v1627_v30 = vpop.eup %1626 }
 0x20e   : > { %v583_v31 = vsel %vm534_vm4, %v1627_v30, 0.0 }
 0x20f   : > { %584 = vadd.xlane.f32.xlu0 %v583_v31 }
 0x211   : > { %v1629_v32 = vpop.eup %1628 }
 0x212   : > { %v586_v33 = vsel %vm534_vm4, %v1629_v32, 0.0 }
 0x213   : > { %587 = vadd.xlane.f32.xlu1 %v586_v33 }
 0x242   : > { %v543_v34 = vpop.xlane.xlu1 %542  ;;  %v549_v35 = vpop.xlane.xlu0 %548 }
 0x243   : > { %v561_v36 = vsub.f32 %v528_v61, %v543_v34  ;;  %v563_v37 = vsub.f32 %v530_v62, %v549_v35 }
 0x245   : > { %v571_v38 = vmul.f32 1.442695, %v561_v36  ;;  %v575_v39 = vmul.f32 1.442695, %v563_v37 }
 0x246   : > { %v546_v40 = vpop.xlane.xlu1 %545 }
 0x247   : > { %1630 = vpow2.f32 %v571_v38  ;;  %v562_v41 = vsub.f32 %v529_v7, %v546_v40 }
 0x248   : > { %1632 = vpow2.f32 %v575_v39 }
 0x249   : > { %v573_v42 = vmul.f32 1.442695, %v562_v41 }
 0x24a   : > { %v555_v43 = vpop.xlane.xlu0 %554  ;;  %v552_v44 = vpop.xlane.xlu1 %551 }
 0x24b   : > { %1634 = vpow2.f32 %v573_v42  ;;  %v565_v45 = vsub.f32 %v532_v13, %v555_v43  ;;  %v564_v47 = vsub.f32 %v531_v11, %v552_v44 }
 0x24d   : > { %v579_v48 = vmul.f32 1.442695, %v565_v45  ;;  %v577_v49 = vmul.f32 1.442695, %v564_v47 }
 0x24e   : > { %v558_v50 = vpop.xlane.xlu1 %557 }
 0x24f   : > { %1636 = vpow2.f32 %v579_v48  ;;  %v566_v51 = vsub.f32 %v533_v18, %v558_v50 }
 0x250   : > { %1638 = vpow2.f32 %v577_v49 }
 0x251   : > { %v581_v52 = vmul.f32 1.442695, %v566_v51 }
 0x253   : > { %1640 = vpow2.f32 %v581_v52 }
 0x254   : > { %v1631_v53 = vpop.eup %1630 }
 0x255   : > { %v589_v54 = vsel %vm534_vm4, %v1631_v53, 0.0  ;;  %v1790_v55 = vpop.eup %1632 }
 0x256   : > { %590 = vadd.xlane.f32.xlu0 %v589_v54  ;;  %v595_v57 = vsel %vm534_vm4, %v1790_v55, 0.0 }
 0x258   : > { %v1635_v56 = vpop.eup %1634 }
 0x259   : > { %v592_v58 = vsel %vm534_vm4, %v1635_v56, 0.0 }
 0x25a   : > { %596 = vadd.xlane.f32.xlu0 %v595_v57  ;;  %593 = vadd.xlane.f32.xlu1 %v592_v58 }
 0x25c   : > { %v1795_v59 = vpop.eup %1636 }
 0x25d   : > { %v1639_v60 = vpop.eup %1638  ;;  %v601_v61 = vsel %vm534_vm4, %v1795_v59, 0.0 }
 0x25e   : > { %602 = vadd.xlane.f32.xlu0 %v601_v61  ;;  %v598_v62 = vsel %vm534_vm4, %v1639_v60, 0.0 }
 0x25f   : > { %599 = vadd.xlane.f32.xlu1 %v598_v62 }
 0x260   : > { %v1641_v63 = vpop.eup %1640 }
 0x261   : > { %v604_v2 = vsel %vm534_vm4, %v1641_v63, 0.0 }
 0x263   : > { %605 = vadd.xlane.f32.xlu1 %v604_v2  ;;  %v1672_v2 = vmov 1983009808  }
 0x264   : > { %v1070_v3 = vunpack.c.l.s4 %v1672_v2 }
 0x28b   : > { %643 = vxpose.xlu0.c.b16.start.end [1/1] (short) (narrow) %v1480_v5, 32  ;;  %v1102_v5 = vunpack.c.l.s4 %v1673_v4 }
 0x290   : > { %659 = vxpose.xlu1.c.b16.start.end [1/1] (short) (narrow) %v1744_v19, 32  ;;  %675 = vxpose.xlu0.c.b16.start.end [1/1] (short) (narrow) %v1746_v20, 32 }
 0x295   : > { %691 = vxpose.xlu1.c.b16.start.end [1/1] (short) (narrow) %v1748_v26, 32 }
 0x298   : > { %v585_v6 = vpop.xlane.xlu0 %584 }
 0x299   : > { %1642 = vrcp.f32 %v585_v6 }
 0x29c   : > { %v588_v7 = vpop.xlane.xlu1 %587 }
 0x29d   : > { %1644 = vrcp.f32 %v588_v7  ;;  %v1071_v7 = vunpack.c.0.s8 %v1070_v3 }
 0x2a6   : > { %v1643_v8 = vpop.eup %1642 }
 0x2a7   : > { %v615_v10 = vmul.f32 %v1643_v8, %v1627_v30 }
 0x2aa   : > { %v1645_v9 = vpop.eup %1644 }
 0x2ab   : > { %v616_v11 = vmul.f32 %v1645_v9, %v1629_v32  ;;  %v1103_v9 = vunpack.c.0.s8 %v1102_v5 }
 0x2ad   : > { %v623_v12 = vpack.c.bf16 %v616_v11, %v615_v10  ;;  %v1074_v10 = vsub.s32 %v1071_v7, %v1768_v46 }
 0x2af   : > { %1590 = vmatprep.subr.msk.bf16.mxu0 %vm534_vm4, %v623_v12  ;;  %v714_v0 = vsel %vm534_vm4, %v623_v12, 0 }
 0x2b0   : > { %1567 = vmatpush3.bf16.xpose.msra.mxu0 %v714_v0 }
 0x2df   : > { %v591_v1 = vpop.xlane.xlu0 %590 }
 0x2e0   : > { %1646 = vrcp.f32 %v591_v1 }
 0x2e3   : > { %v597_v19 = vpop.xlane.xlu0 %596  ;;  %v594_v20 = vpop.xlane.xlu1 %593 }
 0x2e4   : > { %1648 = vrcp.f32 %v594_v20 }
 0x2e5   : > { %1650 = vrcp.f32 %v597_v19 }
 0x2e7   : > { %v603_v26 = vpop.xlane.xlu0 %602 }
 0x2e8   : > { %v600_v13 = vpop.xlane.xlu1 %599 }
 0x2e9   : > { %1652 = vrcp.f32 %v600_v13 }
 0x2ea   : > { %1654 = vrcp.f32 %v603_v26  ;;  %v1106_v26 = vsub.s32 %v1103_v9, %v1768_v46 }
 0x2ec   : > { %v606_v14 = vpop.xlane.xlu1 %605 }
 0x2ed   : > { %1656 = vrcp.f32 %v606_v14  ;;  %v651_v15 = vpop.trf.xlu0  ;;  %v1647_v16 = vpop.eup %1646 }
 0x2ee   : > { %1568 = vmatprep.mubr.msk.bf16.mxu0 %vm534_vm4, %v651_v15  ;;  %v617_v22 = vmul.f32 %v1647_v16, %v1631_v53 }
 0x2f1   : > { %v652_v17 = vpop.trf.xlu0  ;;  %v1649_v18 = vpop.eup %1648 }
 0x2f2   : > { %1569 = vmatmul.mubr.msk.bf16.vlgmr.msra.gmra.mxu0 %vm534_vm4, %v652_v17  ;;  %v667_v21 = vpop.trf.xlu1  ;;  %v618_v23 = vmul.f32 %v1649_v18, %v1635_v56  ;;  %v1651_v24 = vpop.eup %1650 }
 0x2f3   : > { %1574 = vmatprep.mubr.msk.bf16.mxu1 %vm534_vm4, %v667_v21  ;;  %v619_v30 = vmul.f32 %v1651_v24, %v1790_v55 }
 0x2f4   : > { %v624_v25 = vpack.c.bf16 %v618_v23, %v617_v22 }
 0x2f5   : > { %v683_v27 = vpop.trf.xlu0 }
 0x2f6   : > { %v1653_v28 = vpop.eup %1652  ;;  %1580 = vmatprep.mubr.msk.bf16.mxu0 %vm534_vm4, %v683_v27  ;;  %1591 = vmatprep.subr.msk.bf16.mxu1 %vm534_vm4, %v624_v25  ;;  %v772_v29 = vsel %vm534_vm4, %v624_v25, 0  ;;  %v668_v35 = vpop.trf.xlu1 }
 0x2f7   : > { %v620_v31 = vmul.f32 %v1653_v28, %v1639_v60  ;;  %v1655_v32 = vpop.eup %1654  ;;  %1573 = vmatpush3.bf16.xpose.msra.mxu1 %v772_v29 }
 0x2f8   : > { %v621_v37 = vmul.f32 %v1655_v32, %v1795_v59 }
 0x2f9   : > { %v625_v33 = vpack.c.bf16 %v620_v31, %v619_v30  ;;  %v684_v42 = vpop.trf.xlu0 }
 0x2fa   : > { %v1657_v34 = vpop.eup %1656  ;;  %v699_v40 = vpop.trf.xlu1 }
 0x2fb   : > { %1592 = vmatprep.subr.msk.bf16.mxu0 %vm534_vm4, %v625_v33  ;;  %v830_v36 = vsel %vm534_vm4, %v625_v33, 0  ;;  %v622_v38 = vmul.f32 %v1657_v34, %v1641_v63 }
 0x2fc   : > { %1579 = vmatpush3.bf16.xpose.msra.mxu0 %v830_v36 }
 0x2fd   : > { %v626_v39 = vpack.c.bf16 %v622_v38, %v621_v37 }
 0x2fe   : > { %1575 = vmatmul.mubr.msk.bf16.vlgmr.msra.gmra.mxu1 %vm534_vm4, %v668_v35  ;;  %v700_v43 = vpop.trf.xlu1 }
 0x2ff   : > { %1593 = vmatprep.subr.msk.bf16.mxu1 %vm534_vm4, %v626_v39  ;;  %v888_v41 = vsel %vm534_vm4, %v626_v39, 0  ;;  %1586 = vmatprep.mubr.msk.bf16.mxu1 %vm534_vm4, %v699_v40 }
 0x300   : > { %1585 = vmatpush3.bf16.xpose.msra.mxu1 %v888_v41 }
 0x303   : > { %1581 = vmatmul.mubr.msk.bf16.vlgmr.msra.gmra.mxu0 %vm534_vm4, %v684_v42 }
 0x307   : > { %1587 = vmatmul.mubr.msk.bf16.vlgmr.msra.gmra.mxu1 %vm534_vm4, %v700_v43 }
 0x3b2   : > { %v1570_v44 = vpop.f32.mrf.mxu0 }
 0x3b4   : > { %v750_v45 = vpop.f32.mrf.mxu0 }
 0x3b5   : > { %939 = vxpose.xlu0.b32.start [1/4] (short) (narrow) %v750_v45, 16 }
 0x3b6   : > { %v1571_v47 = vpop.f32.mrf.mxu0 }
 0x3b8   : > { %v753_v48 = vpop.f32.mrf.mxu0 }
 0x3b9   : > { %940 = vxpose.xlu0.b32.cont [2/4] (short) (narrow) %v753_v48, 16 }
 0x3bd   : > { %941 = vxpose.xlu0.b32.cont [3/4] (short) (narrow) %v1570_v44, 16 }
 0x3be   : > { %v1576_v49 = vpop.f32.mrf.mxu1 }
 0x3c0   : > { %v808_v50 = vpop.f32.mrf.mxu1 }
 0x3c1   : > { %942 = vxpose.xlu0.b32.end [4/4] (short) (narrow) %v1571_v47, 16  ;;  %971 = vxpose.xlu1.b32.start [1/4] (short) (narrow) %v808_v50, 16 }
 0x3c2   : > { %v1577_v51 = vpop.f32.mrf.mxu1 }
 0x3c3   : > { %v1582_v52 = vpop.f32.mrf.mxu0 }
 0x3c4   : > { %v811_v53 = vpop.f32.mrf.mxu1 }
 0x3c5   : > { %v866_v54 = vpop.f32.mrf.mxu0  ;;  %972 = vxpose.xlu1.b32.cont [2/4] (short) (narrow) %v811_v53, 16 }
 0x3c6   : > { %1003 = vxpose.xlu0.b32.start [1/4] (short) (narrow) %v866_v54, 16 }
 0x3c7   : > { %v1583_v55 = vpop.f32.mrf.mxu0  ;;  %v1588_v57 = vpop.f32.mrf.mxu1 }
 0x3c9   : > { %v869_v56 = vpop.f32.mrf.mxu0  ;;  %973 = vxpose.xlu1.b32.cont [3/4] (short) (narrow) %v1576_v49, 16  ;;  %v924_v58 = vpop.f32.mrf.mxu1 }
 0x3ca   : > { %1004 = vxpose.xlu0.b32.cont [2/4] (short) (narrow) %v869_v56, 16 }
 0x3cb   : > { %v1589_v59 = vpop.f32.mrf.mxu1 }
 0x3cd   : > { %974 = vxpose.xlu1.b32.end [4/4] (short) (narrow) %v1577_v51, 16  ;;  %v927_v60 = vpop.f32.mrf.mxu1 }
 0x3ce   : > { %1005 = vxpose.xlu0.b32.cont [3/4] (short) (narrow) %v1582_v52, 16 }
 0x3d1   : > { %1035 = vxpose.xlu1.b32.start [1/4] (short) (narrow) %v924_v58, 16 }
 0x3d2   : > { %1006 = vxpose.xlu0.b32.end [4/4] (short) (narrow) %v1583_v55, 16 }
 0x3d5   : > { %1036 = vxpose.xlu1.b32.cont [2/4] (short) (narrow) %v927_v60, 16 }
 0x3d9   : > { %1037 = vxpose.xlu1.b32.cont [3/4] (short) (narrow) %v1588_v57, 16 }
 0x3dd   : > { %1038 = vxpose.xlu1.b32.end [4/4] (short) (narrow) %v1589_v59, 16 }
 0x431   : > { %v955_v61 = vpop.trf.xlu0 }
 0x435   : > { %v956_v63 = vpop.trf.xlu0 }
 0x43d   : > { %v987_v62 = vpop.trf.xlu1 }
 0x441   : > { %v988_v6 = vpop.trf.xlu1 }
 0x442   : > { %v1019_v8 = vpop.trf.xlu0 }
 0x443   : > { %v1067_v11 = vcombine.low %v955_v61, %v1019_v8  ;;  %v1068_v12 = vcombine.high %v955_v61, %v1019_v8 }
 0x445   : > { %v1075_v13 = vrot.slane %v1067_v11, %v1074_v10  ;;  %v1082_v14 = vrot.slane %v1068_v12, %v1074_v10 }
 0x446   : > { %v1020_v1 = vpop.trf.xlu0 }
 0x447   : > { %v1135_v17 = vcombine.low %v956_v63, %v1020_v1  ;;  %v1136_v18 = vcombine.high %v956_v63, %v1020_v1 }
 0x449   : > { %v1143_v33 = vrot.slane %v1135_v17, %v1074_v10  ;;  %v1150_v34 = vrot.slane %v1136_v18, %v1074_v10 }
 0x44d   : > { %v1051_v0 = vpop.trf.xlu1 }
 0x44e   : > { %v1083_v19 = vcombine.low %v987_v62, %v1051_v0  ;;  %v1084_v20 = vcombine.high %v987_v62, %v1051_v0 }
 0x450   : > { %v1091_v15 = vrot.slane %v1083_v19, %v1074_v10  ;;  %v1098_v16 = vrot.slane %v1084_v20, %v1074_v10 }
 0x451   : > { %v1052_v21 = vpop.trf.xlu1 }
 0x452   : > { %v1099_v22 = vcombine.low %v1075_v13, %v1091_v15  ;;  %v1100_v23 = vcombine.high %v1075_v13, %v1091_v15  ;;  %v1115_v24 = vcombine.low %v1082_v14, %v1098_v16  ;;  %v1116_v25 = vcombine.high %v1082_v14, %v1098_v16 }
 0x453   : > { %v1151_v27 = vcombine.low %v988_v6, %v1052_v21  ;;  %v1152_v28 = vcombine.high %v988_v6, %v1052_v21 }
 0x454   : > { %v1107_v29 = vrot.slane %v1099_v22, %v1106_v26  ;;  %v1114_v30 = vrot.slane %v1100_v23, %v1106_v26  ;;  %v1123_v31 = vrot.slane %v1115_v24, %v1106_v26  ;;  %v1130_v32 = vrot.slane %v1116_v25, %v1106_v26 }
 0x455   : > { %v1159_v46 = vrot.slane %v1151_v27, %v1074_v10  ;;  %v1166_v35 = vrot.slane %v1152_v28, %v1074_v10 }
 0x456   : > { %v1203_v36 = vcombine.low %v1107_v29, %v1114_v30  ;;  %v1492_v37 = vcombine.high %v1107_v29, %v1114_v30  ;;  %v1219_v38 = vcombine.low %v1123_v31, %v1130_v32  ;;  %v1493_v39 = vcombine.high %v1123_v31, %v1130_v32 }
 0x457   : > { %v1167_v40 = vcombine.low %v1143_v33, %v1159_v46  ;;  %v1168_v41 = vcombine.high %v1143_v33, %v1159_v46  ;;  %v1183_v42 = vcombine.low %v1150_v34, %v1166_v35  ;;  %v1184_v43 = vcombine.high %v1150_v34, %v1166_v35 }
 0x458   : > { %v1210_v44 = vrot.slane %v1203_v36, %v1074_v10  ;;  %v1218_v45 = vrot.slane %v1492_v37, %v1074_v10  ;;  %v1226_v47 = vrot.slane %v1219_v38, %v1074_v10  ;;  %v1234_v48 = vrot.slane %v1493_v39, %v1074_v10 }
 0x459   : > { %v1175_v49 = vrot.slane %v1167_v40, %v1106_v26  ;;  %v1182_v50 = vrot.slane %v1168_v41, %v1106_v26  ;;  %v1191_v51 = vrot.slane %v1183_v42, %v1106_v26  ;;  %v1198_v52 = vrot.slane %v1184_v43, %v1106_v26 }
 0x45a   : > { %v1236_v53 = vcombine.high %v1210_v44, %v1218_v45  ;;  %v1252_v54 = vcombine.high %v1226_v47, %v1234_v48  ;;  %v1235_v55 = vcombine.low %v1210_v44, %v1218_v45  ;;  %v1251_v56 = vcombine.low %v1226_v47, %v1234_v48 }
 0x45b   : > { %v1271_v57 = vcombine.low %v1175_v49, %v1182_v50  ;;  %v1494_v58 = vcombine.high %v1175_v49, %v1182_v50  ;;  %v1287_v59 = vcombine.low %v1191_v51, %v1198_v52  ;;  %v1495_v60 = vcombine.high %v1191_v51, %v1198_v52 }
 0x45c   : > { %v1243_v61 = vrot.slane %v1235_v55, %v1106_v26  ;;  %v1259_v62 = vrot.slane %v1251_v56, %v1106_v26  ;;  %v1250_v5 = vrot.slane %v1236_v53, %v1106_v26  ;;  %v1266_v6 = vrot.slane %v1252_v54, %v1106_v26 }
 0x45d   : > { %v1278_v63 = vrot.slane %v1271_v57, %v1074_v10  ;;  %v1286_v2 = vrot.slane %v1494_v58, %v1074_v10  ;;  %v1294_v3 = vrot.slane %v1287_v59, %v1074_v10  ;;  %v1302_v4 = vrot.slane %v1495_v60, %v1074_v10 }
 0x45e   : > { %v1267_v7 = vcombine.low %v1243_v61, %v1259_v62  ;;  %v1269_v13 = vcombine.low %v1250_v5, %v1266_v6  ;;  %v1268_v15 = vcombine.high %v1243_v61, %v1259_v62  ;;  %v1270_v10 = vcombine.high %v1250_v5, %v1266_v6 }
 0x45f   : > { %v1304_v8 = vcombine.high %v1278_v63, %v1286_v2  ;;  %v1320_v9 = vcombine.high %v1294_v3, %v1302_v4  ;;  %v1303_v11 = vcombine.low %v1278_v63, %v1286_v2  ;;  %v1319_v12 = vcombine.low %v1294_v3, %v1302_v4 }
 0x461   : > { %v1318_v0 = vrot.slane %v1304_v8, %v1106_v26  ;;  %v1334_v1 = vrot.slane %v1320_v9, %v1106_v26  ;;  %v1311_v19 = vrot.slane %v1303_v11, %v1106_v26  ;;  %v1327_v20 = vrot.slane %v1319_v12, %v1106_v26 }
 0x463   : > { %v1337_v14 = vcombine.low %v1318_v0, %v1334_v1  ;;  %v1336_v16 = vcombine.high %v1311_v19, %v1327_v20  ;;  %v1335_v17 = vcombine.low %v1311_v19, %v1327_v20  ;;  %v1338_v22 = vcombine.high %v1318_v0, %v1334_v1 }
 0x465   : > { %v1615_v18 = vpack.i.bf16 %v1337_v14, %v1269_v13  ;;  %v1610_v21 = vpack.i.bf16 %v1336_v16, %v1268_v15  ;;  %v1620_v23 = vpack.i.bf16 %v1338_v22, %v1270_v10 }
 0x467   : > { %1616 = vrot.lane.b32.xlu1 %v1615_v18, %s1666_s19  ;;  %1611 = vrot.lane.b32.xlu0 %v1610_v21, %s1668_s24 }
 0x46b   : > { %1621 = vrot.lane.b32.xlu1 %v1620_v23, %s1667_s20 }
 0x4d9   : > { %v1617_v24 = vpop.permute.xlu1 %1616  ;;  %v1612_v25 = vpop.permute.xlu0 %1611 }
 0x4da   : > { %v1614_v26 = vunpack.i.h.bf16 %v1612_v25  ;;  %v1613_v27 = vunpack.i.l.bf16 %v1612_v25  ;;  %v1619_v28 = vunpack.i.h.bf16 %v1617_v24  ;;  %v1618_v29 = vunpack.i.l.bf16 %v1617_v24 }
 0x4dc   : > { %v1363_v30 = vsel %vm333_vm1, %v1267_v7, %v1613_v27  ;;  %v1364_v31 = vsel %vm333_vm1, %v1335_v17, %v1614_v26 }
 0x4dd   : > { %v1622_v32 = vpop.permute.xlu1 %1621  ;;  %v1366_v46 = vsel %vm1365_vm5, %v1363_v30, %v1618_v29  ;;  %v1367_v35 = vsel %vm1365_vm5, %v1364_v31, %v1619_v28 }
 0x4de   : > { %v1624_v33 = vunpack.i.h.bf16 %v1622_v32  ;;  %v1623_v34 = vunpack.i.l.bf16 %v1622_v32 }
 0x4e0   : > { %v1369_v36 = vsel %vm1368_vm6, %v1366_v46, %v1623_v34  ;;  %v1370_v37 = vsel %vm1368_vm6, %v1367_v35, %v1624_v33 }
 0x4e1   : > { %v1508_v38 = vpack.c.bf16 %v1370_v37, %v1369_v36 }
 0x4e3   : > { %1509 = vst [vmem:[%s204_s30] sm:$0xff] %v1508_v38  }
 0x4e4 PF: > { %s13_s12 = sadd.s32 1, %s1664_s12  }
 0x4e5   : > { %p10_p4 = scmp.ge.s32.totalorder %s13_s12, 4  }
 0x4e7   :  { %12 = sbr.rel (!%p10_p4) target bundleno = 1 (0x1), region = 68 }

</bundles_post_ra>
